<compile_context>
chip_gen: v7x
topology: tpu7x:2x2x1
jax: 0.10.0
libtpu: 0.0.40
codegen_flags: <defaults>
</compile_context>

<pallas_src>
import functools

import jax
import jax.numpy as jnp
from jax.experimental import pallas as pl
from jax.experimental.pallas import tpu as pltpu

_EPS = 1e-5                      # PyTorch BatchNorm default eps
_VMEM_LIMIT = 32 * 1024 * 1024   # explicit scoped-VMEM budget (safe on v5e/v6e/v7x)
_LSTM_CHUNK = 16                 # timesteps per grid step in the recurrent kernel


def _round_up(x, m):
    return (x + m - 1) // m * m


# ----------------------------------------------------------------------------
# Fused tiled matmul + BatchNorm affine + LeakyReLU  (also used as plain matmul
# with scale=1, shift=0, slope=1 for the hoisted LSTM input projection)
# ----------------------------------------------------------------------------

def _matmul_affine_lrelu_kernel(a_ref, w_ref, scale_ref, shift_ref, o_ref, *, slope):
    y = jnp.dot(a_ref[...], w_ref[...], preferred_element_type=jnp.float32)
    y = y * scale_ref[...] + shift_ref[...]
    o_ref[...] = jnp.where(y >= 0.0, y, slope * y)


def matmul_affine_lrelu(a, w, scale, shift, slope):
    """a: (M, K) bf16, w: (K, Cout) bf16, scale/shift: (Cout,) f32 -> (M, Cout) f32."""
    M, K = a.shape
    Cout = w.shape[1]
    tm = min(256, _round_up(M, 32))          # row tile (multiple of 32 -> bf16 friendly)
    mp = _round_up(M, tm)
    if mp != M:
        a = jnp.pad(a, ((0, mp - M), (0, 0)))
    kern = functools.partial(_matmul_affine_lrelu_kernel, slope=float(slope))
    out = pl.pallas_call(
        kern,
        out_shape=jax.ShapeDtypeStruct((mp, Cout), jnp.float32),
        grid=(mp // tm,),
        in_specs=[
            pl.BlockSpec((tm, K), lambda i: (i, 0)),        # activation tiles stream
            pl.BlockSpec((K, Cout), lambda i: (0, 0)),      # weights stay resident
            pl.BlockSpec((1, Cout), lambda i: (0, 0)),
            pl.BlockSpec((1, Cout), lambda i: (0, 0)),
        ],
        out_specs=pl.BlockSpec((tm, Cout), lambda i: (i, 0)),
        compiler_params=pltpu.CompilerParams(
            dimension_semantics=("parallel",),
            vmem_limit_bytes=_VMEM_LIMIT),
    )(a, w, scale.reshape(1, -1).astype(jnp.float32),
      shift.reshape(1, -1).astype(jnp.float32))
    return out[:M]


# ----------------------------------------------------------------------------
# Bidirectional LSTM recurrence (bias=False, PyTorch gate order i, f, g, o).
# The x @ Wih term is precomputed outside (hoisted), only h @ Whh is recurrent.
# ----------------------------------------------------------------------------

def _bilstm_chunk_kernel(gx_ref, whh_ref, out_ref, h_sc, c_sc, *, ct):
    # gx_ref : (ct, 4, N, H) f32  precomputed input-projection gates for this chunk
    # whh_ref: (4, H, H)     bf16 recurrent weights of this direction (resident)
    # out_ref: (ct, N, H)    f32  hidden states, written at original time slots
    d = pl.program_id(0)                 # 0 = forward, 1 = backward

    @pl.when(pl.program_id(1) == 0)      # start of a direction's time sweep
    def _init():
        h_sc[...] = jnp.zeros_like(h_sc)
        c_sc[...] = jnp.zeros_like(c_sc)

    w_i = whh_ref[0]
    w_f = whh_ref[1]
    w_g = whh_ref[2]
    w_o = whh_ref[3]

    def step(j, carry):
        # local time index: forward -> j, backward -> ct-1-j (chunk blocks are already
        # reversed by the index_map, so this lands each h at its original time slot).
        t = j + d * (ct - 1 - 2 * j)
        gx = gx_ref[t]                                   # (4, N, H) f32
        h_bf = h_sc[...].astype(jnp.bfloat16)
        gi = jax.nn.sigmoid(gx[0] + jnp.dot(h_bf, w_i, preferred_element_type=jnp.float32))
        gf = jax.nn.sigmoid(gx[1] + jnp.dot(h_bf, w_f, preferred_element_type=jnp.float32))
        gg = jnp.tanh(gx[2] + jnp.dot(h_bf, w_g, preferred_element_type=jnp.float32))
        go = jax.nn.sigmoid(gx[3] + jnp.dot(h_bf, w_o, preferred_element_type=jnp.float32))
        c = gf * c_sc[...] + gi * gg
        h = go * jnp.tanh(c)
        c_sc[...] = c
        h_sc[...] = h
        out_ref[t] = h
        return carry

    jax.lax.fori_loop(0, ct, step, 0, unroll=True)


def bilstm(gx, whh, ct):
    """gx: (2, Tp, 4, N, H) f32, whh: (2, 4, H, H) bf16 -> (2, Tp, N, H) f32."""
    _, tp, _, n, hid = gx.shape
    ntc = tp // ct
    kern = functools.partial(_bilstm_chunk_kernel, ct=ct)
    return pl.pallas_call(
        kern,
        out_shape=jax.ShapeDtypeStruct((2, tp, n, hid), jnp.float32),
        grid=(2, ntc),
        in_specs=[
            # time blocks run forward for d==0, reversed for d==1 (no HBM reversal)
            pl.BlockSpec((None, ct, 4, n, hid),
                         lambda d, tc: (d, tc + d * (ntc - 1 - 2 * tc), 0, 0, 0)),
            pl.BlockSpec((None, 4, hid, hid), lambda d, tc: (d, 0, 0, 0)),
        ],
        out_specs=pl.BlockSpec((None, ct, n, hid),
                               lambda d, tc: (d, tc + d * (ntc - 1 - 2 * tc), 0, 0)),
        scratch_shapes=[pltpu.VMEM((n, hid), jnp.float32),   # h carry
                        pltpu.VMEM((n, hid), jnp.float32)],  # c carry
        compiler_params=pltpu.CompilerParams(
            dimension_semantics=("parallel", "arbitrary"),   # directions parallel (v7x 2 TCs)
            vmem_limit_bytes=_VMEM_LIMIT),
    )(gx, whh)


# ----------------------------------------------------------------------------
# Fused BatchNorm affine -> Linear(no bias) -> softmax (classes padded to 128 lanes)
# ----------------------------------------------------------------------------

def _bn_fc_softmax_kernel(x_ref, scale_ref, shift_ref, w_ref, o_ref, *, n_valid):
    x = x_ref[...] * scale_ref[...] + shift_ref[...]
    logits = jnp.dot(x.astype(jnp.bfloat16), w_ref[...], preferred_element_type=jnp.float32)
    col = jax.lax.broadcasted_iota(jnp.int32, logits.shape, 1)
    logits = jnp.where(col < n_valid, logits, -jnp.inf)      # mask padded classes
    m = jnp.max(logits, axis=-1, keepdims=True)
    e = jnp.exp(logits - m)
    o_ref[...] = e / jnp.sum(e, axis=-1, keepdims=True)


def bn_fc_softmax(x2d, scale, shift, w_t):
    """x2d: (M, H) f32, scale/shift: (H,), w_t: (H, C) -> softmax probs (M, C)."""
    M, H = x2d.shape
    C = w_t.shape[1]
    cp = _round_up(C, 128)                                   # lane-dense output stores
    wp = jnp.pad(w_t, ((0, 0), (0, cp - C))).astype(jnp.bfloat16)
    tm = min(256, _round_up(M, 8))
    mp = _round_up(M, tm)
    if mp != M:
        x2d = jnp.pad(x2d, ((0, mp - M), (0, 0)))
    kern = functools.partial(_bn_fc_softmax_kernel, n_valid=C)
    out = pl.pallas_call(
        kern,
        out_shape=jax.ShapeDtypeStruct((mp, cp), jnp.float32),
        grid=(mp // tm,),
        in_specs=[
            pl.BlockSpec((tm, H), lambda i: (i, 0)),
            pl.BlockSpec((1, H), lambda i: (0, 0)),
            pl.BlockSpec((1, H), lambda i: (0, 0)),
            pl.BlockSpec((H, cp), lambda i: (0, 0)),
        ],
        out_specs=pl.BlockSpec((tm, cp), lambda i: (i, 0)),
        compiler_params=pltpu.CompilerParams(
            dimension_semantics=("parallel",),
            vmem_limit_bytes=_VMEM_LIMIT),
    )(x2d, scale.reshape(1, -1).astype(jnp.float32),
      shift.reshape(1, -1).astype(jnp.float32), wp)
    return out[:M, :C]


# ----------------------------------------------------------------------------
# Forward pass glue (im2col, weight re-layout, parameter folding)
# ----------------------------------------------------------------------------

def deepspeech_forward(x, params, cfg):
    slope = float(cfg["map"])     # nn.LeakyReLU(map): negative_slope == map (PyTorch quirk)
    nb = x.shape[0]

    # (N, nFreq, L) -> time-major channels-last (T, N, C); kept for the whole network.
    h = jnp.transpose(x, (2, 0, 1)).astype(jnp.float32)

    # --- CNN stack: Conv1d -> BN -> LeakyReLU (im2col + fused matmul kernel) ---
    # TODO(synk): fold im2col into the conv kernel (per-tap strided slices) so the input
    #             is read once instead of K times when building patches.
    for li in range(cfg["cnn_layers"]):
        stride = cfg["stride"] if li == 0 else (1 if cfg["nDownsample"] == 1 else cfg["stride"])
        W, b, gamma, beta, rm, rv = params["conv"][li]
        Cout, Cin, K = W.shape
        tin = h.shape[0]
        tout = (tin - K) // stride + 1
        idx = jnp.arange(tout)[:, None] * stride + jnp.arange(K)[None, :]   # (Tout, K)
        p = h[idx]                                          # (Tout, K, N, Cin)
        p = p.transpose(0, 2, 1, 3).reshape(tout * nb, K * Cin)
        w2 = jnp.transpose(W, (2, 1, 0)).reshape(K * Cin, Cout)
        scale = gamma / jnp.sqrt(rv + _EPS)
        shift = scale * (b - rm) + beta                     # conv bias folded into BN shift
        y = matmul_affine_lrelu(p.astype(jnp.bfloat16), w2.astype(jnp.bfloat16),
                                scale, shift, slope)        # (Tout*N, Cout) f32
        h = y.reshape(tout, nb, Cout)                       # stays (T, N, C)

    # --- bidirectional LSTM stack (direction sum, bias=False) ---
    hid = cfg["hidden"]
    ct = _LSTM_CHUNK
    for li in range(cfg["rnn_layers"]):
        prm = params["rnn"][li]
        if prm["bn"] is not None:                           # SequenceWise BatchNorm1d (eval)
            gamma, beta, rm, rv = prm["bn"]
            s = gamma / jnp.sqrt(rv + _EPS)
            h = h * s + (beta - rm * s)
        T, _, isz = h.shape

        # (dir, gate, in, hid) weight layout, PyTorch gate order (i, f, g, o)
        wih = jnp.stack([prm["wih_f"], prm["wih_b"]], 0).reshape(2, 4, hid, isz)
        wih = wih.transpose(0, 1, 3, 2)                     # (2, 4, I, H)
        whh = jnp.stack([prm["whh_f"], prm["whh_b"]], 0).reshape(2, 4, hid, hid)
        whh = whh.transpose(0, 1, 3, 2)                     # (2, 4, H, H)

        # Hoisted input projection: single MXU matmul for both directions / all gates.
        wih2d = wih.transpose(2, 0, 1, 3).reshape(isz, 2 * 4 * hid)
        ones = jnp.ones((2 * 4 * hid,), jnp.float32)
        zeros = jnp.zeros((2 * 4 * hid,), jnp.float32)
        gx2d = matmul_affine_lrelu(h.reshape(T * nb, isz).astype(jnp.bfloat16),
                                   wih2d.astype(jnp.bfloat16), ones, zeros, 1.0)
        gx = gx2d.reshape(T, nb, 2, 4, hid).transpose(2, 0, 3, 1, 4)   # (2, T, 4, N, H)

        tp = _round_up(T, ct)
        if tp != T:
            # Zero gx in padded steps keeps (h, c) exactly zero there (bias-free LSTM),
            # so the backward direction's state is unaffected by the padding.
            gx = jnp.pad(gx, ((0, 0), (0, tp - T), (0, 0), (0, 0), (0, 0)))
        out2 = bilstm(gx, whh.astype(jnp.bfloat16), ct)     # (2, Tp, N, H)
        h = out2[0, :T] + out2[1, :T]                       # sum the two directions

    # --- fc: SequenceWise(BatchNorm1d -> Linear(no bias)) + InferenceBatchSoftmax ---
    T = h.shape[0]
    gamma, beta, rm, rv = params["fc_bn"]
    s = gamma / jnp.sqrt(rv + _EPS)
    probs = bn_fc_softmax(h.reshape(T * nb, hid), s, beta - rm * s, params["fc_w"].T)
    C = params["fc_w"].shape[0]
    return probs.reshape(T, nb, C).transpose(1, 0, 2)       # (N, T, num_classes)


# ----------------------------------------------------------------------------
# Deterministic parameter construction (synthetic, shapes follow the module)
# ----------------------------------------------------------------------------

def make_params(key, cfg):
    def nrm(k, shape, scl=0.1):
        return scl * jax.random.normal(k, shape, dtype=jnp.float32)

    keys = iter(jax.random.split(key, 64))
    nFreq, mp, K, H = cfg["nFreq"], cfg["map"], cfg["kernel"], cfg["hidden"]
    C = cfg["num_classes"]

    def bn(cin):
        return (nrm(next(keys), (cin,)) + 1.0,          # gamma
                nrm(next(keys), (cin,)),                # beta
                nrm(next(keys), (cin,)),                # running_mean
                jnp.abs(nrm(next(keys), (cin,))) + 1.0) # running_var

    conv = []
    cin = nFreq
    for _ in range(cfg["cnn_layers"]):
        W = nrm(next(keys), (mp, cin, K))
        b = nrm(next(keys), (mp,))
        conv.append((W, b) + bn(mp))
        cin = mp

    rnn = []
    isz = mp
    for li in range(cfg["rnn_layers"]):
        rnn.append({
            "bn": None if li == 0 else bn(isz),
            "wih_f": nrm(next(keys), (4 * H, isz)),
            "whh_f": nrm(next(keys), (4 * H, H)),
            "wih_b": nrm(next(keys), (4 * H, isz)),
            "whh_b": nrm(next(keys), (4 * H, H)),
        })
        isz = H

    return {
        "conv": conv,
        "rnn": rnn,
        "fc_bn": bn(H),
        "fc_w": nrm(next(keys), (C, H)),
    }


if __name__ == "__main__":
    cfg = dict(
        nFreq=8, map=16, kernel=5, stride=2, cnn_layers=2, nDownsample=1,
        hidden=32, rnn_layers=2, num_classes=3,  # labels='abc'
    )
    N, L = 2, 64

    root = jax.random.PRNGKey(0)
    kx, kp = jax.random.split(root)
    x = jax.random.normal(kx, (N, cfg["nFreq"], L), dtype=jnp.float32)
    params = make_params(kp, cfg)

    fwd = jax.jit(functools.partial(deepspeech_forward, cfg=cfg))
    out = fwd(x, params)
    out = jax.block_until_ready(out)

    # sanity: shape (N, T', num_classes), finite, softmax rows sum to 1
    T1 = (L - cfg["kernel"]) // cfg["stride"] + 1
    T2 = T1 - cfg["kernel"] + 1
    assert out.shape == (N, T2, cfg["num_classes"]), out.shape
    assert bool(jnp.all(jnp.isfinite(out)))
    assert bool(jnp.allclose(out.sum(-1), 1.0, atol=1e-4))
    print("KERNEL_OK")
</pallas_src>

<mosaic_0001>
module attributes {stable_mosaic.version = 11 : i64} {
  func.func @_matmul_affine_lrelu_kernel(%arg0: i32, %arg1: memref<64x40xbf16, #tpu.memory_space<vmem>>, %arg2: memref<40x16xbf16, #tpu.memory_space<vmem>>, %arg3: memref<1x16xf32, #tpu.memory_space<vmem>>, %arg4: memref<1x16xf32, #tpu.memory_space<vmem>>, %arg5: memref<64x16xf32, #tpu.memory_space<vmem>>) attributes {dimension_semantics = [#tpu.dimension_semantics<parallel>], iteration_bounds = array<i64: 1>, scalar_prefetch = 0 : i64, scratch_operands = 0 : i64, tpu.core_type = #tpu.core_type<tc>, window_params = [{transform_indices = @transform_0, window_bounds = array<i64: 64, 40>}, {pipeline_mode = #tpu.pipeline_mode<synchronous>, transform_indices = @transform_1, window_bounds = array<i64: 40, 16>}, {pipeline_mode = #tpu.pipeline_mode<synchronous>, transform_indices = @transform_2, window_bounds = array<i64: 1, 16>}, {pipeline_mode = #tpu.pipeline_mode<synchronous>, transform_indices = @transform_3, window_bounds = array<i64: 1, 16>}, {transform_indices = @transform_4, window_bounds = array<i64: 64, 16>}]} {
    %c0 = arith.constant 0 : index
    %c0_0 = arith.constant 0 : index
    %0 = vector.load %arg1[%c0, %c0_0] : memref<64x40xbf16, #tpu.memory_space<vmem>>, vector<64x40xbf16>
    %c0_1 = arith.constant 0 : index
    %c0_2 = arith.constant 0 : index
    %1 = vector.load %arg2[%c0_1, %c0_2] : memref<40x16xbf16, #tpu.memory_space<vmem>>, vector<40x16xbf16>
    %cst = arith.constant dense<0.000000e+00> : vector<64x16xf32>
    %2 = tpu.matmul %0, %1, %cst {dimension_numbers = #tpu.dot_dimension_numbers<[1], [0], [0], [1], [0, 0, 1, 1], [], []>} : vector<64x40xbf16>, vector<40x16xbf16>, vector<64x16xf32> -> vector<64x16xf32>
    %c0_3 = arith.constant 0 : index
    %c0_4 = arith.constant 0 : index
    %3 = vector.load %arg3[%c0_3, %c0_4] : memref<1x16xf32, #tpu.memory_space<vmem>>, vector<1x16xf32>
    %4 = vector.broadcast %3 : vector<1x16xf32> to vector<64x16xf32>
    %5 = arith.mulf %2, %4 : vector<64x16xf32>
    %c0_5 = arith.constant 0 : index
    %c0_6 = arith.constant 0 : index
    %6 = vector.load %arg4[%c0_5, %c0_6] : memref<1x16xf32, #tpu.memory_space<vmem>>, vector<1x16xf32>
    %7 = vector.broadcast %6 : vector<1x16xf32> to vector<64x16xf32>
    %8 = arith.addf %5, %7 : vector<64x16xf32>
    %cst_7 = arith.constant 0.000000e+00 : f32
    %9 = vector.broadcast %cst_7 : f32 to vector<64x16xf32>
    %10 = arith.cmpf oge, %8, %9 : vector<64x16xf32>
    %cst_8 = arith.constant 1.600000e+01 : f32
    %11 = vector.broadcast %cst_8 : f32 to vector<64x16xf32>
    %12 = arith.mulf %11, %8 : vector<64x16xf32>
    %13 = arith.select %10, %8, %12 : vector<64x16xi1>, vector<64x16xf32>
    %c0_9 = arith.constant 0 : index
    %c0_10 = arith.constant 0 : index
    %14 = vector.load %arg5[%c0_9, %c0_10] : memref<64x16xf32, #tpu.memory_space<vmem>>, vector<64x16xf32>
    tpu.vector_store %arg5[%c0_9, %c0_10], %13 {strides = array<i32>} : memref<64x16xf32, #tpu.memory_space<vmem>>, vector<64x16xf32>,
    return
  }
  func.func @transform_0(%arg0: i32) -> (i32, i32) {
    %c0_i32 = arith.constant 0 : i32
    %c0_i32_0 = arith.constant 0 : i32
    return %arg0, %c0_i32 : i32, i32
  }
  func.func @transform_1(%arg0: i32) -> (i32, i32) {
    %c0_i32 = arith.constant 0 : i32
    %c0_i32_0 = arith.constant 0 : i32
    %c0_i32_1 = arith.constant 0 : i32
    return %c0_i32, %c0_i32_0 : i32, i32
  }
  func.func @transform_2(%arg0: i32) -> (i32, i32) {
    %c0_i32 = arith.constant 0 : i32
    %c0_i32_0 = arith.constant 0 : i32
    %c0_i32_1 = arith.constant 0 : i32
    return %c0_i32, %c0_i32_0 : i32, i32
  }
  func.func @transform_3(%arg0: i32) -> (i32, i32) {
    %c0_i32 = arith.constant 0 : i32
    %c0_i32_0 = arith.constant 0 : i32
    %c0_i32_1 = arith.constant 0 : i32
    return %c0_i32, %c0_i32_0 : i32, i32
  }
  func.func @transform_4(%arg0: i32) -> (i32, i32) {
    %c0_i32 = arith.constant 0 : i32
    %c0_i32_0 = arith.constant 0 : i32
    return %arg0, %c0_i32 : i32, i32
  }
}

module attributes {stable_mosaic.version = 11 : i64} {
  func.func @_matmul_affine_lrelu_kernel(%arg0: i32, %arg1: memref<64x80xbf16, #tpu.memory_space<vmem>>, %arg2: memref<80x16xbf16, #tpu.memory_space<vmem>>, %arg3: memref<1x16xf32, #tpu.memory_space<vmem>>, %arg4: memref<1x16xf32, #tpu.memory_space<vmem>>, %arg5: memref<64x16xf32, #tpu.memory_space<vmem>>) attributes {dimension_semantics = [#tpu.dimension_semantics<parallel>], iteration_bounds = array<i64: 1>, scalar_prefetch = 0 : i64, scratch_operands = 0 : i64, tpu.core_type = #tpu.core_type<tc>, window_params = [{transform_indices = @transform_0, window_bounds = array<i64: 64, 80>}, {pipeline_mode = #tpu.pipeline_mode<synchronous>, transform_indices = @transform_1, window_bounds = array<i64: 80, 16>}, {pipeline_mode = #tpu.pipeline_mode<synchronous>, transform_indices = @transform_2, window_bounds = array<i64: 1, 16>}, {pipeline_mode = #tpu.pipeline_mode<synchronous>, transform_indices = @transform_3, window_bounds = array<i64: 1, 16>}, {transform_indices = @transform_4, window_bounds = array<i64: 64, 16>}]} {
    %c0 = arith.constant 0 : index
    %c0_0 = arith.constant 0 : index
    %0 = vector.load %arg1[%c0, %c0_0] : memref<64x80xbf16, #tpu.memory_space<vmem>>, vector<64x80xbf16>
    %c0_1 = arith.constant 0 : index
    %c0_2 = arith.constant 0 : index
    %1 = vector.load %arg2[%c0_1, %c0_2] : memref<80x16xbf16, #tpu.memory_space<vmem>>, vector<80x16xbf16>
    %cst = arith.constant dense<0.000000e+00> : vector<64x16xf32>
    %2 = tpu.matmul %0, %1, %cst {dimension_numbers = #tpu.dot_dimension_numbers<[1], [0], [0], [1], [0, 0, 1, 1], [], []>} : vector<64x80xbf16>, vector<80x16xbf16>, vector<64x16xf32> -> vector<64x16xf32>
    %c0_3 = arith.constant 0 : index
    %c0_4 = arith.constant 0 : index
    %3 = vector.load %arg3[%c0_3, %c0_4] : memref<1x16xf32, #tpu.memory_space<vmem>>, vector<1x16xf32>
    %4 = vector.broadcast %3 : vector<1x16xf32> to vector<64x16xf32>
    %5 = arith.mulf %2, %4 : vector<64x16xf32>
    %c0_5 = arith.constant 0 : index
    %c0_6 = arith.constant 0 : index
    %6 = vector.load %arg4[%c0_5, %c0_6] : memref<1x16xf32, #tpu.memory_space<vmem>>, vector<1x16xf32>
    %7 = vector.broadcast %6 : vector<1x16xf32> to vector<64x16xf32>
    %8 = arith.addf %5, %7 : vector<64x16xf32>
    %cst_7 = arith.constant 0.000000e+00 : f32
    %9 = vector.broadcast %cst_7 : f32 to vector<64x16xf32>
    %10 = arith.cmpf oge, %8, %9 : vector<64x16xf32>
    %cst_8 = arith.constant 1.600000e+01 : f32
    %11 = vector.broadcast %cst_8 : f32 to vector<64x16xf32>
    %12 = arith.mulf %11, %8 : vector<64x16xf32>
    %13 = arith.select %10, %8, %12 : vector<64x16xi1>, vector<64x16xf32>
    %c0_9 = arith.constant 0 : index
    %c0_10 = arith.constant 0 : index
    %14 = vector.load %arg5[%c0_9, %c0_10] : memref<64x16xf32, #tpu.memory_space<vmem>>, vector<64x16xf32>
    tpu.vector_store %arg5[%c0_9, %c0_10], %13 {strides = array<i32>} : memref<64x16xf32, #tpu.memory_space<vmem>>, vector<64x16xf32>,
    return
  }
  func.func @transform_0(%arg0: i32) -> (i32, i32) {
    %c0_i32 = arith.constant 0 : i32
    %c0_i32_0 = arith.constant 0 : i32
    return %arg0, %c0_i32 : i32, i32
  }
  func.func @transform_1(%arg0: i32) -> (i32, i32) {
    %c0_i32 = arith.constant 0 : i32
    %c0_i32_0 = arith.constant 0 : i32
    %c0_i32_1 = arith.constant 0 : i32
    return %c0_i32, %c0_i32_0 : i32, i32
  }
  func.func @transform_2(%arg0: i32) -> (i32, i32) {
    %c0_i32 = arith.constant 0 : i32
    %c0_i32_0 = arith.constant 0 : i32
    %c0_i32_1 = arith.constant 0 : i32
    return %c0_i32, %c0_i32_0 : i32, i32
  }
  func.func @transform_3(%arg0: i32) -> (i32, i32) {
    %c0_i32 = arith.constant 0 : i32
    %c0_i32_0 = arith.constant 0 : i32
    %c0_i32_1 = arith.constant 0 : i32
    return %c0_i32, %c0_i32_0 : i32, i32
  }
  func.func @transform_4(%arg0: i32) -> (i32, i32) {
    %c0_i32 = arith.constant 0 : i32
    %c0_i32_0 = arith.constant 0 : i32
    return %arg0, %c0_i32 : i32, i32
  }
}

module attributes {stable_mosaic.version = 11 : i64} {
  func.func @_matmul_affine_lrelu_kernel(%arg0: i32, %arg1: memref<64x16xbf16, #tpu.memory_space<vmem>>, %arg2: memref<16x256xbf16, #tpu.memory_space<vmem>>, %arg3: memref<1x256xf32, #tpu.memory_space<vmem>>, %arg4: memref<1x256xf32, #tpu.memory_space<vmem>>, %arg5: memref<64x256xf32, #tpu.memory_space<vmem>>) attributes {dimension_semantics = [#tpu.dimension_semantics<parallel>], iteration_bounds = array<i64: 1>, scalar_prefetch = 0 : i64, scratch_operands = 0 : i64, tpu.core_type = #tpu.core_type<tc>, window_params = [{transform_indices = @transform_0, window_bounds = array<i64: 64, 16>}, {pipeline_mode = #tpu.pipeline_mode<synchronous>, transform_indices = @transform_1, window_bounds = array<i64: 16, 256>}, {pipeline_mode = #tpu.pipeline_mode<synchronous>, transform_indices = @transform_2, window_bounds = array<i64: 1, 256>}, {pipeline_mode = #tpu.pipeline_mode<synchronous>, transform_indices = @transform_3, window_bounds = array<i64: 1, 256>}, {transform_indices = @transform_4, window_bounds = array<i64: 64, 256>}]} {
    %c0 = arith.constant 0 : index
    %c0_0 = arith.constant 0 : index
    %0 = vector.load %arg1[%c0, %c0_0] : memref<64x16xbf16, #tpu.memory_space<vmem>>, vector<64x16xbf16>
    %c0_1 = arith.constant 0 : index
    %c0_2 = arith.constant 0 : index
    %1 = vector.load %arg2[%c0_1, %c0_2] : memref<16x256xbf16, #tpu.memory_space<vmem>>, vector<16x256xbf16>
    %cst = arith.constant dense<0.000000e+00> : vector<64x256xf32>
    %2 = tpu.matmul %0, %1, %cst {dimension_numbers = #tpu.dot_dimension_numbers<[1], [0], [0], [1], [0, 0, 1, 1], [], []>} : vector<64x16xbf16>, vector<16x256xbf16>, vector<64x256xf32> -> vector<64x256xf32>
    %c0_3 = arith.constant 0 : index
    %c0_4 = arith.constant 0 : index
    %3 = vector.load %arg3[%c0_3, %c0_4] : memref<1x256xf32, #tpu.memory_space<vmem>>, vector<1x256xf32>
    %4 = vector.broadcast %3 : vector<1x256xf32> to vector<64x256xf32>
    %5 = arith.mulf %2, %4 : vector<64x256xf32>
    %c0_5 = arith.constant 0 : index
    %c0_6 = arith.constant 0 : index
    %6 = vector.load %arg4[%c0_5, %c0_6] : memref<1x256xf32, #tpu.memory_space<vmem>>, vector<1x256xf32>
    %7 = vector.broadcast %6 : vector<1x256xf32> to vector<64x256xf32>
    %8 = arith.addf %5, %7 : vector<64x256xf32>
    %cst_7 = arith.constant 0.000000e+00 : f32
    %9 = vector.broadcast %cst_7 : f32 to vector<64x256xf32>
    %10 = arith.cmpf oge, %8, %9 : vector<64x256xf32>
    %cst_8 = arith.constant 1.000000e+00 : f32
    %11 = vector.broadcast %cst_8 : f32 to vector<64x256xf32>
    %12 = arith.mulf %11, %8 : vector<64x256xf32>
    %13 = arith.select %10, %8, %12 : vector<64x256xi1>, vector<64x256xf32>
    %c0_9 = arith.constant 0 : index
    %c0_10 = arith.constant 0 : index
    %14 = vector.load %arg5[%c0_9, %c0_10] : memref<64x256xf32, #tpu.memory_space<vmem>>, vector<64x256xf32>
    tpu.vector_store %arg5[%c0_9, %c0_10], %13 {strides = array<i32>} : memref<64x256xf32, #tpu.memory_space<vmem>>, vector<64x256xf32>,
    return
  }
  func.func @transform_0(%arg0: i32) -> (i32, i32) {
    %c0_i32 = arith.constant 0 : i32
    %c0_i32_0 = arith.constant 0 : i32
    return %arg0, %c0_i32 : i32, i32
  }
  func.func @transform_1(%arg0: i32) -> (i32, i32) {
    %c0_i32 = arith.constant 0 : i32
    %c0_i32_0 = arith.constant 0 : i32
    %c0_i32_1 = arith.constant 0 : i32
    return %c0_i32, %c0_i32_0 : i32, i32
  }
  func.func @transform_2(%arg0: i32) -> (i32, i32) {
    %c0_i32 = arith.constant 0 : i32
    %c0_i32_0 = arith.constant 0 : i32
    %c0_i32_1 = arith.constant 0 : i32
    return %c0_i32, %c0_i32_0 : i32, i32
  }
  func.func @transform_3(%arg0: i32) -> (i32, i32) {
    %c0_i32 = arith.constant 0 : i32
    %c0_i32_0 = arith.constant 0 : i32
    %c0_i32_1 = arith.constant 0 : i32
    return %c0_i32, %c0_i32_0 : i32, i32
  }
  func.func @transform_4(%arg0: i32) -> (i32, i32) {
    %c0_i32 = arith.constant 0 : i32
    %c0_i32_0 = arith.constant 0 : i32
    return %arg0, %c0_i32 : i32, i32
  }
}

module attributes {stable_mosaic.version = 11 : i64} {
  func.func @_bilstm_chunk_kernel(%arg0: i32, %arg1: i32, %arg2: memref<1x16x4x2x32xf32, #tpu.memory_space<vmem>>, %arg3: memref<1x4x32x32xbf16, #tpu.memory_space<vmem>>, %arg4: memref<1x16x2x32xf32, #tpu.memory_space<vmem>>, %arg5: memref<2x32xf32, #tpu.memory_space<vmem>>, %arg6: memref<2x32xf32, #tpu.memory_space<vmem>>) attributes {dimension_semantics = [#tpu.dimension_semantics<parallel>, #tpu.dimension_semantics<arbitrary>], iteration_bounds = array<i64: 2, 2>, scalar_prefetch = 0 : i64, scratch_operands = 2 : i64, tpu.core_type = #tpu.core_type<tc>, window_params = [{transform_indices = @transform_0, window_bounds = array<i64: 1, 16, 4, 2, 32>}, {transform_indices = @transform_1, window_bounds = array<i64: 1, 4, 32, 32>}, {transform_indices = @transform_2, window_bounds = array<i64: 1, 16, 2, 32>}]} {
    %c0_i32 = arith.constant 0 : i32
    %0 = arith.cmpi eq, %arg1, %c0_i32 : i32
    %1 = arith.extui %0 : i1 to i32
    %c0_i32_0 = arith.constant 0 : i32
    %2 = arith.cmpi ne, %1, %c0_i32_0 : i32
    scf.if %2 {
      %cst_397 = arith.constant 0.000000e+00 : f32
      %859 = vector.broadcast %cst_397 : f32 to vector<2x32xf32>
      %c0_398 = arith.constant 0 : index
      %c0_399 = arith.constant 0 : index
      %860 = vector.load %arg5[%c0_398, %c0_399] : memref<2x32xf32, #tpu.memory_space<vmem>>, vector<2x32xf32>
      tpu.vector_store %arg5[%c0_398, %c0_399], %859 {strides = array<i32>} : memref<2x32xf32, #tpu.memory_space<vmem>>, vector<2x32xf32>,
      %cst_400 = arith.constant 0.000000e+00 : f32
      %861 = vector.broadcast %cst_400 : f32 to vector<2x32xf32>
      %c0_401 = arith.constant 0 : index
      %c0_402 = arith.constant 0 : index
      %862 = vector.load %arg6[%c0_401, %c0_402] : memref<2x32xf32, #tpu.memory_space<vmem>>, vector<2x32xf32>
      tpu.vector_store %arg6[%c0_401, %c0_402], %861 {strides = array<i32>} : memref<2x32xf32, #tpu.memory_space<vmem>>, vector<2x32xf32>,
    } else {
    }
    %c0 = arith.constant 0 : index
    %c0_1 = arith.constant 0 : index
    %c0_2 = arith.constant 0 : index
    %c0_3 = arith.constant 0 : index
    %3 = vector.load %arg3[%c0, %c0_1, %c0_2, %c0_3] : memref<1x4x32x32xbf16, #tpu.memory_space<vmem>>, vector<1x1x32x32xbf16>
    %4 = vector.shape_cast %3 : vector<1x1x32x32xbf16> to vector<32x32xbf16>
    %c0_4 = arith.constant 0 : index
    %c1 = arith.constant 1 : index
    %c0_5 = arith.constant 0 : index
    %c0_6 = arith.constant 0 : index
    %5 = vector.load %arg3[%c0_4, %c1, %c0_5, %c0_6] : memref<1x4x32x32xbf16, #tpu.memory_space<vmem>>, vector<1x1x32x32xbf16>
    %6 = vector.shape_cast %5 : vector<1x1x32x32xbf16> to vector<32x32xbf16>
    %c0_7 = arith.constant 0 : index
    %c2 = arith.constant 2 : index
    %c0_8 = arith.constant 0 : index
    %c0_9 = arith.constant 0 : index
    %7 = vector.load %arg3[%c0_7, %c2, %c0_8, %c0_9] : memref<1x4x32x32xbf16, #tpu.memory_space<vmem>>, vector<1x1x32x32xbf16>
    %8 = vector.shape_cast %7 : vector<1x1x32x32xbf16> to vector<32x32xbf16>
    %c0_10 = arith.constant 0 : index
    %c3 = arith.constant 3 : index
    %c0_11 = arith.constant 0 : index
    %c0_12 = arith.constant 0 : index
    %9 = vector.load %arg3[%c0_10, %c3, %c0_11, %c0_12] : memref<1x4x32x32xbf16, #tpu.memory_space<vmem>>, vector<1x1x32x32xbf16>
    %10 = vector.shape_cast %9 : vector<1x1x32x32xbf16> to vector<32x32xbf16>
    %c0_i32_13 = arith.constant 0 : i32
    %c2_i32 = arith.constant 2 : i32
    %11 = arith.muli %c2_i32, %c0_i32_13 : i32
    %c15_i32 = arith.constant 15 : i32
    %12 = arith.subi %c15_i32, %11 : i32
    %13 = arith.muli %arg0, %12 : i32
    %14 = arith.addi %c0_i32_13, %13 : i32
    %c0_14 = arith.constant 0 : index
    %15 = arith.index_cast %14 : i32 to index
    %c0_15 = arith.constant 0 : index
    %c0_16 = arith.constant 0 : index
    %c0_17 = arith.constant 0 : index
    %16 = vector.load %arg2[%c0_14, %15, %c0_15, %c0_16, %c0_17] : memref<1x16x4x2x32xf32, #tpu.memory_space<vmem>>, vector<1x1x4x2x32xf32>
    %17 = vector.shape_cast %16 : vector<1x1x4x2x32xf32> to vector<4x2x32xf32>
    %c0_18 = arith.constant 0 : index
    %c0_19 = arith.constant 0 : index
    %18 = vector.load %arg5[%c0_18, %c0_19] : memref<2x32xf32, #tpu.memory_space<vmem>>, vector<2x32xf32>
    %19 = arith.truncf %18 : vector<2x32xf32> to vector<2x32xbf16>
    %20 = vector.extract_strided_slice %17 {offsets = [0, 0, 0], sizes = [1, 2, 32], strides = [1, 1, 1]} : vector<4x2x32xf32> to vector<1x2x32xf32>
    %21 = vector.shape_cast %20 : vector<1x2x32xf32> to vector<2x32xf32>
    %cst = arith.constant dense<0.000000e+00> : vector<2x32xf32>
    %22 = tpu.matmul %19, %4, %cst {dimension_numbers = #tpu.dot_dimension_numbers<[1], [0], [0], [1], [0, 0, 1, 1], [], []>} : vector<2x32xbf16>, vector<32x32xbf16>, vector<2x32xf32> -> vector<2x32xf32>
    %23 = arith.addf %21, %22 : vector<2x32xf32>
    %24 = arith.negf %23 : vector<2x32xf32>
    %25 = math.exp %24 : vector<2x32xf32>
    %cst_20 = arith.constant 1.000000e+00 : f32
    %26 = vector.broadcast %cst_20 : f32 to vector<2x32xf32>
    %27 = arith.addf %26, %25 : vector<2x32xf32>
    %28 = arith.divf %26, %27 : vector<2x32xf32>
    %29 = vector.extract_strided_slice %17 {offsets = [1, 0, 0], sizes = [1, 2, 32], strides = [1, 1, 1]} : vector<4x2x32xf32> to vector<1x2x32xf32>
    %30 = vector.shape_cast %29 : vector<1x2x32xf32> to vector<2x32xf32>
    %cst_21 = arith.constant dense<0.000000e+00> : vector<2x32xf32>
    %31 = tpu.matmul %19, %6, %cst_21 {dimension_numbers = #tpu.dot_dimension_numbers<[1], [0], [0], [1], [0, 0, 1, 1], [], []>} : vector<2x32xbf16>, vector<32x32xbf16>, vector<2x32xf32> -> vector<2x32xf32>
    %32 = arith.addf %30, %31 : vector<2x32xf32>
    %33 = arith.negf %32 : vector<2x32xf32>
    %34 = math.exp %33 : vector<2x32xf32>
    %cst_22 = arith.constant 1.000000e+00 : f32
    %35 = vector.broadcast %cst_22 : f32 to vector<2x32xf32>
    %36 = arith.addf %35, %34 : vector<2x32xf32>
    %37 = arith.divf %35, %36 : vector<2x32xf32>
    %38 = vector.extract_strided_slice %17 {offsets = [2, 0, 0], sizes = [1, 2, 32], strides = [1, 1, 1]} : vector<4x2x32xf32> to vector<1x2x32xf32>
    %39 = vector.shape_cast %38 : vector<1x2x32xf32> to vector<2x32xf32>
    %cst_23 = arith.constant dense<0.000000e+00> : vector<2x32xf32>
    %40 = tpu.matmul %19, %8, %cst_23 {dimension_numbers = #tpu.dot_dimension_numbers<[1], [0], [0], [1], [0, 0, 1, 1], [], []>} : vector<2x32xbf16>, vector<32x32xbf16>, vector<2x32xf32> -> vector<2x32xf32>
    %41 = arith.addf %39, %40 : vector<2x32xf32>
    %42 = math.tanh %41 : vector<2x32xf32>
    %43 = vector.extract_strided_slice %17 {offsets = [3, 0, 0], sizes = [1, 2, 32], strides = [1, 1, 1]} : vector<4x2x32xf32> to vector<1x2x32xf32>
    %44 = vector.shape_cast %43 : vector<1x2x32xf32> to vector<2x32xf32>
    %cst_24 = arith.constant dense<0.000000e+00> : vector<2x32xf32>
    %45 = tpu.matmul %19, %10, %cst_24 {dimension_numbers = #tpu.dot_dimension_numbers<[1], [0], [0], [1], [0, 0, 1, 1], [], []>} : vector<2x32xbf16>, vector<32x32xbf16>, vector<2x32xf32> -> vector<2x32xf32>
    %46 = arith.addf %44, %45 : vector<2x32xf32>
    %47 = arith.negf %46 : vector<2x32xf32>
    %48 = math.exp %47 : vector<2x32xf32>
    %cst_25 = arith.constant 1.000000e+00 : f32
    %49 = vector.broadcast %cst_25 : f32 to vector<2x32xf32>
    %50 = arith.addf %49, %48 : vector<2x32xf32>
    %51 = arith.divf %49, %50 : vector<2x32xf32>
    %c0_26 = arith.constant 0 : index
    %c0_27 = arith.constant 0 : index
    %52 = vector.load %arg6[%c0_26, %c0_27] : memref<2x32xf32, #tpu.memory_space<vmem>>, vector<2x32xf32>
    %53 = arith.mulf %37, %52 : vector<2x32xf32>
    %54 = arith.mulf %28, %42 : vector<2x32xf32>
    %55 = arith.addf %53, %54 : vector<2x32xf32>
    %56 = math.tanh %55 : vector<2x32xf32>
    %57 = arith.mulf %51, %56 : vector<2x32xf32>
    %c0_28 = arith.constant 0 : index
    %c0_29 = arith.constant 0 : index
    %58 = vector.load %arg6[%c0_28, %c0_29] : memref<2x32xf32, #tpu.memory_space<vmem>>, vector<2x32xf32>
    tpu.vector_store %arg6[%c0_28, %c0_29], %55 {strides = array<i32>} : memref<2x32xf32, #tpu.memory_space<vmem>>, vector<2x32xf32>,
    %c0_30 = arith.constant 0 : index
    %c0_31 = arith.constant 0 : index
    %59 = vector.load %arg5[%c0_30, %c0_31] : memref<2x32xf32, #tpu.memory_space<vmem>>, vector<2x32xf32>
    tpu.vector_store %arg5[%c0_30, %c0_31], %57 {strides = array<i32>} : memref<2x32xf32, #tpu.memory_space<vmem>>, vector<2x32xf32>,
    %c0_32 = arith.constant 0 : index
    %60 = arith.index_cast %14 : i32 to index
    %c0_33 = arith.constant 0 : index
    %c0_34 = arith.constant 0 : index
    %61 = vector.load %arg4[%c0_32, %60, %c0_33, %c0_34] : memref<1x16x2x32xf32, #tpu.memory_space<vmem>>, vector<1x1x2x32xf32>
    %62 = vector.shape_cast %61 : vector<1x1x2x32xf32> to vector<2x32xf32>
    %63 = vector.shape_cast %57 : vector<2x32xf32> to vector<1x1x2x32xf32>
    tpu.vector_store %arg4[%c0_32, %60, %c0_33, %c0_34], %63 {strides = array<i32>} : memref<1x16x2x32xf32, #tpu.memory_space<vmem>>, vector<1x1x2x32xf32>,
    %c1_i32 = arith.constant 1 : i32
    %c2_i32_35 = arith.constant 2 : i32
    %64 = arith.muli %c2_i32_35, %c1_i32 : i32
    %c15_i32_36 = arith.constant 15 : i32
    %65 = arith.subi %c15_i32_36, %64 : i32
    %66 = arith.muli %arg0, %65 : i32
    %67 = arith.addi %c1_i32, %66 : i32
    %c0_37 = arith.constant 0 : index
    %68 = arith.index_cast %67 : i32 to index
    %c0_38 = arith.constant 0 : index
    %c0_39 = arith.constant 0 : index
    %c0_40 = arith.constant 0 : index
    %69 = vector.load %arg2[%c0_37, %68, %c0_38, %c0_39, %c0_40] : memref<1x16x4x2x32xf32, #tpu.memory_space<vmem>>, vector<1x1x4x2x32xf32>
    %70 = vector.shape_cast %69 : vector<1x1x4x2x32xf32> to vector<4x2x32xf32>
    %c0_41 = arith.constant 0 : index
    %c0_42 = arith.constant 0 : index
    %71 = vector.load %arg5[%c0_41, %c0_42] : memref<2x32xf32, #tpu.memory_space<vmem>>, vector<2x32xf32>
    %72 = arith.truncf %71 : vector<2x32xf32> to vector<2x32xbf16>
    %73 = vector.extract_strided_slice %70 {offsets = [0, 0, 0], sizes = [1, 2, 32], strides = [1, 1, 1]} : vector<4x2x32xf32> to vector<1x2x32xf32>
    %74 = vector.shape_cast %73 : vector<1x2x32xf32> to vector<2x32xf32>
    %cst_43 = arith.constant dense<0.000000e+00> : vector<2x32xf32>
    %75 = tpu.matmul %72, %4, %cst_43 {dimension_numbers = #tpu.dot_dimension_numbers<[1], [0], [0], [1], [0, 0, 1, 1], [], []>} : vector<2x32xbf16>, vector<32x32xbf16>, vector<2x32xf32> -> vector<2x32xf32>
    %76 = arith.addf %74, %75 : vector<2x32xf32>
    %77 = arith.negf %76 : vector<2x32xf32>
    %78 = math.exp %77 : vector<2x32xf32>
    %cst_44 = arith.constant 1.000000e+00 : f32
    %79 = vector.broadcast %cst_44 : f32 to vector<2x32xf32>
    %80 = arith.addf %79, %78 : vector<2x32xf32>
    %81 = arith.divf %79, %80 : vector<2x32xf32>
    %82 = vector.extract_strided_slice %70 {offsets = [1, 0, 0], sizes = [1, 2, 32], strides = [1, 1, 1]} : vector<4x2x32xf32> to vector<1x2x32xf32>
    %83 = vector.shape_cast %82 : vector<1x2x32xf32> to vector<2x32xf32>
    %cst_45 = arith.constant dense<0.000000e+00> : vector<2x32xf32>
    %84 = tpu.matmul %72, %6, %cst_45 {dimension_numbers = #tpu.dot_dimension_numbers<[1], [0], [0], [1], [0, 0, 1, 1], [], []>} : vector<2x32xbf16>, vector<32x32xbf16>, vector<2x32xf32> -> vector<2x32xf32>
    %85 = arith.addf %83, %84 : vector<2x32xf32>
    %86 = arith.negf %85 : vector<2x32xf32>
    %87 = math.exp %86 : vector<2x32xf32>
    %cst_46 = arith.constant 1.000000e+00 : f32
    %88 = vector.broadcast %cst_46 : f32 to vector<2x32xf32>
    %89 = arith.addf %88, %87 : vector<2x32xf32>
    %90 = arith.divf %88, %89 : vector<2x32xf32>
    %91 = vector.extract_strided_slice %70 {offsets = [2, 0, 0], sizes = [1, 2, 32], strides = [1, 1, 1]} : vector<4x2x32xf32> to vector<1x2x32xf32>
    %92 = vector.shape_cast %91 : vector<1x2x32xf32> to vector<2x32xf32>
    %cst_47 = arith.constant dense<0.000000e+00> : vector<2x32xf32>
    %93 = tpu.matmul %72, %8, %cst_47 {dimension_numbers = #tpu.dot_dimension_numbers<[1], [0], [0], [1], [0, 0, 1, 1], [], []>} : vector<2x32xbf16>, vector<32x32xbf16>, vector<2x32xf32> -> vector<2x32xf32>
    %94 = arith.addf %92, %93 : vector<2x32xf32>
    %95 = math.tanh %94 : vector<2x32xf32>
    %96 = vector.extract_strided_slice %70 {offsets = [3, 0, 0], sizes = [1, 2, 32], strides = [1, 1, 1]} : vector<4x2x32xf32> to vector<1x2x32xf32>
    %97 = vector.shape_cast %96 : vector<1x2x32xf32> to vector<2x32xf32>
    %cst_48 = arith.constant dense<0.000000e+00> : vector<2x32xf32>
    %98 = tpu.matmul %72, %10, %cst_48 {dimension_numbers = #tpu.dot_dimension_numbers<[1], [0], [0], [1], [0, 0, 1, 1], [], []>} : vector<2x32xbf16>, vector<32x32xbf16>, vector<2x32xf32> -> vector<2x32xf32>
    %99 = arith.addf %97, %98 : vector<2x32xf32>
    %100 = arith.negf %99 : vector<2x32xf32>
    %101 = math.exp %100 : vector<2x32xf32>
    %cst_49 = arith.constant 1.000000e+00 : f32
    %102 = vector.broadcast %cst_49 : f32 to vector<2x32xf32>
    %103 = arith.addf %102, %101 : vector<2x32xf32>
    %104 = arith.divf %102, %103 : vector<2x32xf32>
    %c0_50 = arith.constant 0 : index
    %c0_51 = arith.constant 0 : index
    %105 = vector.load %arg6[%c0_50, %c0_51] : memref<2x32xf32, #tpu.memory_space<vmem>>, vector<2x32xf32>
    %106 = arith.mulf %90, %105 : vector<2x32xf32>
    %107 = arith.mulf %81, %95 : vector<2x32xf32>
    %108 = arith.addf %106, %107 : vector<2x32xf32>
    %109 = math.tanh %108 : vector<2x32xf32>
    %110 = arith.mulf %104, %109 : vector<2x32xf32>
    %c0_52 = arith.constant 0 : index
    %c0_53 = arith.constant 0 : index
    %111 = vector.load %arg6[%c0_52, %c0_53] : memref<2x32xf32, #tpu.memory_space<vmem>>, vector<2x32xf32>
    tpu.vector_store %arg6[%c0_52, %c0_53], %108 {strides = array<i32>} : memref<2x32xf32, #tpu.memory_space<vmem>>, vector<2x32xf32>,
    %c0_54 = arith.constant 0 : index
    %c0_55 = arith.constant 0 : index
    %112 = vector.load %arg5[%c0_54, %c0_55] : memref<2x32xf32, #tpu.memory_space<vmem>>, vector<2x32xf32>
    tpu.vector_store %arg5[%c0_54, %c0_55], %110 {strides = array<i32>} : memref<2x32xf32, #tpu.memory_space<vmem>>, vector<2x32xf32>,
    %c0_56 = arith.constant 0 : index
    %113 = arith.index_cast %67 : i32 to index
    %c0_57 = arith.constant 0 : index
    %c0_58 = arith.constant 0 : index
    %114 = vector.load %arg4[%c0_56, %113, %c0_57, %c0_58] : memref<1x16x2x32xf32, #tpu.memory_space<vmem>>, vector<1x1x2x32xf32>
    %115 = vector.shape_cast %114 : vector<1x1x2x32xf32> to vector<2x32xf32>
    %116 = vector.shape_cast %110 : vector<2x32xf32> to vector<1x1x2x32xf32>
    tpu.vector_store %arg4[%c0_56, %113, %c0_57, %c0_58], %116 {strides = array<i32>} : memref<1x16x2x32xf32, #tpu.memory_space<vmem>>, vector<1x1x2x32xf32>,
    %c2_i32_59 = arith.constant 2 : i32
    %c2_i32_60 = arith.constant 2 : i32
    %117 = arith.muli %c2_i32_60, %c2_i32_59 : i32
    %c15_i32_61 = arith.constant 15 : i32
    %118 = arith.subi %c15_i32_61, %117 : i32
    %119 = arith.muli %arg0, %118 : i32
    %120 = arith.addi %c2_i32_59, %119 : i32
    %c0_62 = arith.constant 0 : index
    %121 = arith.index_cast %120 : i32 to index
    %c0_63 = arith.constant 0 : index
    %c0_64 = arith.constant 0 : index
    %c0_65 = arith.constant 0 : index
    %122 = vector.load %arg2[%c0_62, %121, %c0_63, %c0_64, %c0_65] : memref<1x16x4x2x32xf32, #tpu.memory_space<vmem>>, vector<1x1x4x2x32xf32>
    %123 = vector.shape_cast %122 : vector<1x1x4x2x32xf32> to vector<4x2x32xf32>
    %c0_66 = arith.constant 0 : index
    %c0_67 = arith.constant 0 : index
    %124 = vector.load %arg5[%c0_66, %c0_67] : memref<2x32xf32, #tpu.memory_space<vmem>>, vector<2x32xf32>
    %125 = arith.truncf %124 : vector<2x32xf32> to vector<2x32xbf16>
    %126 = vector.extract_strided_slice %123 {offsets = [0, 0, 0], sizes = [1, 2, 32], strides = [1, 1, 1]} : vector<4x2x32xf32> to vector<1x2x32xf32>
    %127 = vector.shape_cast %126 : vector<1x2x32xf32> to vector<2x32xf32>
    %cst_68 = arith.constant dense<0.000000e+00> : vector<2x32xf32>
    %128 = tpu.matmul %125, %4, %cst_68 {dimension_numbers = #tpu.dot_dimension_numbers<[1], [0], [0], [1], [0, 0, 1, 1], [], []>} : vector<2x32xbf16>, vector<32x32xbf16>, vector<2x32xf32> -> vector<2x32xf32>
    %129 = arith.addf %127, %128 : vector<2x32xf32>
    %130 = arith.negf %129 : vector<2x32xf32>
    %131 = math.exp %130 : vector<2x32xf32>
    %cst_69 = arith.constant 1.000000e+00 : f32
    %132 = vector.broadcast %cst_69 : f32 to vector<2x32xf32>
    %133 = arith.addf %132, %131 : vector<2x32xf32>
    %134 = arith.divf %132, %133 : vector<2x32xf32>
    %135 = vector.extract_strided_slice %123 {offsets = [1, 0, 0], sizes = [1, 2, 32], strides = [1, 1, 1]} : vector<4x2x32xf32> to vector<1x2x32xf32>
    %136 = vector.shape_cast %135 : vector<1x2x32xf32> to vector<2x32xf32>
    %cst_70 = arith.constant dense<0.000000e+00> : vector<2x32xf32>
    %137 = tpu.matmul %125, %6, %cst_70 {dimension_numbers = #tpu.dot_dimension_numbers<[1], [0], [0], [1], [0, 0, 1, 1], [], []>} : vector<2x32xbf16>, vector<32x32xbf16>, vector<2x32xf32> -> vector<2x32xf32>
    %138 = arith.addf %136, %137 : vector<2x32xf32>
    %139 = arith.negf %138 : vector<2x32xf32>
    %140 = math.exp %139 : vector<2x32xf32>
    %cst_71 = arith.constant 1.000000e+00 : f32
    %141 = vector.broadcast %cst_71 : f32 to vector<2x32xf32>
    %142 = arith.addf %141, %140 : vector<2x32xf32>
    %143 = arith.divf %141, %142 : vector<2x32xf32>
    %144 = vector.extract_strided_slice %123 {offsets = [2, 0, 0], sizes = [1, 2, 32], strides = [1, 1, 1]} : vector<4x2x32xf32> to vector<1x2x32xf32>
    %145 = vector.shape_cast %144 : vector<1x2x32xf32> to vector<2x32xf32>
    %cst_72 = arith.constant dense<0.000000e+00> : vector<2x32xf32>
    %146 = tpu.matmul %125, %8, %cst_72 {dimension_numbers = #tpu.dot_dimension_numbers<[1], [0], [0], [1], [0, 0, 1, 1], [], []>} : vector<2x32xbf16>, vector<32x32xbf16>, vector<2x32xf32> -> vector<2x32xf32>
    %147 = arith.addf %145, %146 : vector<2x32xf32>
    %148 = math.tanh %147 : vector<2x32xf32>
    %149 = vector.extract_strided_slice %123 {offsets = [3, 0, 0], sizes = [1, 2, 32], strides = [1, 1, 1]} : vector<4x2x32xf32> to vector<1x2x32xf32>
    %150 = vector.shape_cast %149 : vector<1x2x32xf32> to vector<2x32xf32>
    %cst_73 = arith.constant dense<0.000000e+00> : vector<2x32xf32>
    %151 = tpu.matmul %125, %10, %cst_73 {dimension_numbers = #tpu.dot_dimension_numbers<[1], [0], [0], [1], [0, 0, 1, 1], [], []>} : vector<2x32xbf16>, vector<32x32xbf16>, vector<2x32xf32> -> vector<2x32xf32>
    %152 = arith.addf %150, %151 : vector<2x32xf32>
    %153 = arith.negf %152 : vector<2x32xf32>
    %154 = math.exp %153 : vector<2x32xf32>
    %cst_74 = arith.constant 1.000000e+00 : f32
    %155 = vector.broadcast %cst_74 : f32 to vector<2x32xf32>
    %156 = arith.addf %155, %154 : vector<2x32xf32>
    %157 = arith.divf %155, %156 : vector<2x32xf32>
    %c0_75 = arith.constant 0 : index
    %c0_76 = arith.constant 0 : index
    %158 = vector.load %arg6[%c0_75, %c0_76] : memref<2x32xf32, #tpu.memory_space<vmem>>, vector<2x32xf32>
    %159 = arith.mulf %143, %158 : vector<2x32xf32>
    %160 = arith.mulf %134, %148 : vector<2x32xf32>
    %161 = arith.addf %159, %160 : vector<2x32xf32>
    %162 = math.tanh %161 : vector<2x32xf32>
    %163 = arith.mulf %157, %162 : vector<2x32xf32>
    %c0_77 = arith.constant 0 : index
    %c0_78 = arith.constant 0 : index
    %164 = vector.load %arg6[%c0_77, %c0_78] : memref<2x32xf32, #tpu.memory_space<vmem>>, vector<2x32xf32>
    tpu.vector_store %arg6[%c0_77, %c0_78], %161 {strides = array<i32>} : memref<2x32xf32, #tpu.memory_space<vmem>>, vector<2x32xf32>,
    %c0_79 = arith.constant 0 : index
    %c0_80 = arith.constant 0 : index
    %165 = vector.load %arg5[%c0_79, %c0_80] : memref<2x32xf32, #tpu.memory_space<vmem>>, vector<2x32xf32>
    tpu.vector_store %arg5[%c0_79, %c0_80], %163 {strides = array<i32>} : memref<2x32xf32, #tpu.memory_space<vmem>>, vector<2x32xf32>,
    %c0_81 = arith.constant 0 : index
    %166 = arith.index_cast %120 : i32 to index
    %c0_82 = arith.constant 0 : index
    %c0_83 = arith.constant 0 : index
    %167 = vector.load %arg4[%c0_81, %166, %c0_82, %c0_83] : memref<1x16x2x32xf32, #tpu.memory_space<vmem>>, vector<1x1x2x32xf32>
    %168 = vector.shape_cast %167 : vector<1x1x2x32xf32> to vector<2x32xf32>
    %169 = vector.shape_cast %163 : vector<2x32xf32> to vector<1x1x2x32xf32>
    tpu.vector_store %arg4[%c0_81, %166, %c0_82, %c0_83], %169 {strides = array<i32>} : memref<1x16x2x32xf32, #tpu.memory_space<vmem>>, vector<1x1x2x32xf32>,
    %c3_i32 = arith.constant 3 : i32
    %c2_i32_84 = arith.constant 2 : i32
    %170 = arith.muli %c2_i32_84, %c3_i32 : i32
    %c15_i32_85 = arith.constant 15 : i32
    %171 = arith.subi %c15_i32_85, %170 : i32
    %172 = arith.muli %arg0, %171 : i32
    %173 = arith.addi %c3_i32, %172 : i32
    %c0_86 = arith.constant 0 : index
    %174 = arith.index_cast %173 : i32 to index
    %c0_87 = arith.constant 0 : index
    %c0_88 = arith.constant 0 : index
    %c0_89 = arith.constant 0 : index
    %175 = vector.load %arg2[%c0_86, %174, %c0_87, %c0_88, %c0_89] : memref<1x16x4x2x32xf32, #tpu.memory_space<vmem>>, vector<1x1x4x2x32xf32>
    %176 = vector.shape_cast %175 : vector<1x1x4x2x32xf32> to vector<4x2x32xf32>
    %c0_90 = arith.constant 0 : index
    %c0_91 = arith.constant 0 : index
    %177 = vector.load %arg5[%c0_90, %c0_91] : memref<2x32xf32, #tpu.memory_space<vmem>>, vector<2x32xf32>
    %178 = arith.truncf %177 : vector<2x32xf32> to vector<2x32xbf16>
    %179 = vector.extract_strided_slice %176 {offsets = [0, 0, 0], sizes = [1, 2, 32], strides = [1, 1, 1]} : vector<4x2x32xf32> to vector<1x2x32xf32>
    %180 = vector.shape_cast %179 : vector<1x2x32xf32> to vector<2x32xf32>
    %cst_92 = arith.constant dense<0.000000e+00> : vector<2x32xf32>
    %181 = tpu.matmul %178, %4, %cst_92 {dimension_numbers = #tpu.dot_dimension_numbers<[1], [0], [0], [1], [0, 0, 1, 1], [], []>} : vector<2x32xbf16>, vector<32x32xbf16>, vector<2x32xf32> -> vector<2x32xf32>
    %182 = arith.addf %180, %181 : vector<2x32xf32>
    %183 = arith.negf %182 : vector<2x32xf32>
    %184 = math.exp %183 : vector<2x32xf32>
    %cst_93 = arith.constant 1.000000e+00 : f32
    %185 = vector.broadcast %cst_93 : f32 to vector<2x32xf32>
    %186 = arith.addf %185, %184 : vector<2x32xf32>
    %187 = arith.divf %185, %186 : vector<2x32xf32>
    %188 = vector.extract_strided_slice %176 {offsets = [1, 0, 0], sizes = [1, 2, 32], strides = [1, 1, 1]} : vector<4x2x32xf32> to vector<1x2x32xf32>
    %189 = vector.shape_cast %188 : vector<1x2x32xf32> to vector<2x32xf32>
    %cst_94 = arith.constant dense<0.000000e+00> : vector<2x32xf32>
    %190 = tpu.matmul %178, %6, %cst_94 {dimension_numbers = #tpu.dot_dimension_numbers<[1], [0], [0], [1], [0, 0, 1, 1], [], []>} : vector<2x32xbf16>, vector<32x32xbf16>, vector<2x32xf32> -> vector<2x32xf32>
    %191 = arith.addf %189, %190 : vector<2x32xf32>
    %192 = arith.negf %191 : vector<2x32xf32>
    %193 = math.exp %192 : vector<2x32xf32>
    %cst_95 = arith.constant 1.000000e+00 : f32
    %194 = vector.broadcast %cst_95 : f32 to vector<2x32xf32>
    %195 = arith.addf %194, %193 : vector<2x32xf32>
    %196 = arith.divf %194, %195 : vector<2x32xf32>
    %197 = vector.extract_strided_slice %176 {offsets = [2, 0, 0], sizes = [1, 2, 32], strides = [1, 1, 1]} : vector<4x2x32xf32> to vector<1x2x32xf32>
    %198 = vector.shape_cast %197 : vector<1x2x32xf32> to vector<2x32xf32>
    %cst_96 = arith.constant dense<0.000000e+00> : vector<2x32xf32>
    %199 = tpu.matmul %178, %8, %cst_96 {dimension_numbers = #tpu.dot_dimension_numbers<[1], [0], [0], [1], [0, 0, 1, 1], [], []>} : vector<2x32xbf16>, vector<32x32xbf16>, vector<2x32xf32> -> vector<2x32xf32>
    %200 = arith.addf %198, %199 : vector<2x32xf32>
    %201 = math.tanh %200 : vector<2x32xf32>
    %202 = vector.extract_strided_slice %176 {offsets = [3, 0, 0], sizes = [1, 2, 32], strides = [1, 1, 1]} : vector<4x2x32xf32> to vector<1x2x32xf32>
    %203 = vector.shape_cast %202 : vector<1x2x32xf32> to vector<2x32xf32>
    %cst_97 = arith.constant dense<0.000000e+00> : vector<2x32xf32>
    %204 = tpu.matmul %178, %10, %cst_97 {dimension_numbers = #tpu.dot_dimension_numbers<[1], [0], [0], [1], [0, 0, 1, 1], [], []>} : vector<2x32xbf16>, vector<32x32xbf16>, vector<2x32xf32> -> vector<2x32xf32>
    %205 = arith.addf %203, %204 : vector<2x32xf32>
    %206 = arith.negf %205 : vector<2x32xf32>
    %207 = math.exp %206 : vector<2x32xf32>
    %cst_98 = arith.constant 1.000000e+00 : f32
    %208 = vector.broadcast %cst_98 : f32 to vector<2x32xf32>
    %209 = arith.addf %208, %207 : vector<2x32xf32>
    %210 = arith.divf %208, %209 : vector<2x32xf32>
    %c0_99 = arith.constant 0 : index
    %c0_100 = arith.constant 0 : index
    %211 = vector.load %arg6[%c0_99, %c0_100] : memref<2x32xf32, #tpu.memory_space<vmem>>, vector<2x32xf32>
    %212 = arith.mulf %196, %211 : vector<2x32xf32>
    %213 = arith.mulf %187, %201 : vector<2x32xf32>
    %214 = arith.addf %212, %213 : vector<2x32xf32>
    %215 = math.tanh %214 : vector<2x32xf32>
    %216 = arith.mulf %210, %215 : vector<2x32xf32>
    %c0_101 = arith.constant 0 : index
    %c0_102 = arith.constant 0 : index
    %217 = vector.load %arg6[%c0_101, %c0_102] : memref<2x32xf32, #tpu.memory_space<vmem>>, vector<2x32xf32>
    tpu.vector_store %arg6[%c0_101, %c0_102], %214 {strides = array<i32>} : memref<2x32xf32, #tpu.memory_space<vmem>>, vector<2x32xf32>,
    %c0_103 = arith.constant 0 : index
    %c0_104 = arith.constant 0 : index
    %218 = vector.load %arg5[%c0_103, %c0_104] : memref<2x32xf32, #tpu.memory_space<vmem>>, vector<2x32xf32>
    tpu.vector_store %arg5[%c0_103, %c0_104], %216 {strides = array<i32>} : memref<2x32xf32, #tpu.memory_space<vmem>>, vector<2x32xf32>,
    %c0_105 = arith.constant 0 : index
    %219 = arith.index_cast %173 : i32 to index
    %c0_106 = arith.constant 0 : index
    %c0_107 = arith.constant 0 : index
    %220 = vector.load %arg4[%c0_105, %219, %c0_106, %c0_107] : memref<1x16x2x32xf32, #tpu.memory_space<vmem>>, vector<1x1x2x32xf32>
    %221 = vector.shape_cast %220 : vector<1x1x2x32xf32> to vector<2x32xf32>
    %222 = vector.shape_cast %216 : vector<2x32xf32> to vector<1x1x2x32xf32>
    tpu.vector_store %arg4[%c0_105, %219, %c0_106, %c0_107], %222 {strides = array<i32>} : memref<1x16x2x32xf32, #tpu.memory_space<vmem>>, vector<1x1x2x32xf32>,
    %c4_i32 = arith.constant 4 : i32
    %c2_i32_108 = arith.constant 2 : i32
    %223 = arith.muli %c2_i32_108, %c4_i32 : i32
    %c15_i32_109 = arith.constant 15 : i32
    %224 = arith.subi %c15_i32_109, %223 : i32
    %225 = arith.muli %arg0, %224 : i32
    %226 = arith.addi %c4_i32, %225 : i32
    %c0_110 = arith.constant 0 : index
    %227 = arith.index_cast %226 : i32 to index
    %c0_111 = arith.constant 0 : index
    %c0_112 = arith.constant 0 : index
    %c0_113 = arith.constant 0 : index
    %228 = vector.load %arg2[%c0_110, %227, %c0_111, %c0_112, %c0_113] : memref<1x16x4x2x32xf32, #tpu.memory_space<vmem>>, vector<1x1x4x2x32xf32>
    %229 = vector.shape_cast %228 : vector<1x1x4x2x32xf32> to vector<4x2x32xf32>
    %c0_114 = arith.constant 0 : index
    %c0_115 = arith.constant 0 : index
    %230 = vector.load %arg5[%c0_114, %c0_115] : memref<2x32xf32, #tpu.memory_space<vmem>>, vector<2x32xf32>
    %231 = arith.truncf %230 : vector<2x32xf32> to vector<2x32xbf16>
    %232 = vector.extract_strided_slice %229 {offsets = [0, 0, 0], sizes = [1, 2, 32], strides = [1, 1, 1]} : vector<4x2x32xf32> to vector<1x2x32xf32>
    %233 = vector.shape_cast %232 : vector<1x2x32xf32> to vector<2x32xf32>
    %cst_116 = arith.constant dense<0.000000e+00> : vector<2x32xf32>
    %234 = tpu.matmul %231, %4, %cst_116 {dimension_numbers = #tpu.dot_dimension_numbers<[1], [0], [0], [1], [0, 0, 1, 1], [], []>} : vector<2x32xbf16>, vector<32x32xbf16>, vector<2x32xf32> -> vector<2x32xf32>
    %235 = arith.addf %233, %234 : vector<2x32xf32>
    %236 = arith.negf %235 : vector<2x32xf32>
    %237 = math.exp %236 : vector<2x32xf32>
    %cst_117 = arith.constant 1.000000e+00 : f32
    %238 = vector.broadcast %cst_117 : f32 to vector<2x32xf32>
    %239 = arith.addf %238, %237 : vector<2x32xf32>
    %240 = arith.divf %238, %239 : vector<2x32xf32>
    %241 = vector.extract_strided_slice %229 {offsets = [1, 0, 0], sizes = [1, 2, 32], strides = [1, 1, 1]} : vector<4x2x32xf32> to vector<1x2x32xf32>
    %242 = vector.shape_cast %241 : vector<1x2x32xf32> to vector<2x32xf32>
    %cst_118 = arith.constant dense<0.000000e+00> : vector<2x32xf32>
    %243 = tpu.matmul %231, %6, %cst_118 {dimension_numbers = #tpu.dot_dimension_numbers<[1], [0], [0], [1], [0, 0, 1, 1], [], []>} : vector<2x32xbf16>, vector<32x32xbf16>, vector<2x32xf32> -> vector<2x32xf32>
    %244 = arith.addf %242, %243 : vector<2x32xf32>
    %245 = arith.negf %244 : vector<2x32xf32>
    %246 = math.exp %245 : vector<2x32xf32>
    %cst_119 = arith.constant 1.000000e+00 : f32
    %247 = vector.broadcast %cst_119 : f32 to vector<2x32xf32>
    %248 = arith.addf %247, %246 : vector<2x32xf32>
    %249 = arith.divf %247, %248 : vector<2x32xf32>
    %250 = vector.extract_strided_slice %229 {offsets = [2, 0, 0], sizes = [1, 2, 32], strides = [1, 1, 1]} : vector<4x2x32xf32> to vector<1x2x32xf32>
    %251 = vector.shape_cast %250 : vector<1x2x32xf32> to vector<2x32xf32>
    %cst_120 = arith.constant dense<0.000000e+00> : vector<2x32xf32>
    %252 = tpu.matmul %231, %8, %cst_120 {dimension_numbers = #tpu.dot_dimension_numbers<[1], [0], [0], [1], [0, 0, 1, 1], [], []>} : vector<2x32xbf16>, vector<32x32xbf16>, vector<2x32xf32> -> vector<2x32xf32>
    %253 = arith.addf %251, %252 : vector<2x32xf32>
    %254 = math.tanh %253 : vector<2x32xf32>
    %255 = vector.extract_strided_slice %229 {offsets = [3, 0, 0], sizes = [1, 2, 32], strides = [1, 1, 1]} : vector<4x2x32xf32> to vector<1x2x32xf32>
    %256 = vector.shape_cast %255 : vector<1x2x32xf32> to vector<2x32xf32>
    %cst_121 = arith.constant dense<0.000000e+00> : vector<2x32xf32>
    %257 = tpu.matmul %231, %10, %cst_121 {dimension_numbers = #tpu.dot_dimension_numbers<[1], [0], [0], [1], [0, 0, 1, 1], [], []>} : vector<2x32xbf16>, vector<32x32xbf16>, vector<2x32xf32> -> vector<2x32xf32>
    %258 = arith.addf %256, %257 : vector<2x32xf32>
    %259 = arith.negf %258 : vector<2x32xf32>
    %260 = math.exp %259 : vector<2x32xf32>
    %cst_122 = arith.constant 1.000000e+00 : f32
    %261 = vector.broadcast %cst_122 : f32 to vector<2x32xf32>
    %262 = arith.addf %261, %260 : vector<2x32xf32>
    %263 = arith.divf %261, %262 : vector<2x32xf32>
    %c0_123 = arith.constant 0 : index
    %c0_124 = arith.constant 0 : index
    %264 = vector.load %arg6[%c0_123, %c0_124] : memref<2x32xf32, #tpu.memory_space<vmem>>, vector<2x32xf32>
    %265 = arith.mulf %249, %264 : vector<2x32xf32>
    %266 = arith.mulf %240, %254 : vector<2x32xf32>
    %267 = arith.addf %265, %266 : vector<2x32xf32>
    %268 = math.tanh %267 : vector<2x32xf32>
    %269 = arith.mulf %263, %268 : vector<2x32xf32>
    %c0_125 = arith.constant 0 : index
    %c0_126 = arith.constant 0 : index
    %270 = vector.load %arg6[%c0_125, %c0_126] : memref<2x32xf32, #tpu.memory_space<vmem>>, vector<2x32xf32>
    tpu.vector_store %arg6[%c0_125, %c0_126], %267 {strides = array<i32>} : memref<2x32xf32, #tpu.memory_space<vmem>>, vector<2x32xf32>,
    %c0_127 = arith.constant 0 : index
    %c0_128 = arith.constant 0 : index
    %271 = vector.load %arg5[%c0_127, %c0_128] : memref<2x32xf32, #tpu.memory_space<vmem>>, vector<2x32xf32>
    tpu.vector_store %arg5[%c0_127, %c0_128], %269 {strides = array<i32>} : memref<2x32xf32, #tpu.memory_space<vmem>>, vector<2x32xf32>,
    %c0_129 = arith.constant 0 : index
    %272 = arith.index_cast %226 : i32 to index
    %c0_130 = arith.constant 0 : index
    %c0_131 = arith.constant 0 : index
    %273 = vector.load %arg4[%c0_129, %272, %c0_130, %c0_131] : memref<1x16x2x32xf32, #tpu.memory_space<vmem>>, vector<1x1x2x32xf32>
    %274 = vector.shape_cast %273 : vector<1x1x2x32xf32> to vector<2x32xf32>
    %275 = vector.shape_cast %269 : vector<2x32xf32> to vector<1x1x2x32xf32>
    tpu.vector_store %arg4[%c0_129, %272, %c0_130, %c0_131], %275 {strides = array<i32>} : memref<1x16x2x32xf32, #tpu.memory_space<vmem>>, vector<1x1x2x32xf32>,
    %c5_i32 = arith.constant 5 : i32
    %c2_i32_132 = arith.constant 2 : i32
    %276 = arith.muli %c2_i32_132, %c5_i32 : i32
    %c15_i32_133 = arith.constant 15 : i32
    %277 = arith.subi %c15_i32_133, %276 : i32
    %278 = arith.muli %arg0, %277 : i32
    %279 = arith.addi %c5_i32, %278 : i32
    %c0_134 = arith.constant 0 : index
    %280 = arith.index_cast %279 : i32 to index
    %c0_135 = arith.constant 0 : index
    %c0_136 = arith.constant 0 : index
    %c0_137 = arith.constant 0 : index
    %281 = vector.load %arg2[%c0_134, %280, %c0_135, %c0_136, %c0_137] : memref<1x16x4x2x32xf32, #tpu.memory_space<vmem>>, vector<1x1x4x2x32xf32>
    %282 = vector.shape_cast %281 : vector<1x1x4x2x32xf32> to vector<4x2x32xf32>
    %c0_138 = arith.constant 0 : index
    %c0_139 = arith.constant 0 : index
    %283 = vector.load %arg5[%c0_138, %c0_139] : memref<2x32xf32, #tpu.memory_space<vmem>>, vector<2x32xf32>
    %284 = arith.truncf %283 : vector<2x32xf32> to vector<2x32xbf16>
    %285 = vector.extract_strided_slice %282 {offsets = [0, 0, 0], sizes = [1, 2, 32], strides = [1, 1, 1]} : vector<4x2x32xf32> to vector<1x2x32xf32>
    %286 = vector.shape_cast %285 : vector<1x2x32xf32> to vector<2x32xf32>
    %cst_140 = arith.constant dense<0.000000e+00> : vector<2x32xf32>
    %287 = tpu.matmul %284, %4, %cst_140 {dimension_numbers = #tpu.dot_dimension_numbers<[1], [0], [0], [1], [0, 0, 1, 1], [], []>} : vector<2x32xbf16>, vector<32x32xbf16>, vector<2x32xf32> -> vector<2x32xf32>
    %288 = arith.addf %286, %287 : vector<2x32xf32>
    %289 = arith.negf %288 : vector<2x32xf32>
    %290 = math.exp %289 : vector<2x32xf32>
    %cst_141 = arith.constant 1.000000e+00 : f32
    %291 = vector.broadcast %cst_141 : f32 to vector<2x32xf32>
    %292 = arith.addf %291, %290 : vector<2x32xf32>
    %293 = arith.divf %291, %292 : vector<2x32xf32>
    %294 = vector.extract_strided_slice %282 {offsets = [1, 0, 0], sizes = [1, 2, 32], strides = [1, 1, 1]} : vector<4x2x32xf32> to vector<1x2x32xf32>
    %295 = vector.shape_cast %294 : vector<1x2x32xf32> to vector<2x32xf32>
    %cst_142 = arith.constant dense<0.000000e+00> : vector<2x32xf32>
    %296 = tpu.matmul %284, %6, %cst_142 {dimension_numbers = #tpu.dot_dimension_numbers<[1], [0], [0], [1], [0, 0, 1, 1], [], []>} : vector<2x32xbf16>, vector<32x32xbf16>, vector<2x32xf32> -> vector<2x32xf32>
    %297 = arith.addf %295, %296 : vector<2x32xf32>
    %298 = arith.negf %297 : vector<2x32xf32>
    %299 = math.exp %298 : vector<2x32xf32>
    %cst_143 = arith.constant 1.000000e+00 : f32
    %300 = vector.broadcast %cst_143 : f32 to vector<2x32xf32>
    %301 = arith.addf %300, %299 : vector<2x32xf32>
    %302 = arith.divf %300, %301 : vector<2x32xf32>
    %303 = vector.extract_strided_slice %282 {offsets = [2, 0, 0], sizes = [1, 2, 32], strides = [1, 1, 1]} : vector<4x2x32xf32> to vector<1x2x32xf32>
    %304 = vector.shape_cast %303 : vector<1x2x32xf32> to vector<2x32xf32>
    %cst_144 = arith.constant dense<0.000000e+00> : vector<2x32xf32>
    %305 = tpu.matmul %284, %8, %cst_144 {dimension_numbers = #tpu.dot_dimension_numbers<[1], [0], [0], [1], [0, 0, 1, 1], [], []>} : vector<2x32xbf16>, vector<32x32xbf16>, vector<2x32xf32> -> vector<2x32xf32>
    %306 = arith.addf %304, %305 : vector<2x32xf32>
    %307 = math.tanh %306 : vector<2x32xf32>
    %308 = vector.extract_strided_slice %282 {offsets = [3, 0, 0], sizes = [1, 2, 32], strides = [1, 1, 1]} : vector<4x2x32xf32> to vector<1x2x32xf32>
    %309 = vector.shape_cast %308 : vector<1x2x32xf32> to vector<2x32xf32>
    %cst_145 = arith.constant dense<0.000000e+00> : vector<2x32xf32>
    %310 = tpu.matmul %284, %10, %cst_145 {dimension_numbers = #tpu.dot_dimension_numbers<[1], [0], [0], [1], [0, 0, 1, 1], [], []>} : vector<2x32xbf16>, vector<32x32xbf16>, vector<2x32xf32> -> vector<2x32xf32>
    %311 = arith.addf %309, %310 : vector<2x32xf32>
    %312 = arith.negf %311 : vector<2x32xf32>
    %313 = math.exp %312 : vector<2x32xf32>
    %cst_146 = arith.constant 1.000000e+00 : f32
    %314 = vector.broadcast %cst_146 : f32 to vector<2x32xf32>
    %315 = arith.addf %314, %313 : vector<2x32xf32>
    %316 = arith.divf %314, %315 : vector<2x32xf32>
    %c0_147 = arith.constant 0 : index
    %c0_148 = arith.constant 0 : index
    %317 = vector.load %arg6[%c0_147, %c0_148] : memref<2x32xf32, #tpu.memory_space<vmem>>, vector<2x32xf32>
    %318 = arith.mulf %302, %317 : vector<2x32xf32>
    %319 = arith.mulf %293, %307 : vector<2x32xf32>
    %320 = arith.addf %318, %319 : vector<2x32xf32>
    %321 = math.tanh %320 : vector<2x32xf32>
    %322 = arith.mulf %316, %321 : vector<2x32xf32>
    %c0_149 = arith.constant 0 : index
    %c0_150 = arith.constant 0 : index
    %323 = vector.load %arg6[%c0_149, %c0_150] : memref<2x32xf32, #tpu.memory_space<vmem>>, vector<2x32xf32>
    tpu.vector_store %arg6[%c0_149, %c0_150], %320 {strides = array<i32>} : memref<2x32xf32, #tpu.memory_space<vmem>>, vector<2x32xf32>,
    %c0_151 = arith.constant 0 : index
    %c0_152 = arith.constant 0 : index
    %324 = vector.load %arg5[%c0_151, %c0_152] : memref<2x32xf32, #tpu.memory_space<vmem>>, vector<2x32xf32>
    tpu.vector_store %arg5[%c0_151, %c0_152], %322 {strides = array<i32>} : memref<2x32xf32, #tpu.memory_space<vmem>>, vector<2x32xf32>,
    %c0_153 = arith.constant 0 : index
    %325 = arith.index_cast %279 : i32 to index
    %c0_154 = arith.constant 0 : index
    %c0_155 = arith.constant 0 : index
    %326 = vector.load %arg4[%c0_153, %325, %c0_154, %c0_155] : memref<1x16x2x32xf32, #tpu.memory_space<vmem>>, vector<1x1x2x32xf32>
    %327 = vector.shape_cast %326 : vector<1x1x2x32xf32> to vector<2x32xf32>
    %328 = vector.shape_cast %322 : vector<2x32xf32> to vector<1x1x2x32xf32>
    tpu.vector_store %arg4[%c0_153, %325, %c0_154, %c0_155], %328 {strides = array<i32>} : memref<1x16x2x32xf32, #tpu.memory_space<vmem>>, vector<1x1x2x32xf32>,
    %c6_i32 = arith.constant 6 : i32
    %c2_i32_156 = arith.constant 2 : i32
    %329 = arith.muli %c2_i32_156, %c6_i32 : i32
    %c15_i32_157 = arith.constant 15 : i32
    %330 = arith.subi %c15_i32_157, %329 : i32
    %331 = arith.muli %arg0, %330 : i32
    %332 = arith.addi %c6_i32, %331 : i32
    %c0_158 = arith.constant 0 : index
    %333 = arith.index_cast %332 : i32 to index
    %c0_159 = arith.constant 0 : index
    %c0_160 = arith.constant 0 : index
    %c0_161 = arith.constant 0 : index
    %334 = vector.load %arg2[%c0_158, %333, %c0_159, %c0_160, %c0_161] : memref<1x16x4x2x32xf32, #tpu.memory_space<vmem>>, vector<1x1x4x2x32xf32>
    %335 = vector.shape_cast %334 : vector<1x1x4x2x32xf32> to vector<4x2x32xf32>
    %c0_162 = arith.constant 0 : index
    %c0_163 = arith.constant 0 : index
    %336 = vector.load %arg5[%c0_162, %c0_163] : memref<2x32xf32, #tpu.memory_space<vmem>>, vector<2x32xf32>
    %337 = arith.truncf %336 : vector<2x32xf32> to vector<2x32xbf16>
    %338 = vector.extract_strided_slice %335 {offsets = [0, 0, 0], sizes = [1, 2, 32], strides = [1, 1, 1]} : vector<4x2x32xf32> to vector<1x2x32xf32>
    %339 = vector.shape_cast %338 : vector<1x2x32xf32> to vector<2x32xf32>
    %cst_164 = arith.constant dense<0.000000e+00> : vector<2x32xf32>
    %340 = tpu.matmul %337, %4, %cst_164 {dimension_numbers = #tpu.dot_dimension_numbers<[1], [0], [0], [1], [0, 0, 1, 1], [], []>} : vector<2x32xbf16>, vector<32x32xbf16>, vector<2x32xf32> -> vector<2x32xf32>
    %341 = arith.addf %339, %340 : vector<2x32xf32>
    %342 = arith.negf %341 : vector<2x32xf32>
    %343 = math.exp %342 : vector<2x32xf32>
    %cst_165 = arith.constant 1.000000e+00 : f32
    %344 = vector.broadcast %cst_165 : f32 to vector<2x32xf32>
    %345 = arith.addf %344, %343 : vector<2x32xf32>
    %346 = arith.divf %344, %345 : vector<2x32xf32>
    %347 = vector.extract_strided_slice %335 {offsets = [1, 0, 0], sizes = [1, 2, 32], strides = [1, 1, 1]} : vector<4x2x32xf32> to vector<1x2x32xf32>
    %348 = vector.shape_cast %347 : vector<1x2x32xf32> to vector<2x32xf32>
    %cst_166 = arith.constant dense<0.000000e+00> : vector<2x32xf32>
    %349 = tpu.matmul %337, %6, %cst_166 {dimension_numbers = #tpu.dot_dimension_numbers<[1], [0], [0], [1], [0, 0, 1, 1], [], []>} : vector<2x32xbf16>, vector<32x32xbf16>, vector<2x32xf32> -> vector<2x32xf32>
    %350 = arith.addf %348, %349 : vector<2x32xf32>
    %351 = arith.negf %350 : vector<2x32xf32>
    %352 = math.exp %351 : vector<2x32xf32>
    %cst_167 = arith.constant 1.000000e+00 : f32
    %353 = vector.broadcast %cst_167 : f32 to vector<2x32xf32>
    %354 = arith.addf %353, %352 : vector<2x32xf32>
    %355 = arith.divf %353, %354 : vector<2x32xf32>
    %356 = vector.extract_strided_slice %335 {offsets = [2, 0, 0], sizes = [1, 2, 32], strides = [1, 1, 1]} : vector<4x2x32xf32> to vector<1x2x32xf32>
    %357 = vector.shape_cast %356 : vector<1x2x32xf32> to vector<2x32xf32>
    %cst_168 = arith.constant dense<0.000000e+00> : vector<2x32xf32>
    %358 = tpu.matmul %337, %8, %cst_168 {dimension_numbers = #tpu.dot_dimension_numbers<[1], [0], [0], [1], [0, 0, 1, 1], [], []>} : vector<2x32xbf16>, vector<32x32xbf16>, vector<2x32xf32> -> vector<2x32xf32>
    %359 = arith.addf %357, %358 : vector<2x32xf32>
    %360 = math.tanh %359 : vector<2x32xf32>
    %361 = vector.extract_strided_slice %335 {offsets = [3, 0, 0], sizes = [1, 2, 32], strides = [1, 1, 1]} : vector<4x2x32xf32> to vector<1x2x32xf32>
    %362 = vector.shape_cast %361 : vector<1x2x32xf32> to vector<2x32xf32>
    %cst_169 = arith.constant dense<0.000000e+00> : vector<2x32xf32>
    %363 = tpu.matmul %337, %10, %cst_169 {dimension_numbers = #tpu.dot_dimension_numbers<[1], [0], [0], [1], [0, 0, 1, 1], [], []>} : vector<2x32xbf16>, vector<32x32xbf16>, vector<2x32xf32> -> vector<2x32xf32>
    %364 = arith.addf %362, %363 : vector<2x32xf32>
    %365 = arith.negf %364 : vector<2x32xf32>
    %366 = math.exp %365 : vector<2x32xf32>
    %cst_170 = arith.constant 1.000000e+00 : f32
    %367 = vector.broadcast %cst_170 : f32 to vector<2x32xf32>
    %368 = arith.addf %367, %366 : vector<2x32xf32>
    %369 = arith.divf %367, %368 : vector<2x32xf32>
    %c0_171 = arith.constant 0 : index
    %c0_172 = arith.constant 0 : index
    %370 = vector.load %arg6[%c0_171, %c0_172] : memref<2x32xf32, #tpu.memory_space<vmem>>, vector<2x32xf32>
    %371 = arith.mulf %355, %370 : vector<2x32xf32>
    %372 = arith.mulf %346, %360 : vector<2x32xf32>
    %373 = arith.addf %371, %372 : vector<2x32xf32>
    %374 = math.tanh %373 : vector<2x32xf32>
    %375 = arith.mulf %369, %374 : vector<2x32xf32>
    %c0_173 = arith.constant 0 : index
    %c0_174 = arith.constant 0 : index
    %376 = vector.load %arg6[%c0_173, %c0_174] : memref<2x32xf32, #tpu.memory_space<vmem>>, vector<2x32xf32>
    tpu.vector_store %arg6[%c0_173, %c0_174], %373 {strides = array<i32>} : memref<2x32xf32, #tpu.memory_space<vmem>>, vector<2x32xf32>,
    %c0_175 = arith.constant 0 : index
    %c0_176 = arith.constant 0 : index
    %377 = vector.load %arg5[%c0_175, %c0_176] : memref<2x32xf32, #tpu.memory_space<vmem>>, vector<2x32xf32>
    tpu.vector_store %arg5[%c0_175, %c0_176], %375 {strides = array<i32>} : memref<2x32xf32, #tpu.memory_space<vmem>>, vector<2x32xf32>,
    %c0_177 = arith.constant 0 : index
    %378 = arith.index_cast %332 : i32 to index
    %c0_178 = arith.constant 0 : index
    %c0_179 = arith.constant 0 : index
    %379 = vector.load %arg4[%c0_177, %378, %c0_178, %c0_179] : memref<1x16x2x32xf32, #tpu.memory_space<vmem>>, vector<1x1x2x32xf32>
    %380 = vector.shape_cast %379 : vector<1x1x2x32xf32> to vector<2x32xf32>
    %381 = vector.shape_cast %375 : vector<2x32xf32> to vector<1x1x2x32xf32>
    tpu.vector_store %arg4[%c0_177, %378, %c0_178, %c0_179], %381 {strides = array<i32>} : memref<1x16x2x32xf32, #tpu.memory_space<vmem>>, vector<1x1x2x32xf32>,
    %c7_i32 = arith.constant 7 : i32
    %c2_i32_180 = arith.constant 2 : i32
    %382 = arith.muli %c2_i32_180, %c7_i32 : i32
    %c15_i32_181 = arith.constant 15 : i32
    %383 = arith.subi %c15_i32_181, %382 : i32
    %384 = arith.muli %arg0, %383 : i32
    %385 = arith.addi %c7_i32, %384 : i32
    %c0_182 = arith.constant 0 : index
    %386 = arith.index_cast %385 : i32 to index
    %c0_183 = arith.constant 0 : index
    %c0_184 = arith.constant 0 : index
    %c0_185 = arith.constant 0 : index
    %387 = vector.load %arg2[%c0_182, %386, %c0_183, %c0_184, %c0_185] : memref<1x16x4x2x32xf32, #tpu.memory_space<vmem>>, vector<1x1x4x2x32xf32>
    %388 = vector.shape_cast %387 : vector<1x1x4x2x32xf32> to vector<4x2x32xf32>
    %c0_186 = arith.constant 0 : index
    %c0_187 = arith.constant 0 : index
    %389 = vector.load %arg5[%c0_186, %c0_187] : memref<2x32xf32, #tpu.memory_space<vmem>>, vector<2x32xf32>
    %390 = arith.truncf %389 : vector<2x32xf32> to vector<2x32xbf16>
    %391 = vector.extract_strided_slice %388 {offsets = [0, 0, 0], sizes = [1, 2, 32], strides = [1, 1, 1]} : vector<4x2x32xf32> to vector<1x2x32xf32>
    %392 = vector.shape_cast %391 : vector<1x2x32xf32> to vector<2x32xf32>
    %cst_188 = arith.constant dense<0.000000e+00> : vector<2x32xf32>
    %393 = tpu.matmul %390, %4, %cst_188 {dimension_numbers = #tpu.dot_dimension_numbers<[1], [0], [0], [1], [0, 0, 1, 1], [], []>} : vector<2x32xbf16>, vector<32x32xbf16>, vector<2x32xf32> -> vector<2x32xf32>
    %394 = arith.addf %392, %393 : vector<2x32xf32>
    %395 = arith.negf %394 : vector<2x32xf32>
    %396 = math.exp %395 : vector<2x32xf32>
    %cst_189 = arith.constant 1.000000e+00 : f32
    %397 = vector.broadcast %cst_189 : f32 to vector<2x32xf32>
    %398 = arith.addf %397, %396 : vector<2x32xf32>
    %399 = arith.divf %397, %398 : vector<2x32xf32>
    %400 = vector.extract_strided_slice %388 {offsets = [1, 0, 0], sizes = [1, 2, 32], strides = [1, 1, 1]} : vector<4x2x32xf32> to vector<1x2x32xf32>
    %401 = vector.shape_cast %400 : vector<1x2x32xf32> to vector<2x32xf32>
    %cst_190 = arith.constant dense<0.000000e+00> : vector<2x32xf32>
    %402 = tpu.matmul %390, %6, %cst_190 {dimension_numbers = #tpu.dot_dimension_numbers<[1], [0], [0], [1], [0, 0, 1, 1], [], []>} : vector<2x32xbf16>, vector<32x32xbf16>, vector<2x32xf32> -> vector<2x32xf32>
    %403 = arith.addf %401, %402 : vector<2x32xf32>
    %404 = arith.negf %403 : vector<2x32xf32>
    %405 = math.exp %404 : vector<2x32xf32>
    %cst_191 = arith.constant 1.000000e+00 : f32
    %406 = vector.broadcast %cst_191 : f32 to vector<2x32xf32>
    %407 = arith.addf %406, %405 : vector<2x32xf32>
    %408 = arith.divf %406, %407 : vector<2x32xf32>
    %409 = vector.extract_strided_slice %388 {offsets = [2, 0, 0], sizes = [1, 2, 32], strides = [1, 1, 1]} : vector<4x2x32xf32> to vector<1x2x32xf32>
    %410 = vector.shape_cast %409 : vector<1x2x32xf32> to vector<2x32xf32>
    %cst_192 = arith.constant dense<0.000000e+00> : vector<2x32xf32>
    %411 = tpu.matmul %390, %8, %cst_192 {dimension_numbers = #tpu.dot_dimension_numbers<[1], [0], [0], [1], [0, 0, 1, 1], [], []>} : vector<2x32xbf16>, vector<32x32xbf16>, vector<2x32xf32> -> vector<2x32xf32>
    %412 = arith.addf %410, %411 : vector<2x32xf32>
    %413 = math.tanh %412 : vector<2x32xf32>
    %414 = vector.extract_strided_slice %388 {offsets = [3, 0, 0], sizes = [1, 2, 32], strides = [1, 1, 1]} : vector<4x2x32xf32> to vector<1x2x32xf32>
    %415 = vector.shape_cast %414 : vector<1x2x32xf32> to vector<2x32xf32>
    %cst_193 = arith.constant dense<0.000000e+00> : vector<2x32xf32>
    %416 = tpu.matmul %390, %10, %cst_193 {dimension_numbers = #tpu.dot_dimension_numbers<[1], [0], [0], [1], [0, 0, 1, 1], [], []>} : vector<2x32xbf16>, vector<32x32xbf16>, vector<2x32xf32> -> vector<2x32xf32>
    %417 = arith.addf %415, %416 : vector<2x32xf32>
    %418 = arith.negf %417 : vector<2x32xf32>
    %419 = math.exp %418 : vector<2x32xf32>
    %cst_194 = arith.constant 1.000000e+00 : f32
    %420 = vector.broadcast %cst_194 : f32 to vector<2x32xf32>
    %421 = arith.addf %420, %419 : vector<2x32xf32>
    %422 = arith.divf %420, %421 : vector<2x32xf32>
    %c0_195 = arith.constant 0 : index
    %c0_196 = arith.constant 0 : index
    %423 = vector.load %arg6[%c0_195, %c0_196] : memref<2x32xf32, #tpu.memory_space<vmem>>, vector<2x32xf32>
    %424 = arith.mulf %408, %423 : vector<2x32xf32>
    %425 = arith.mulf %399, %413 : vector<2x32xf32>
    %426 = arith.addf %424, %425 : vector<2x32xf32>
    %427 = math.tanh %426 : vector<2x32xf32>
    %428 = arith.mulf %422, %427 : vector<2x32xf32>
    %c0_197 = arith.constant 0 : index
    %c0_198 = arith.constant 0 : index
    %429 = vector.load %arg6[%c0_197, %c0_198] : memref<2x32xf32, #tpu.memory_space<vmem>>, vector<2x32xf32>
    tpu.vector_store %arg6[%c0_197, %c0_198], %426 {strides = array<i32>} : memref<2x32xf32, #tpu.memory_space<vmem>>, vector<2x32xf32>,
    %c0_199 = arith.constant 0 : index
    %c0_200 = arith.constant 0 : index
    %430 = vector.load %arg5[%c0_199, %c0_200] : memref<2x32xf32, #tpu.memory_space<vmem>>, vector<2x32xf32>
    tpu.vector_store %arg5[%c0_199, %c0_200], %428 {strides = array<i32>} : memref<2x32xf32, #tpu.memory_space<vmem>>, vector<2x32xf32>,
    %c0_201 = arith.constant 0 : index
    %431 = arith.index_cast %385 : i32 to index
    %c0_202 = arith.constant 0 : index
    %c0_203 = arith.constant 0 : index
    %432 = vector.load %arg4[%c0_201, %431, %c0_202, %c0_203] : memref<1x16x2x32xf32, #tpu.memory_space<vmem>>, vector<1x1x2x32xf32>
    %433 = vector.shape_cast %432 : vector<1x1x2x32xf32> to vector<2x32xf32>
    %434 = vector.shape_cast %428 : vector<2x32xf32> to vector<1x1x2x32xf32>
    tpu.vector_store %arg4[%c0_201, %431, %c0_202, %c0_203], %434 {strides = array<i32>} : memref<1x16x2x32xf32, #tpu.memory_space<vmem>>, vector<1x1x2x32xf32>,
    %c8_i32 = arith.constant 8 : i32
    %c2_i32_204 = arith.constant 2 : i32
    %435 = arith.muli %c2_i32_204, %c8_i32 : i32
    %c15_i32_205 = arith.constant 15 : i32
    %436 = arith.subi %c15_i32_205, %435 : i32
    %437 = arith.muli %arg0, %436 : i32
    %438 = arith.addi %c8_i32, %437 : i32
    %c0_206 = arith.constant 0 : index
    %439 = arith.index_cast %438 : i32 to index
    %c0_207 = arith.constant 0 : index
    %c0_208 = arith.constant 0 : index
    %c0_209 = arith.constant 0 : index
    %440 = vector.load %arg2[%c0_206, %439, %c0_207, %c0_208, %c0_209] : memref<1x16x4x2x32xf32, #tpu.memory_space<vmem>>, vector<1x1x4x2x32xf32>
    %441 = vector.shape_cast %440 : vector<1x1x4x2x32xf32> to vector<4x2x32xf32>
    %c0_210 = arith.constant 0 : index
    %c0_211 = arith.constant 0 : index
    %442 = vector.load %arg5[%c0_210, %c0_211] : memref<2x32xf32, #tpu.memory_space<vmem>>, vector<2x32xf32>
    %443 = arith.truncf %442 : vector<2x32xf32> to vector<2x32xbf16>
    %444 = vector.extract_strided_slice %441 {offsets = [0, 0, 0], sizes = [1, 2, 32], strides = [1, 1, 1]} : vector<4x2x32xf32> to vector<1x2x32xf32>
    %445 = vector.shape_cast %444 : vector<1x2x32xf32> to vector<2x32xf32>
    %cst_212 = arith.constant dense<0.000000e+00> : vector<2x32xf32>
    %446 = tpu.matmul %443, %4, %cst_212 {dimension_numbers = #tpu.dot_dimension_numbers<[1], [0], [0], [1], [0, 0, 1, 1], [], []>} : vector<2x32xbf16>, vector<32x32xbf16>, vector<2x32xf32> -> vector<2x32xf32>
    %447 = arith.addf %445, %446 : vector<2x32xf32>
    %448 = arith.negf %447 : vector<2x32xf32>
    %449 = math.exp %448 : vector<2x32xf32>
    %cst_213 = arith.constant 1.000000e+00 : f32
    %450 = vector.broadcast %cst_213 : f32 to vector<2x32xf32>
    %451 = arith.addf %450, %449 : vector<2x32xf32>
    %452 = arith.divf %450, %451 : vector<2x32xf32>
    %453 = vector.extract_strided_slice %441 {offsets = [1, 0, 0], sizes = [1, 2, 32], strides = [1, 1, 1]} : vector<4x2x32xf32> to vector<1x2x32xf32>
    %454 = vector.shape_cast %453 : vector<1x2x32xf32> to vector<2x32xf32>
    %cst_214 = arith.constant dense<0.000000e+00> : vector<2x32xf32>
    %455 = tpu.matmul %443, %6, %cst_214 {dimension_numbers = #tpu.dot_dimension_numbers<[1], [0], [0], [1], [0, 0, 1, 1], [], []>} : vector<2x32xbf16>, vector<32x32xbf16>, vector<2x32xf32> -> vector<2x32xf32>
    %456 = arith.addf %454, %455 : vector<2x32xf32>
    %457 = arith.negf %456 : vector<2x32xf32>
    %458 = math.exp %457 : vector<2x32xf32>
    %cst_215 = arith.constant 1.000000e+00 : f32
    %459 = vector.broadcast %cst_215 : f32 to vector<2x32xf32>
    %460 = arith.addf %459, %458 : vector<2x32xf32>
    %461 = arith.divf %459, %460 : vector<2x32xf32>
    %462 = vector.extract_strided_slice %441 {offsets = [2, 0, 0], sizes = [1, 2, 32], strides = [1, 1, 1]} : vector<4x2x32xf32> to vector<1x2x32xf32>
    %463 = vector.shape_cast %462 : vector<1x2x32xf32> to vector<2x32xf32>
    %cst_216 = arith.constant dense<0.000000e+00> : vector<2x32xf32>
    %464 = tpu.matmul %443, %8, %cst_216 {dimension_numbers = #tpu.dot_dimension_numbers<[1], [0], [0], [1], [0, 0, 1, 1], [], []>} : vector<2x32xbf16>, vector<32x32xbf16>, vector<2x32xf32> -> vector<2x32xf32>
    %465 = arith.addf %463, %464 : vector<2x32xf32>
    %466 = math.tanh %465 : vector<2x32xf32>
    %467 = vector.extract_strided_slice %441 {offsets = [3, 0, 0], sizes = [1, 2, 32], strides = [1, 1, 1]} : vector<4x2x32xf32> to vector<1x2x32xf32>
    %468 = vector.shape_cast %467 : vector<1x2x32xf32> to vector<2x32xf32>
    %cst_217 = arith.constant dense<0.000000e+00> : vector<2x32xf32>
    %469 = tpu.matmul %443, %10, %cst_217 {dimension_numbers = #tpu.dot_dimension_numbers<[1], [0], [0], [1], [0, 0, 1, 1], [], []>} : vector<2x32xbf16>, vector<32x32xbf16>, vector<2x32xf32> -> vector<2x32xf32>
    %470 = arith.addf %468, %469 : vector<2x32xf32>
    %471 = arith.negf %470 : vector<2x32xf32>
    %472 = math.exp %471 : vector<2x32xf32>
    %cst_218 = arith.constant 1.000000e+00 : f32
    %473 = vector.broadcast %cst_218 : f32 to vector<2x32xf32>
    %474 = arith.addf %473, %472 : vector<2x32xf32>
    %475 = arith.divf %473, %474 : vector<2x32xf32>
    %c0_219 = arith.constant 0 : index
    %c0_220 = arith.constant 0 : index
    %476 = vector.load %arg6[%c0_219, %c0_220] : memref<2x32xf32, #tpu.memory_space<vmem>>, vector<2x32xf32>
    %477 = arith.mulf %461, %476 : vector<2x32xf32>
    %478 = arith.mulf %452, %466 : vector<2x32xf32>
    %479 = arith.addf %477, %478 : vector<2x32xf32>
    %480 = math.tanh %479 : vector<2x32xf32>
    %481 = arith.mulf %475, %480 : vector<2x32xf32>
    %c0_221 = arith.constant 0 : index
    %c0_222 = arith.constant 0 : index
    %482 = vector.load %arg6[%c0_221, %c0_222] : memref<2x32xf32, #tpu.memory_space<vmem>>, vector<2x32xf32>
    tpu.vector_store %arg6[%c0_221, %c0_222], %479 {strides = array<i32>} : memref<2x32xf32, #tpu.memory_space<vmem>>, vector<2x32xf32>,
    %c0_223 = arith.constant 0 : index
    %c0_224 = arith.constant 0 : index
    %483 = vector.load %arg5[%c0_223, %c0_224] : memref<2x32xf32, #tpu.memory_space<vmem>>, vector<2x32xf32>
    tpu.vector_store %arg5[%c0_223, %c0_224], %481 {strides = array<i32>} : memref<2x32xf32, #tpu.memory_space<vmem>>, vector<2x32xf32>,
    %c0_225 = arith.constant 0 : index
    %484 = arith.index_cast %438 : i32 to index
    %c0_226 = arith.constant 0 : index
    %c0_227 = arith.constant 0 : index
    %485 = vector.load %arg4[%c0_225, %484, %c0_226, %c0_227] : memref<1x16x2x32xf32, #tpu.memory_space<vmem>>, vector<1x1x2x32xf32>
    %486 = vector.shape_cast %485 : vector<1x1x2x32xf32> to vector<2x32xf32>
    %487 = vector.shape_cast %481 : vector<2x32xf32> to vector<1x1x2x32xf32>
    tpu.vector_store %arg4[%c0_225, %484, %c0_226, %c0_227], %487 {strides = array<i32>} : memref<1x16x2x32xf32, #tpu.memory_space<vmem>>, vector<1x1x2x32xf32>,
    %c9_i32 = arith.constant 9 : i32
    %c2_i32_228 = arith.constant 2 : i32
    %488 = arith.muli %c2_i32_228, %c9_i32 : i32
    %c15_i32_229 = arith.constant 15 : i32
    %489 = arith.subi %c15_i32_229, %488 : i32
    %490 = arith.muli %arg0, %489 : i32
    %491 = arith.addi %c9_i32, %490 : i32
    %c0_230 = arith.constant 0 : index
    %492 = arith.index_cast %491 : i32 to index
    %c0_231 = arith.constant 0 : index
    %c0_232 = arith.constant 0 : index
    %c0_233 = arith.constant 0 : index
    %493 = vector.load %arg2[%c0_230, %492, %c0_231, %c0_232, %c0_233] : memref<1x16x4x2x32xf32, #tpu.memory_space<vmem>>, vector<1x1x4x2x32xf32>
    %494 = vector.shape_cast %493 : vector<1x1x4x2x32xf32> to vector<4x2x32xf32>
    %c0_234 = arith.constant 0 : index
    %c0_235 = arith.constant 0 : index
    %495 = vector.load %arg5[%c0_234, %c0_235] : memref<2x32xf32, #tpu.memory_space<vmem>>, vector<2x32xf32>
    %496 = arith.truncf %495 : vector<2x32xf32> to vector<2x32xbf16>
    %497 = vector.extract_strided_slice %494 {offsets = [0, 0, 0], sizes = [1, 2, 32], strides = [1, 1, 1]} : vector<4x2x32xf32> to vector<1x2x32xf32>
    %498 = vector.shape_cast %497 : vector<1x2x32xf32> to vector<2x32xf32>
    %cst_236 = arith.constant dense<0.000000e+00> : vector<2x32xf32>
    %499 = tpu.matmul %496, %4, %cst_236 {dimension_numbers = #tpu.dot_dimension_numbers<[1], [0], [0], [1], [0, 0, 1, 1], [], []>} : vector<2x32xbf16>, vector<32x32xbf16>, vector<2x32xf32> -> vector<2x32xf32>
    %500 = arith.addf %498, %499 : vector<2x32xf32>
    %501 = arith.negf %500 : vector<2x32xf32>
    %502 = math.exp %501 : vector<2x32xf32>
    %cst_237 = arith.constant 1.000000e+00 : f32
    %503 = vector.broadcast %cst_237 : f32 to vector<2x32xf32>
    %504 = arith.addf %503, %502 : vector<2x32xf32>
    %505 = arith.divf %503, %504 : vector<2x32xf32>
    %506 = vector.extract_strided_slice %494 {offsets = [1, 0, 0], sizes = [1, 2, 32], strides = [1, 1, 1]} : vector<4x2x32xf32> to vector<1x2x32xf32>
    %507 = vector.shape_cast %506 : vector<1x2x32xf32> to vector<2x32xf32>
    %cst_238 = arith.constant dense<0.000000e+00> : vector<2x32xf32>
    %508 = tpu.matmul %496, %6, %cst_238 {dimension_numbers = #tpu.dot_dimension_numbers<[1], [0], [0], [1], [0, 0, 1, 1], [], []>} : vector<2x32xbf16>, vector<32x32xbf16>, vector<2x32xf32> -> vector<2x32xf32>
    %509 = arith.addf %507, %508 : vector<2x32xf32>
    %510 = arith.negf %509 : vector<2x32xf32>
    %511 = math.exp %510 : vector<2x32xf32>
    %cst_239 = arith.constant 1.000000e+00 : f32
    %512 = vector.broadcast %cst_239 : f32 to vector<2x32xf32>
    %513 = arith.addf %512, %511 : vector<2x32xf32>
    %514 = arith.divf %512, %513 : vector<2x32xf32>
    %515 = vector.extract_strided_slice %494 {offsets = [2, 0, 0], sizes = [1, 2, 32], strides = [1, 1, 1]} : vector<4x2x32xf32> to vector<1x2x32xf32>
    %516 = vector.shape_cast %515 : vector<1x2x32xf32> to vector<2x32xf32>
    %cst_240 = arith.constant dense<0.000000e+00> : vector<2x32xf32>
    %517 = tpu.matmul %496, %8, %cst_240 {dimension_numbers = #tpu.dot_dimension_numbers<[1], [0], [0], [1], [0, 0, 1, 1], [], []>} : vector<2x32xbf16>, vector<32x32xbf16>, vector<2x32xf32> -> vector<2x32xf32>
    %518 = arith.addf %516, %517 : vector<2x32xf32>
    %519 = math.tanh %518 : vector<2x32xf32>
    %520 = vector.extract_strided_slice %494 {offsets = [3, 0, 0], sizes = [1, 2, 32], strides = [1, 1, 1]} : vector<4x2x32xf32> to vector<1x2x32xf32>
    %521 = vector.shape_cast %520 : vector<1x2x32xf32> to vector<2x32xf32>
    %cst_241 = arith.constant dense<0.000000e+00> : vector<2x32xf32>
    %522 = tpu.matmul %496, %10, %cst_241 {dimension_numbers = #tpu.dot_dimension_numbers<[1], [0], [0], [1], [0, 0, 1, 1], [], []>} : vector<2x32xbf16>, vector<32x32xbf16>, vector<2x32xf32> -> vector<2x32xf32>
    %523 = arith.addf %521, %522 : vector<2x32xf32>
    %524 = arith.negf %523 : vector<2x32xf32>
    %525 = math.exp %524 : vector<2x32xf32>
    %cst_242 = arith.constant 1.000000e+00 : f32
    %526 = vector.broadcast %cst_242 : f32 to vector<2x32xf32>
    %527 = arith.addf %526, %525 : vector<2x32xf32>
    %528 = arith.divf %526, %527 : vector<2x32xf32>
    %c0_243 = arith.constant 0 : index
    %c0_244 = arith.constant 0 : index
    %529 = vector.load %arg6[%c0_243, %c0_244] : memref<2x32xf32, #tpu.memory_space<vmem>>, vector<2x32xf32>
    %530 = arith.mulf %514, %529 : vector<2x32xf32>
    %531 = arith.mulf %505, %519 : vector<2x32xf32>
    %532 = arith.addf %530, %531 : vector<2x32xf32>
    %533 = math.tanh %532 : vector<2x32xf32>
    %534 = arith.mulf %528, %533 : vector<2x32xf32>
    %c0_245 = arith.constant 0 : index
    %c0_246 = arith.constant 0 : index
    %535 = vector.load %arg6[%c0_245, %c0_246] : memref<2x32xf32, #tpu.memory_space<vmem>>, vector<2x32xf32>
    tpu.vector_store %arg6[%c0_245, %c0_246], %532 {strides = array<i32>} : memref<2x32xf32, #tpu.memory_space<vmem>>, vector<2x32xf32>,
    %c0_247 = arith.constant 0 : index
    %c0_248 = arith.constant 0 : index
    %536 = vector.load %arg5[%c0_247, %c0_248] : memref<2x32xf32, #tpu.memory_space<vmem>>, vector<2x32xf32>
    tpu.vector_store %arg5[%c0_247, %c0_248], %534 {strides = array<i32>} : memref<2x32xf32, #tpu.memory_space<vmem>>, vector<2x32xf32>,
    %c0_249 = arith.constant 0 : index
    %537 = arith.index_cast %491 : i32 to index
    %c0_250 = arith.constant 0 : index
    %c0_251 = arith.constant 0 : index
    %538 = vector.load %arg4[%c0_249, %537, %c0_250, %c0_251] : memref<1x16x2x32xf32, #tpu.memory_space<vmem>>, vector<1x1x2x32xf32>
    %539 = vector.shape_cast %538 : vector<1x1x2x32xf32> to vector<2x32xf32>
    %540 = vector.shape_cast %534 : vector<2x32xf32> to vector<1x1x2x32xf32>
    tpu.vector_store %arg4[%c0_249, %537, %c0_250, %c0_251], %540 {strides = array<i32>} : memref<1x16x2x32xf32, #tpu.memory_space<vmem>>, vector<1x1x2x32xf32>,
    %c10_i32 = arith.constant 10 : i32
    %c2_i32_252 = arith.constant 2 : i32
    %541 = arith.muli %c2_i32_252, %c10_i32 : i32
    %c15_i32_253 = arith.constant 15 : i32
    %542 = arith.subi %c15_i32_253, %541 : i32
    %543 = arith.muli %arg0, %542 : i32
    %544 = arith.addi %c10_i32, %543 : i32
    %c0_254 = arith.constant 0 : index
    %545 = arith.index_cast %544 : i32 to index
    %c0_255 = arith.constant 0 : index
    %c0_256 = arith.constant 0 : index
    %c0_257 = arith.constant 0 : index
    %546 = vector.load %arg2[%c0_254, %545, %c0_255, %c0_256, %c0_257] : memref<1x16x4x2x32xf32, #tpu.memory_space<vmem>>, vector<1x1x4x2x32xf32>
    %547 = vector.shape_cast %546 : vector<1x1x4x2x32xf32> to vector<4x2x32xf32>
    %c0_258 = arith.constant 0 : index
    %c0_259 = arith.constant 0 : index
    %548 = vector.load %arg5[%c0_258, %c0_259] : memref<2x32xf32, #tpu.memory_space<vmem>>, vector<2x32xf32>
    %549 = arith.truncf %548 : vector<2x32xf32> to vector<2x32xbf16>
    %550 = vector.extract_strided_slice %547 {offsets = [0, 0, 0], sizes = [1, 2, 32], strides = [1, 1, 1]} : vector<4x2x32xf32> to vector<1x2x32xf32>
    %551 = vector.shape_cast %550 : vector<1x2x32xf32> to vector<2x32xf32>
    %cst_260 = arith.constant dense<0.000000e+00> : vector<2x32xf32>
    %552 = tpu.matmul %549, %4, %cst_260 {dimension_numbers = #tpu.dot_dimension_numbers<[1], [0], [0], [1], [0, 0, 1, 1], [], []>} : vector<2x32xbf16>, vector<32x32xbf16>, vector<2x32xf32> -> vector<2x32xf32>
    %553 = arith.addf %551, %552 : vector<2x32xf32>
    %554 = arith.negf %553 : vector<2x32xf32>
    %555 = math.exp %554 : vector<2x32xf32>
    %cst_261 = arith.constant 1.000000e+00 : f32
    %556 = vector.broadcast %cst_261 : f32 to vector<2x32xf32>
    %557 = arith.addf %556, %555 : vector<2x32xf32>
    %558 = arith.divf %556, %557 : vector<2x32xf32>
    %559 = vector.extract_strided_slice %547 {offsets = [1, 0, 0], sizes = [1, 2, 32], strides = [1, 1, 1]} : vector<4x2x32xf32> to vector<1x2x32xf32>
    %560 = vector.shape_cast %559 : vector<1x2x32xf32> to vector<2x32xf32>
    %cst_262 = arith.constant dense<0.000000e+00> : vector<2x32xf32>
    %561 = tpu.matmul %549, %6, %cst_262 {dimension_numbers = #tpu.dot_dimension_numbers<[1], [0], [0], [1], [0, 0, 1, 1], [], []>} : vector<2x32xbf16>, vector<32x32xbf16>, vector<2x32xf32> -> vector<2x32xf32>
    %562 = arith.addf %560, %561 : vector<2x32xf32>
    %563 = arith.negf %562 : vector<2x32xf32>
    %564 = math.exp %563 : vector<2x32xf32>
    %cst_263 = arith.constant 1.000000e+00 : f32
    %565 = vector.broadcast %cst_263 : f32 to vector<2x32xf32>
    %566 = arith.addf %565, %564 : vector<2x32xf32>
    %567 = arith.divf %565, %566 : vector<2x32xf32>
    %568 = vector.extract_strided_slice %547 {offsets = [2, 0, 0], sizes = [1, 2, 32], strides = [1, 1, 1]} : vector<4x2x32xf32> to vector<1x2x32xf32>
    %569 = vector.shape_cast %568 : vector<1x2x32xf32> to vector<2x32xf32>
    %cst_264 = arith.constant dense<0.000000e+00> : vector<2x32xf32>
    %570 = tpu.matmul %549, %8, %cst_264 {dimension_numbers = #tpu.dot_dimension_numbers<[1], [0], [0], [1], [0, 0, 1, 1], [], []>} : vector<2x32xbf16>, vector<32x32xbf16>, vector<2x32xf32> -> vector<2x32xf32>
    %571 = arith.addf %569, %570 : vector<2x32xf32>
    %572 = math.tanh %571 : vector<2x32xf32>
    %573 = vector.extract_strided_slice %547 {offsets = [3, 0, 0], sizes = [1, 2, 32], strides = [1, 1, 1]} : vector<4x2x32xf32> to vector<1x2x32xf32>
    %574 = vector.shape_cast %573 : vector<1x2x32xf32> to vector<2x32xf32>
    %cst_265 = arith.constant dense<0.000000e+00> : vector<2x32xf32>
    %575 = tpu.matmul %549, %10, %cst_265 {dimension_numbers = #tpu.dot_dimension_numbers<[1], [0], [0], [1], [0, 0, 1, 1], [], []>} : vector<2x32xbf16>, vector<32x32xbf16>, vector<2x32xf32> -> vector<2x32xf32>
    %576 = arith.addf %574, %575 : vector<2x32xf32>
    %577 = arith.negf %576 : vector<2x32xf32>
    %578 = math.exp %577 : vector<2x32xf32>
    %cst_266 = arith.constant 1.000000e+00 : f32
    %579 = vector.broadcast %cst_266 : f32 to vector<2x32xf32>
    %580 = arith.addf %579, %578 : vector<2x32xf32>
    %581 = arith.divf %579, %580 : vector<2x32xf32>
    %c0_267 = arith.constant 0 : index
    %c0_268 = arith.constant 0 : index
    %582 = vector.load %arg6[%c0_267, %c0_268] : memref<2x32xf32, #tpu.memory_space<vmem>>, vector<2x32xf32>
    %583 = arith.mulf %567, %582 : vector<2x32xf32>
    %584 = arith.mulf %558, %572 : vector<2x32xf32>
    %585 = arith.addf %583, %584 : vector<2x32xf32>
    %586 = math.tanh %585 : vector<2x32xf32>
    %587 = arith.mulf %581, %586 : vector<2x32xf32>
    %c0_269 = arith.constant 0 : index
    %c0_270 = arith.constant 0 : index
    %588 = vector.load %arg6[%c0_269, %c0_270] : memref<2x32xf32, #tpu.memory_space<vmem>>, vector<2x32xf32>
    tpu.vector_store %arg6[%c0_269, %c0_270], %585 {strides = array<i32>} : memref<2x32xf32, #tpu.memory_space<vmem>>, vector<2x32xf32>,
    %c0_271 = arith.constant 0 : index
    %c0_272 = arith.constant 0 : index
    %589 = vector.load %arg5[%c0_271, %c0_272] : memref<2x32xf32, #tpu.memory_space<vmem>>, vector<2x32xf32>
    tpu.vector_store %arg5[%c0_271, %c0_272], %587 {strides = array<i32>} : memref<2x32xf32, #tpu.memory_space<vmem>>, vector<2x32xf32>,
    %c0_273 = arith.constant 0 : index
    %590 = arith.index_cast %544 : i32 to index
    %c0_274 = arith.constant 0 : index
    %c0_275 = arith.constant 0 : index
    %591 = vector.load %arg4[%c0_273, %590, %c0_274, %c0_275] : memref<1x16x2x32xf32, #tpu.memory_space<vmem>>, vector<1x1x2x32xf32>
    %592 = vector.shape_cast %591 : vector<1x1x2x32xf32> to vector<2x32xf32>
    %593 = vector.shape_cast %587 : vector<2x32xf32> to vector<1x1x2x32xf32>
    tpu.vector_store %arg4[%c0_273, %590, %c0_274, %c0_275], %593 {strides = array<i32>} : memref<1x16x2x32xf32, #tpu.memory_space<vmem>>, vector<1x1x2x32xf32>,
    %c11_i32 = arith.constant 11 : i32
    %c2_i32_276 = arith.constant 2 : i32
    %594 = arith.muli %c2_i32_276, %c11_i32 : i32
    %c15_i32_277 = arith.constant 15 : i32
    %595 = arith.subi %c15_i32_277, %594 : i32
    %596 = arith.muli %arg0, %595 : i32
    %597 = arith.addi %c11_i32, %596 : i32
    %c0_278 = arith.constant 0 : index
    %598 = arith.index_cast %597 : i32 to index
    %c0_279 = arith.constant 0 : index
    %c0_280 = arith.constant 0 : index
    %c0_281 = arith.constant 0 : index
    %599 = vector.load %arg2[%c0_278, %598, %c0_279, %c0_280, %c0_281] : memref<1x16x4x2x32xf32, #tpu.memory_space<vmem>>, vector<1x1x4x2x32xf32>
    %600 = vector.shape_cast %599 : vector<1x1x4x2x32xf32> to vector<4x2x32xf32>
    %c0_282 = arith.constant 0 : index
    %c0_283 = arith.constant 0 : index
    %601 = vector.load %arg5[%c0_282, %c0_283] : memref<2x32xf32, #tpu.memory_space<vmem>>, vector<2x32xf32>
    %602 = arith.truncf %601 : vector<2x32xf32> to vector<2x32xbf16>
    %603 = vector.extract_strided_slice %600 {offsets = [0, 0, 0], sizes = [1, 2, 32], strides = [1, 1, 1]} : vector<4x2x32xf32> to vector<1x2x32xf32>
    %604 = vector.shape_cast %603 : vector<1x2x32xf32> to vector<2x32xf32>
    %cst_284 = arith.constant dense<0.000000e+00> : vector<2x32xf32>
    %605 = tpu.matmul %602, %4, %cst_284 {dimension_numbers = #tpu.dot_dimension_numbers<[1], [0], [0], [1], [0, 0, 1, 1], [], []>} : vector<2x32xbf16>, vector<32x32xbf16>, vector<2x32xf32> -> vector<2x32xf32>
    %606 = arith.addf %604, %605 : vector<2x32xf32>
    %607 = arith.negf %606 : vector<2x32xf32>
    %608 = math.exp %607 : vector<2x32xf32>
    %cst_285 = arith.constant 1.000000e+00 : f32
    %609 = vector.broadcast %cst_285 : f32 to vector<2x32xf32>
    %610 = arith.addf %609, %608 : vector<2x32xf32>
    %611 = arith.divf %609, %610 : vector<2x32xf32>
    %612 = vector.extract_strided_slice %600 {offsets = [1, 0, 0], sizes = [1, 2, 32], strides = [1, 1, 1]} : vector<4x2x32xf32> to vector<1x2x32xf32>
    %613 = vector.shape_cast %612 : vector<1x2x32xf32> to vector<2x32xf32>
    %cst_286 = arith.constant dense<0.000000e+00> : vector<2x32xf32>
    %614 = tpu.matmul %602, %6, %cst_286 {dimension_numbers = #tpu.dot_dimension_numbers<[1], [0], [0], [1], [0, 0, 1, 1], [], []>} : vector<2x32xbf16>, vector<32x32xbf16>, vector<2x32xf32> -> vector<2x32xf32>
    %615 = arith.addf %613, %614 : vector<2x32xf32>
    %616 = arith.negf %615 : vector<2x32xf32>
    %617 = math.exp %616 : vector<2x32xf32>
    %cst_287 = arith.constant 1.000000e+00 : f32
    %618 = vector.broadcast %cst_287 : f32 to vector<2x32xf32>
    %619 = arith.addf %618, %617 : vector<2x32xf32>
    %620 = arith.divf %618, %619 : vector<2x32xf32>
    %621 = vector.extract_strided_slice %600 {offsets = [2, 0, 0], sizes = [1, 2, 32], strides = [1, 1, 1]} : vector<4x2x32xf32> to vector<1x2x32xf32>
    %622 = vector.shape_cast %621 : vector<1x2x32xf32> to vector<2x32xf32>
    %cst_288 = arith.constant dense<0.000000e+00> : vector<2x32xf32>
    %623 = tpu.matmul %602, %8, %cst_288 {dimension_numbers = #tpu.dot_dimension_numbers<[1], [0], [0], [1], [0, 0, 1, 1], [], []>} : vector<2x32xbf16>, vector<32x32xbf16>, vector<2x32xf32> -> vector<2x32xf32>
    %624 = arith.addf %622, %623 : vector<2x32xf32>
    %625 = math.tanh %624 : vector<2x32xf32>
    %626 = vector.extract_strided_slice %600 {offsets = [3, 0, 0], sizes = [1, 2, 32], strides = [1, 1, 1]} : vector<4x2x32xf32> to vector<1x2x32xf32>
    %627 = vector.shape_cast %626 : vector<1x2x32xf32> to vector<2x32xf32>
    %cst_289 = arith.constant dense<0.000000e+00> : vector<2x32xf32>
    %628 = tpu.matmul %602, %10, %cst_289 {dimension_numbers = #tpu.dot_dimension_numbers<[1], [0], [0], [1], [0, 0, 1, 1], [], []>} : vector<2x32xbf16>, vector<32x32xbf16>, vector<2x32xf32> -> vector<2x32xf32>
    %629 = arith.addf %627, %628 : vector<2x32xf32>
    %630 = arith.negf %629 : vector<2x32xf32>
    %631 = math.exp %630 : vector<2x32xf32>
    %cst_290 = arith.constant 1.000000e+00 : f32
    %632 = vector.broadcast %cst_290 : f32 to vector<2x32xf32>
    %633 = arith.addf %632, %631 : vector<2x32xf32>
    %634 = arith.divf %632, %633 : vector<2x32xf32>
    %c0_291 = arith.constant 0 : index
    %c0_292 = arith.constant 0 : index
    %635 = vector.load %arg6[%c0_291, %c0_292] : memref<2x32xf32, #tpu.memory_space<vmem>>, vector<2x32xf32>
    %636 = arith.mulf %620, %635 : vector<2x32xf32>
    %637 = arith.mulf %611, %625 : vector<2x32xf32>
    %638 = arith.addf %636, %637 : vector<2x32xf32>
    %639 = math.tanh %638 : vector<2x32xf32>
    %640 = arith.mulf %634, %639 : vector<2x32xf32>
    %c0_293 = arith.constant 0 : index
    %c0_294 = arith.constant 0 : index
    %641 = vector.load %arg6[%c0_293, %c0_294] : memref<2x32xf32, #tpu.memory_space<vmem>>, vector<2x32xf32>
    tpu.vector_store %arg6[%c0_293, %c0_294], %638 {strides = array<i32>} : memref<2x32xf32, #tpu.memory_space<vmem>>, vector<2x32xf32>,
    %c0_295 = arith.constant 0 : index
    %c0_296 = arith.constant 0 : index
    %642 = vector.load %arg5[%c0_295, %c0_296] : memref<2x32xf32, #tpu.memory_space<vmem>>, vector<2x32xf32>
    tpu.vector_store %arg5[%c0_295, %c0_296], %640 {strides = array<i32>} : memref<2x32xf32, #tpu.memory_space<vmem>>, vector<2x32xf32>,
    %c0_297 = arith.constant 0 : index
    %643 = arith.index_cast %597 : i32 to index
    %c0_298 = arith.constant 0 : index
    %c0_299 = arith.constant 0 : index
    %644 = vector.load %arg4[%c0_297, %643, %c0_298, %c0_299] : memref<1x16x2x32xf32, #tpu.memory_space<vmem>>, vector<1x1x2x32xf32>
    %645 = vector.shape_cast %644 : vector<1x1x2x32xf32> to vector<2x32xf32>
    %646 = vector.shape_cast %640 : vector<2x32xf32> to vector<1x1x2x32xf32>
    tpu.vector_store %arg4[%c0_297, %643, %c0_298, %c0_299], %646 {strides = array<i32>} : memref<1x16x2x32xf32, #tpu.memory_space<vmem>>, vector<1x1x2x32xf32>,
    %c12_i32 = arith.constant 12 : i32
    %c2_i32_300 = arith.constant 2 : i32
    %647 = arith.muli %c2_i32_300, %c12_i32 : i32
    %c15_i32_301 = arith.constant 15 : i32
    %648 = arith.subi %c15_i32_301, %647 : i32
    %649 = arith.muli %arg0, %648 : i32
    %650 = arith.addi %c12_i32, %649 : i32
    %c0_302 = arith.constant 0 : index
    %651 = arith.index_cast %650 : i32 to index
    %c0_303 = arith.constant 0 : index
    %c0_304 = arith.constant 0 : index
    %c0_305 = arith.constant 0 : index
    %652 = vector.load %arg2[%c0_302, %651, %c0_303, %c0_304, %c0_305] : memref<1x16x4x2x32xf32, #tpu.memory_space<vmem>>, vector<1x1x4x2x32xf32>
    %653 = vector.shape_cast %652 : vector<1x1x4x2x32xf32> to vector<4x2x32xf32>
    %c0_306 = arith.constant 0 : index
    %c0_307 = arith.constant 0 : index
    %654 = vector.load %arg5[%c0_306, %c0_307] : memref<2x32xf32, #tpu.memory_space<vmem>>, vector<2x32xf32>
    %655 = arith.truncf %654 : vector<2x32xf32> to vector<2x32xbf16>
    %656 = vector.extract_strided_slice %653 {offsets = [0, 0, 0], sizes = [1, 2, 32], strides = [1, 1, 1]} : vector<4x2x32xf32> to vector<1x2x32xf32>
    %657 = vector.shape_cast %656 : vector<1x2x32xf32> to vector<2x32xf32>
    %cst_308 = arith.constant dense<0.000000e+00> : vector<2x32xf32>
    %658 = tpu.matmul %655, %4, %cst_308 {dimension_numbers = #tpu.dot_dimension_numbers<[1], [0], [0], [1], [0, 0, 1, 1], [], []>} : vector<2x32xbf16>, vector<32x32xbf16>, vector<2x32xf32> -> vector<2x32xf32>
    %659 = arith.addf %657, %658 : vector<2x32xf32>
    %660 = arith.negf %659 : vector<2x32xf32>
    %661 = math.exp %660 : vector<2x32xf32>
    %cst_309 = arith.constant 1.000000e+00 : f32
    %662 = vector.broadcast %cst_309 : f32 to vector<2x32xf32>
    %663 = arith.addf %662, %661 : vector<2x32xf32>
    %664 = arith.divf %662, %663 : vector<2x32xf32>
    %665 = vector.extract_strided_slice %653 {offsets = [1, 0, 0], sizes = [1, 2, 32], strides = [1, 1, 1]} : vector<4x2x32xf32> to vector<1x2x32xf32>
    %666 = vector.shape_cast %665 : vector<1x2x32xf32> to vector<2x32xf32>
    %cst_310 = arith.constant dense<0.000000e+00> : vector<2x32xf32>
    %667 = tpu.matmul %655, %6, %cst_310 {dimension_numbers = #tpu.dot_dimension_numbers<[1], [0], [0], [1], [0, 0, 1, 1], [], []>} : vector<2x32xbf16>, vector<32x32xbf16>, vector<2x32xf32> -> vector<2x32xf32>
    %668 = arith.addf %666, %667 : vector<2x32xf32>
    %669 = arith.negf %668 : vector<2x32xf32>
    %670 = math.exp %669 : vector<2x32xf32>
    %cst_311 = arith.constant 1.000000e+00 : f32
    %671 = vector.broadcast %cst_311 : f32 to vector<2x32xf32>
    %672 = arith.addf %671, %670 : vector<2x32xf32>
    %673 = arith.divf %671, %672 : vector<2x32xf32>
    %674 = vector.extract_strided_slice %653 {offsets = [2, 0, 0], sizes = [1, 2, 32], strides = [1, 1, 1]} : vector<4x2x32xf32> to vector<1x2x32xf32>
    %675 = vector.shape_cast %674 : vector<1x2x32xf32> to vector<2x32xf32>
    %cst_312 = arith.constant dense<0.000000e+00> : vector<2x32xf32>
    %676 = tpu.matmul %655, %8, %cst_312 {dimension_numbers = #tpu.dot_dimension_numbers<[1], [0], [0], [1], [0, 0, 1, 1], [], []>} : vector<2x32xbf16>, vector<32x32xbf16>, vector<2x32xf32> -> vector<2x32xf32>
    %677 = arith.addf %675, %676 : vector<2x32xf32>
    %678 = math.tanh %677 : vector<2x32xf32>
    %679 = vector.extract_strided_slice %653 {offsets = [3, 0, 0], sizes = [1, 2, 32], strides = [1, 1, 1]} : vector<4x2x32xf32> to vector<1x2x32xf32>
    %680 = vector.shape_cast %679 : vector<1x2x32xf32> to vector<2x32xf32>
    %cst_313 = arith.constant dense<0.000000e+00> : vector<2x32xf32>
    %681 = tpu.matmul %655, %10, %cst_313 {dimension_numbers = #tpu.dot_dimension_numbers<[1], [0], [0], [1], [0, 0, 1, 1], [], []>} : vector<2x32xbf16>, vector<32x32xbf16>, vector<2x32xf32> -> vector<2x32xf32>
    %682 = arith.addf %680, %681 : vector<2x32xf32>
    %683 = arith.negf %682 : vector<2x32xf32>
    %684 = math.exp %683 : vector<2x32xf32>
    %cst_314 = arith.constant 1.000000e+00 : f32
    %685 = vector.broadcast %cst_314 : f32 to vector<2x32xf32>
    %686 = arith.addf %685, %684 : vector<2x32xf32>
    %687 = arith.divf %685, %686 : vector<2x32xf32>
    %c0_315 = arith.constant 0 : index
    %c0_316 = arith.constant 0 : index
    %688 = vector.load %arg6[%c0_315, %c0_316] : memref<2x32xf32, #tpu.memory_space<vmem>>, vector<2x32xf32>
    %689 = arith.mulf %673, %688 : vector<2x32xf32>
    %690 = arith.mulf %664, %678 : vector<2x32xf32>
    %691 = arith.addf %689, %690 : vector<2x32xf32>
    %692 = math.tanh %691 : vector<2x32xf32>
    %693 = arith.mulf %687, %692 : vector<2x32xf32>
    %c0_317 = arith.constant 0 : index
    %c0_318 = arith.constant 0 : index
    %694 = vector.load %arg6[%c0_317, %c0_318] : memref<2x32xf32, #tpu.memory_space<vmem>>, vector<2x32xf32>
    tpu.vector_store %arg6[%c0_317, %c0_318], %691 {strides = array<i32>} : memref<2x32xf32, #tpu.memory_space<vmem>>, vector<2x32xf32>,
    %c0_319 = arith.constant 0 : index
    %c0_320 = arith.constant 0 : index
    %695 = vector.load %arg5[%c0_319, %c0_320] : memref<2x32xf32, #tpu.memory_space<vmem>>, vector<2x32xf32>
    tpu.vector_store %arg5[%c0_319, %c0_320], %693 {strides = array<i32>} : memref<2x32xf32, #tpu.memory_space<vmem>>, vector<2x32xf32>,
    %c0_321 = arith.constant 0 : index
    %696 = arith.index_cast %650 : i32 to index
    %c0_322 = arith.constant 0 : index
    %c0_323 = arith.constant 0 : index
    %697 = vector.load %arg4[%c0_321, %696, %c0_322, %c0_323] : memref<1x16x2x32xf32, #tpu.memory_space<vmem>>, vector<1x1x2x32xf32>
    %698 = vector.shape_cast %697 : vector<1x1x2x32xf32> to vector<2x32xf32>
    %699 = vector.shape_cast %693 : vector<2x32xf32> to vector<1x1x2x32xf32>
    tpu.vector_store %arg4[%c0_321, %696, %c0_322, %c0_323], %699 {strides = array<i32>} : memref<1x16x2x32xf32, #tpu.memory_space<vmem>>, vector<1x1x2x32xf32>,
    %c13_i32 = arith.constant 13 : i32
    %c2_i32_324 = arith.constant 2 : i32
    %700 = arith.muli %c2_i32_324, %c13_i32 : i32
    %c15_i32_325 = arith.constant 15 : i32
    %701 = arith.subi %c15_i32_325, %700 : i32
    %702 = arith.muli %arg0, %701 : i32
    %703 = arith.addi %c13_i32, %702 : i32
    %c0_326 = arith.constant 0 : index
    %704 = arith.index_cast %703 : i32 to index
    %c0_327 = arith.constant 0 : index
    %c0_328 = arith.constant 0 : index
    %c0_329 = arith.constant 0 : index
    %705 = vector.load %arg2[%c0_326, %704, %c0_327, %c0_328, %c0_329] : memref<1x16x4x2x32xf32, #tpu.memory_space<vmem>>, vector<1x1x4x2x32xf32>
    %706 = vector.shape_cast %705 : vector<1x1x4x2x32xf32> to vector<4x2x32xf32>
    %c0_330 = arith.constant 0 : index
    %c0_331 = arith.constant 0 : index
    %707 = vector.load %arg5[%c0_330, %c0_331] : memref<2x32xf32, #tpu.memory_space<vmem>>, vector<2x32xf32>
    %708 = arith.truncf %707 : vector<2x32xf32> to vector<2x32xbf16>
    %709 = vector.extract_strided_slice %706 {offsets = [0, 0, 0], sizes = [1, 2, 32], strides = [1, 1, 1]} : vector<4x2x32xf32> to vector<1x2x32xf32>
    %710 = vector.shape_cast %709 : vector<1x2x32xf32> to vector<2x32xf32>
    %cst_332 = arith.constant dense<0.000000e+00> : vector<2x32xf32>
    %711 = tpu.matmul %708, %4, %cst_332 {dimension_numbers = #tpu.dot_dimension_numbers<[1], [0], [0], [1], [0, 0, 1, 1], [], []>} : vector<2x32xbf16>, vector<32x32xbf16>, vector<2x32xf32> -> vector<2x32xf32>
    %712 = arith.addf %710, %711 : vector<2x32xf32>
    %713 = arith.negf %712 : vector<2x32xf32>
    %714 = math.exp %713 : vector<2x32xf32>
    %cst_333 = arith.constant 1.000000e+00 : f32
    %715 = vector.broadcast %cst_333 : f32 to vector<2x32xf32>
    %716 = arith.addf %715, %714 : vector<2x32xf32>
    %717 = arith.divf %715, %716 : vector<2x32xf32>
    %718 = vector.extract_strided_slice %706 {offsets = [1, 0, 0], sizes = [1, 2, 32], strides = [1, 1, 1]} : vector<4x2x32xf32> to vector<1x2x32xf32>
    %719 = vector.shape_cast %718 : vector<1x2x32xf32> to vector<2x32xf32>
    %cst_334 = arith.constant dense<0.000000e+00> : vector<2x32xf32>
    %720 = tpu.matmul %708, %6, %cst_334 {dimension_numbers = #tpu.dot_dimension_numbers<[1], [0], [0], [1], [0, 0, 1, 1], [], []>} : vector<2x32xbf16>, vector<32x32xbf16>, vector<2x32xf32> -> vector<2x32xf32>
    %721 = arith.addf %719, %720 : vector<2x32xf32>
    %722 = arith.negf %721 : vector<2x32xf32>
    %723 = math.exp %722 : vector<2x32xf32>
    %cst_335 = arith.constant 1.000000e+00 : f32
    %724 = vector.broadcast %cst_335 : f32 to vector<2x32xf32>
    %725 = arith.addf %724, %723 : vector<2x32xf32>
    %726 = arith.divf %724, %725 : vector<2x32xf32>
    %727 = vector.extract_strided_slice %706 {offsets = [2, 0, 0], sizes = [1, 2, 32], strides = [1, 1, 1]} : vector<4x2x32xf32> to vector<1x2x32xf32>
    %728 = vector.shape_cast %727 : vector<1x2x32xf32> to vector<2x32xf32>
    %cst_336 = arith.constant dense<0.000000e+00> : vector<2x32xf32>
    %729 = tpu.matmul %708, %8, %cst_336 {dimension_numbers = #tpu.dot_dimension_numbers<[1], [0], [0], [1], [0, 0, 1, 1], [], []>} : vector<2x32xbf16>, vector<32x32xbf16>, vector<2x32xf32> -> vector<2x32xf32>
    %730 = arith.addf %728, %729 : vector<2x32xf32>
    %731 = math.tanh %730 : vector<2x32xf32>
    %732 = vector.extract_strided_slice %706 {offsets = [3, 0, 0], sizes = [1, 2, 32], strides = [1, 1, 1]} : vector<4x2x32xf32> to vector<1x2x32xf32>
    %733 = vector.shape_cast %732 : vector<1x2x32xf32> to vector<2x32xf32>
    %cst_337 = arith.constant dense<0.000000e+00> : vector<2x32xf32>
    %734 = tpu.matmul %708, %10, %cst_337 {dimension_numbers = #tpu.dot_dimension_numbers<[1], [0], [0], [1], [0, 0, 1, 1], [], []>} : vector<2x32xbf16>, vector<32x32xbf16>, vector<2x32xf32> -> vector<2x32xf32>
    %735 = arith.addf %733, %734 : vector<2x32xf32>
    %736 = arith.negf %735 : vector<2x32xf32>
    %737 = math.exp %736 : vector<2x32xf32>
    %cst_338 = arith.constant 1.000000e+00 : f32
    %738 = vector.broadcast %cst_338 : f32 to vector<2x32xf32>
    %739 = arith.addf %738, %737 : vector<2x32xf32>
    %740 = arith.divf %738, %739 : vector<2x32xf32>
    %c0_339 = arith.constant 0 : index
    %c0_340 = arith.constant 0 : index
    %741 = vector.load %arg6[%c0_339, %c0_340] : memref<2x32xf32, #tpu.memory_space<vmem>>, vector<2x32xf32>
    %742 = arith.mulf %726, %741 : vector<2x32xf32>
    %743 = arith.mulf %717, %731 : vector<2x32xf32>
    %744 = arith.addf %742, %743 : vector<2x32xf32>
    %745 = math.tanh %744 : vector<2x32xf32>
    %746 = arith.mulf %740, %745 : vector<2x32xf32>
    %c0_341 = arith.constant 0 : index
    %c0_342 = arith.constant 0 : index
    %747 = vector.load %arg6[%c0_341, %c0_342] : memref<2x32xf32, #tpu.memory_space<vmem>>, vector<2x32xf32>
    tpu.vector_store %arg6[%c0_341, %c0_342], %744 {strides = array<i32>} : memref<2x32xf32, #tpu.memory_space<vmem>>, vector<2x32xf32>,
    %c0_343 = arith.constant 0 : index
    %c0_344 = arith.constant 0 : index
    %748 = vector.load %arg5[%c0_343, %c0_344] : memref<2x32xf32, #tpu.memory_space<vmem>>, vector<2x32xf32>
    tpu.vector_store %arg5[%c0_343, %c0_344], %746 {strides = array<i32>} : memref<2x32xf32, #tpu.memory_space<vmem>>, vector<2x32xf32>,
    %c0_345 = arith.constant 0 : index
    %749 = arith.index_cast %703 : i32 to index
    %c0_346 = arith.constant 0 : index
    %c0_347 = arith.constant 0 : index
    %750 = vector.load %arg4[%c0_345, %749, %c0_346, %c0_347] : memref<1x16x2x32xf32, #tpu.memory_space<vmem>>, vector<1x1x2x32xf32>
    %751 = vector.shape_cast %750 : vector<1x1x2x32xf32> to vector<2x32xf32>
    %752 = vector.shape_cast %746 : vector<2x32xf32> to vector<1x1x2x32xf32>
    tpu.vector_store %arg4[%c0_345, %749, %c0_346, %c0_347], %752 {strides = array<i32>} : memref<1x16x2x32xf32, #tpu.memory_space<vmem>>, vector<1x1x2x32xf32>,
    %c14_i32 = arith.constant 14 : i32
    %c2_i32_348 = arith.constant 2 : i32
    %753 = arith.muli %c2_i32_348, %c14_i32 : i32
    %c15_i32_349 = arith.constant 15 : i32
    %754 = arith.subi %c15_i32_349, %753 : i32
    %755 = arith.muli %arg0, %754 : i32
    %756 = arith.addi %c14_i32, %755 : i32
    %c0_350 = arith.constant 0 : index
    %757 = arith.index_cast %756 : i32 to index
    %c0_351 = arith.constant 0 : index
    %c0_352 = arith.constant 0 : index
    %c0_353 = arith.constant 0 : index
    %758 = vector.load %arg2[%c0_350, %757, %c0_351, %c0_352, %c0_353] : memref<1x16x4x2x32xf32, #tpu.memory_space<vmem>>, vector<1x1x4x2x32xf32>
    %759 = vector.shape_cast %758 : vector<1x1x4x2x32xf32> to vector<4x2x32xf32>
    %c0_354 = arith.constant 0 : index
    %c0_355 = arith.constant 0 : index
    %760 = vector.load %arg5[%c0_354, %c0_355] : memref<2x32xf32, #tpu.memory_space<vmem>>, vector<2x32xf32>
    %761 = arith.truncf %760 : vector<2x32xf32> to vector<2x32xbf16>
    %762 = vector.extract_strided_slice %759 {offsets = [0, 0, 0], sizes = [1, 2, 32], strides = [1, 1, 1]} : vector<4x2x32xf32> to vector<1x2x32xf32>
    %763 = vector.shape_cast %762 : vector<1x2x32xf32> to vector<2x32xf32>
    %cst_356 = arith.constant dense<0.000000e+00> : vector<2x32xf32>
    %764 = tpu.matmul %761, %4, %cst_356 {dimension_numbers = #tpu.dot_dimension_numbers<[1], [0], [0], [1], [0, 0, 1, 1], [], []>} : vector<2x32xbf16>, vector<32x32xbf16>, vector<2x32xf32> -> vector<2x32xf32>
    %765 = arith.addf %763, %764 : vector<2x32xf32>
    %766 = arith.negf %765 : vector<2x32xf32>
    %767 = math.exp %766 : vector<2x32xf32>
    %cst_357 = arith.constant 1.000000e+00 : f32
    %768 = vector.broadcast %cst_357 : f32 to vector<2x32xf32>
    %769 = arith.addf %768, %767 : vector<2x32xf32>
    %770 = arith.divf %768, %769 : vector<2x32xf32>
    %771 = vector.extract_strided_slice %759 {offsets = [1, 0, 0], sizes = [1, 2, 32], strides = [1, 1, 1]} : vector<4x2x32xf32> to vector<1x2x32xf32>
    %772 = vector.shape_cast %771 : vector<1x2x32xf32> to vector<2x32xf32>
    %cst_358 = arith.constant dense<0.000000e+00> : vector<2x32xf32>
    %773 = tpu.matmul %761, %6, %cst_358 {dimension_numbers = #tpu.dot_dimension_numbers<[1], [0], [0], [1], [0, 0, 1, 1], [], []>} : vector<2x32xbf16>, vector<32x32xbf16>, vector<2x32xf32> -> vector<2x32xf32>
    %774 = arith.addf %772, %773 : vector<2x32xf32>
    %775 = arith.negf %774 : vector<2x32xf32>
    %776 = math.exp %775 : vector<2x32xf32>
    %cst_359 = arith.constant 1.000000e+00 : f32
    %777 = vector.broadcast %cst_359 : f32 to vector<2x32xf32>
    %778 = arith.addf %777, %776 : vector<2x32xf32>
    %779 = arith.divf %777, %778 : vector<2x32xf32>
    %780 = vector.extract_strided_slice %759 {offsets = [2, 0, 0], sizes = [1, 2, 32], strides = [1, 1, 1]} : vector<4x2x32xf32> to vector<1x2x32xf32>
    %781 = vector.shape_cast %780 : vector<1x2x32xf32> to vector<2x32xf32>
    %cst_360 = arith.constant dense<0.000000e+00> : vector<2x32xf32>
    %782 = tpu.matmul %761, %8, %cst_360 {dimension_numbers = #tpu.dot_dimension_numbers<[1], [0], [0], [1], [0, 0, 1, 1], [], []>} : vector<2x32xbf16>, vector<32x32xbf16>, vector<2x32xf32> -> vector<2x32xf32>
    %783 = arith.addf %781, %782 : vector<2x32xf32>
    %784 = math.tanh %783 : vector<2x32xf32>
    %785 = vector.extract_strided_slice %759 {offsets = [3, 0, 0], sizes = [1, 2, 32], strides = [1, 1, 1]} : vector<4x2x32xf32> to vector<1x2x32xf32>
    %786 = vector.shape_cast %785 : vector<1x2x32xf32> to vector<2x32xf32>
    %cst_361 = arith.constant dense<0.000000e+00> : vector<2x32xf32>
    %787 = tpu.matmul %761, %10, %cst_361 {dimension_numbers = #tpu.dot_dimension_numbers<[1], [0], [0], [1], [0, 0, 1, 1], [], []>} : vector<2x32xbf16>, vector<32x32xbf16>, vector<2x32xf32> -> vector<2x32xf32>
    %788 = arith.addf %786, %787 : vector<2x32xf32>
    %789 = arith.negf %788 : vector<2x32xf32>
    %790 = math.exp %789 : vector<2x32xf32>
    %cst_362 = arith.constant 1.000000e+00 : f32
    %791 = vector.broadcast %cst_362 : f32 to vector<2x32xf32>
    %792 = arith.addf %791, %790 : vector<2x32xf32>
    %793 = arith.divf %791, %792 : vector<2x32xf32>
    %c0_363 = arith.constant 0 : index
    %c0_364 = arith.constant 0 : index
    %794 = vector.load %arg6[%c0_363, %c0_364] : memref<2x32xf32, #tpu.memory_space<vmem>>, vector<2x32xf32>
    %795 = arith.mulf %779, %794 : vector<2x32xf32>
    %796 = arith.mulf %770, %784 : vector<2x32xf32>
    %797 = arith.addf %795, %796 : vector<2x32xf32>
    %798 = math.tanh %797 : vector<2x32xf32>
    %799 = arith.mulf %793, %798 : vector<2x32xf32>
    %c0_365 = arith.constant 0 : index
    %c0_366 = arith.constant 0 : index
    %800 = vector.load %arg6[%c0_365, %c0_366] : memref<2x32xf32, #tpu.memory_space<vmem>>, vector<2x32xf32>
    tpu.vector_store %arg6[%c0_365, %c0_366], %797 {strides = array<i32>} : memref<2x32xf32, #tpu.memory_space<vmem>>, vector<2x32xf32>,
    %c0_367 = arith.constant 0 : index
    %c0_368 = arith.constant 0 : index
    %801 = vector.load %arg5[%c0_367, %c0_368] : memref<2x32xf32, #tpu.memory_space<vmem>>, vector<2x32xf32>
    tpu.vector_store %arg5[%c0_367, %c0_368], %799 {strides = array<i32>} : memref<2x32xf32, #tpu.memory_space<vmem>>, vector<2x32xf32>,
    %c0_369 = arith.constant 0 : index
    %802 = arith.index_cast %756 : i32 to index
    %c0_370 = arith.constant 0 : index
    %c0_371 = arith.constant 0 : index
    %803 = vector.load %arg4[%c0_369, %802, %c0_370, %c0_371] : memref<1x16x2x32xf32, #tpu.memory_space<vmem>>, vector<1x1x2x32xf32>
    %804 = vector.shape_cast %803 : vector<1x1x2x32xf32> to vector<2x32xf32>
    %805 = vector.shape_cast %799 : vector<2x32xf32> to vector<1x1x2x32xf32>
    tpu.vector_store %arg4[%c0_369, %802, %c0_370, %c0_371], %805 {strides = array<i32>} : memref<1x16x2x32xf32, #tpu.memory_space<vmem>>, vector<1x1x2x32xf32>,
    %c15_i32_372 = arith.constant 15 : i32
    %c2_i32_373 = arith.constant 2 : i32
    %806 = arith.muli %c2_i32_373, %c15_i32_372 : i32
    %c15_i32_374 = arith.constant 15 : i32
    %807 = arith.subi %c15_i32_374, %806 : i32
    %808 = arith.muli %arg0, %807 : i32
    %809 = arith.addi %c15_i32_372, %808 : i32
    %c0_375 = arith.constant 0 : index
    %810 = arith.index_cast %809 : i32 to index
    %c0_376 = arith.constant 0 : index
    %c0_377 = arith.constant 0 : index
    %c0_378 = arith.constant 0 : index
    %811 = vector.load %arg2[%c0_375, %810, %c0_376, %c0_377, %c0_378] : memref<1x16x4x2x32xf32, #tpu.memory_space<vmem>>, vector<1x1x4x2x32xf32>
    %812 = vector.shape_cast %811 : vector<1x1x4x2x32xf32> to vector<4x2x32xf32>
    %c0_379 = arith.constant 0 : index
    %c0_380 = arith.constant 0 : index
    %813 = vector.load %arg5[%c0_379, %c0_380] : memref<2x32xf32, #tpu.memory_space<vmem>>, vector<2x32xf32>
    %814 = arith.truncf %813 : vector<2x32xf32> to vector<2x32xbf16>
    %815 = vector.extract_strided_slice %812 {offsets = [0, 0, 0], sizes = [1, 2, 32], strides = [1, 1, 1]} : vector<4x2x32xf32> to vector<1x2x32xf32>
    %816 = vector.shape_cast %815 : vector<1x2x32xf32> to vector<2x32xf32>
    %cst_381 = arith.constant dense<0.000000e+00> : vector<2x32xf32>
    %817 = tpu.matmul %814, %4, %cst_381 {dimension_numbers = #tpu.dot_dimension_numbers<[1], [0], [0], [1], [0, 0, 1, 1], [], []>} : vector<2x32xbf16>, vector<32x32xbf16>, vector<2x32xf32> -> vector<2x32xf32>
    %818 = arith.addf %816, %817 : vector<2x32xf32>
    %819 = arith.negf %818 : vector<2x32xf32>
    %820 = math.exp %819 : vector<2x32xf32>
    %cst_382 = arith.constant 1.000000e+00 : f32
    %821 = vector.broadcast %cst_382 : f32 to vector<2x32xf32>
    %822 = arith.addf %821, %820 : vector<2x32xf32>
    %823 = arith.divf %821, %822 : vector<2x32xf32>
    %824 = vector.extract_strided_slice %812 {offsets = [1, 0, 0], sizes = [1, 2, 32], strides = [1, 1, 1]} : vector<4x2x32xf32> to vector<1x2x32xf32>
    %825 = vector.shape_cast %824 : vector<1x2x32xf32> to vector<2x32xf32>
    %cst_383 = arith.constant dense<0.000000e+00> : vector<2x32xf32>
    %826 = tpu.matmul %814, %6, %cst_383 {dimension_numbers = #tpu.dot_dimension_numbers<[1], [0], [0], [1], [0, 0, 1, 1], [], []>} : vector<2x32xbf16>, vector<32x32xbf16>, vector<2x32xf32> -> vector<2x32xf32>
    %827 = arith.addf %825, %826 : vector<2x32xf32>
    %828 = arith.negf %827 : vector<2x32xf32>
    %829 = math.exp %828 : vector<2x32xf32>
    %cst_384 = arith.constant 1.000000e+00 : f32
    %830 = vector.broadcast %cst_384 : f32 to vector<2x32xf32>
    %831 = arith.addf %830, %829 : vector<2x32xf32>
    %832 = arith.divf %830, %831 : vector<2x32xf32>
    %833 = vector.extract_strided_slice %812 {offsets = [2, 0, 0], sizes = [1, 2, 32], strides = [1, 1, 1]} : vector<4x2x32xf32> to vector<1x2x32xf32>
    %834 = vector.shape_cast %833 : vector<1x2x32xf32> to vector<2x32xf32>
    %cst_385 = arith.constant dense<0.000000e+00> : vector<2x32xf32>
    %835 = tpu.matmul %814, %8, %cst_385 {dimension_numbers = #tpu.dot_dimension_numbers<[1], [0], [0], [1], [0, 0, 1, 1], [], []>} : vector<2x32xbf16>, vector<32x32xbf16>, vector<2x32xf32> -> vector<2x32xf32>
    %836 = arith.addf %834, %835 : vector<2x32xf32>
    %837 = math.tanh %836 : vector<2x32xf32>
    %838 = vector.extract_strided_slice %812 {offsets = [3, 0, 0], sizes = [1, 2, 32], strides = [1, 1, 1]} : vector<4x2x32xf32> to vector<1x2x32xf32>
    %839 = vector.shape_cast %838 : vector<1x2x32xf32> to vector<2x32xf32>
    %cst_386 = arith.constant dense<0.000000e+00> : vector<2x32xf32>
    %840 = tpu.matmul %814, %10, %cst_386 {dimension_numbers = #tpu.dot_dimension_numbers<[1], [0], [0], [1], [0, 0, 1, 1], [], []>} : vector<2x32xbf16>, vector<32x32xbf16>, vector<2x32xf32> -> vector<2x32xf32>
    %841 = arith.addf %839, %840 : vector<2x32xf32>
    %842 = arith.negf %841 : vector<2x32xf32>
    %843 = math.exp %842 : vector<2x32xf32>
    %cst_387 = arith.constant 1.000000e+00 : f32
    %844 = vector.broadcast %cst_387 : f32 to vector<2x32xf32>
    %845 = arith.addf %844, %843 : vector<2x32xf32>
    %846 = arith.divf %844, %845 : vector<2x32xf32>
    %c0_388 = arith.constant 0 : index
    %c0_389 = arith.constant 0 : index
    %847 = vector.load %arg6[%c0_388, %c0_389] : memref<2x32xf32, #tpu.memory_space<vmem>>, vector<2x32xf32>
    %848 = arith.mulf %832, %847 : vector<2x32xf32>
    %849 = arith.mulf %823, %837 : vector<2x32xf32>
    %850 = arith.addf %848, %849 : vector<2x32xf32>
    %851 = math.tanh %850 : vector<2x32xf32>
    %852 = arith.mulf %846, %851 : vector<2x32xf32>
    %c0_390 = arith.constant 0 : index
    %c0_391 = arith.constant 0 : index
    %853 = vector.load %arg6[%c0_390, %c0_391] : memref<2x32xf32, #tpu.memory_space<vmem>>, vector<2x32xf32>
    tpu.vector_store %arg6[%c0_390, %c0_391], %850 {strides = array<i32>} : memref<2x32xf32, #tpu.memory_space<vmem>>, vector<2x32xf32>,
    %c0_392 = arith.constant 0 : index
    %c0_393 = arith.constant 0 : index
    %854 = vector.load %arg5[%c0_392, %c0_393] : memref<2x32xf32, #tpu.memory_space<vmem>>, vector<2x32xf32>
    tpu.vector_store %arg5[%c0_392, %c0_393], %852 {strides = array<i32>} : memref<2x32xf32, #tpu.memory_space<vmem>>, vector<2x32xf32>,
    %c0_394 = arith.constant 0 : index
    %855 = arith.index_cast %809 : i32 to index
    %c0_395 = arith.constant 0 : index
    %c0_396 = arith.constant 0 : index
    %856 = vector.load %arg4[%c0_394, %855, %c0_395, %c0_396] : memref<1x16x2x32xf32, #tpu.memory_space<vmem>>, vector<1x1x2x32xf32>
    %857 = vector.shape_cast %856 : vector<1x1x2x32xf32> to vector<2x32xf32>
    %858 = vector.shape_cast %852 : vector<2x32xf32> to vector<1x1x2x32xf32>
    tpu.vector_store %arg4[%c0_394, %855, %c0_395, %c0_396], %858 {strides = array<i32>} : memref<1x16x2x32xf32, #tpu.memory_space<vmem>>, vector<1x1x2x32xf32>,
    %c16_i32 = arith.constant 16 : i32
    return
  }
  func.func @transform_0(%arg0: i32, %arg1: i32) -> (i32, i32, i32, i32, i32) {
    %c2_i32 = arith.constant 2 : i32
    %0 = arith.muli %c2_i32, %arg1 : i32
    %c1_i32 = arith.constant 1 : i32
    %1 = arith.subi %c1_i32, %0 : i32
    %2 = arith.muli %arg0, %1 : i32
    %3 = arith.addi %arg1, %2 : i32
    %c0_i32 = arith.constant 0 : i32
    %c0_i32_0 = arith.constant 0 : i32
    %c0_i32_1 = arith.constant 0 : i32
    %c0_i32_2 = arith.constant 0 : i32
    return %arg0, %3, %c0_i32, %c0_i32_0, %c0_i32_1 : i32, i32, i32, i32, i32
  }
  func.func @transform_1(%arg0: i32, %arg1: i32) -> (i32, i32, i32, i32) {
    %c0_i32 = arith.constant 0 : i32
    %c0_i32_0 = arith.constant 0 : i32
    %c0_i32_1 = arith.constant 0 : i32
    %c0_i32_2 = arith.constant 0 : i32
    return %arg0, %c0_i32, %c0_i32_0, %c0_i32_1 : i32, i32, i32, i32
  }
  func.func @transform_2(%arg0: i32, %arg1: i32) -> (i32, i32, i32, i32) {
    %c2_i32 = arith.constant 2 : i32
    %0 = arith.muli %c2_i32, %arg1 : i32
    %c1_i32 = arith.constant 1 : i32
    %1 = arith.subi %c1_i32, %0 : i32
    %2 = arith.muli %arg0, %1 : i32
    %3 = arith.addi %arg1, %2 : i32
    %c0_i32 = arith.constant 0 : i32
    %c0_i32_0 = arith.constant 0 : i32
    %c0_i32_1 = arith.constant 0 : i32
    return %arg0, %3, %c0_i32, %c0_i32_0 : i32, i32, i32, i32
  }
}

module attributes {stable_mosaic.version = 11 : i64} {
  func.func @_matmul_affine_lrelu_kernel(%arg0: i32, %arg1: memref<64x32xbf16, #tpu.memory_space<vmem>>, %arg2: memref<32x256xbf16, #tpu.memory_space<vmem>>, %arg3: memref<1x256xf32, #tpu.memory_space<vmem>>, %arg4: memref<1x256xf32, #tpu.memory_space<vmem>>, %arg5: memref<64x256xf32, #tpu.memory_space<vmem>>) attributes {dimension_semantics = [#tpu.dimension_semantics<parallel>], iteration_bounds = array<i64: 1>, scalar_prefetch = 0 : i64, scratch_operands = 0 : i64, tpu.core_type = #tpu.core_type<tc>, window_params = [{transform_indices = @transform_0, window_bounds = array<i64: 64, 32>}, {pipeline_mode = #tpu.pipeline_mode<synchronous>, transform_indices = @transform_1, window_bounds = array<i64: 32, 256>}, {pipeline_mode = #tpu.pipeline_mode<synchronous>, transform_indices = @transform_2, window_bounds = array<i64: 1, 256>}, {pipeline_mode = #tpu.pipeline_mode<synchronous>, transform_indices = @transform_3, window_bounds = array<i64: 1, 256>}, {transform_indices = @transform_4, window_bounds = array<i64: 64, 256>}]} {
    %c0 = arith.constant 0 : index
    %c0_0 = arith.constant 0 : index
    %0 = vector.load %arg1[%c0, %c0_0] : memref<64x32xbf16, #tpu.memory_space<vmem>>, vector<64x32xbf16>
    %c0_1 = arith.constant 0 : index
    %c0_2 = arith.constant 0 : index
    %1 = vector.load %arg2[%c0_1, %c0_2] : memref<32x256xbf16, #tpu.memory_space<vmem>>, vector<32x256xbf16>
    %cst = arith.constant dense<0.000000e+00> : vector<64x256xf32>
    %2 = tpu.matmul %0, %1, %cst {dimension_numbers = #tpu.dot_dimension_numbers<[1], [0], [0], [1], [0, 0, 1, 1], [], []>} : vector<64x32xbf16>, vector<32x256xbf16>, vector<64x256xf32> -> vector<64x256xf32>
    %c0_3 = arith.constant 0 : index
    %c0_4 = arith.constant 0 : index
    %3 = vector.load %arg3[%c0_3, %c0_4] : memref<1x256xf32, #tpu.memory_space<vmem>>, vector<1x256xf32>
    %4 = vector.broadcast %3 : vector<1x256xf32> to vector<64x256xf32>
    %5 = arith.mulf %2, %4 : vector<64x256xf32>
    %c0_5 = arith.constant 0 : index
    %c0_6 = arith.constant 0 : index
    %6 = vector.load %arg4[%c0_5, %c0_6] : memref<1x256xf32, #tpu.memory_space<vmem>>, vector<1x256xf32>
    %7 = vector.broadcast %6 : vector<1x256xf32> to vector<64x256xf32>
    %8 = arith.addf %5, %7 : vector<64x256xf32>
    %cst_7 = arith.constant 0.000000e+00 : f32
    %9 = vector.broadcast %cst_7 : f32 to vector<64x256xf32>
    %10 = arith.cmpf oge, %8, %9 : vector<64x256xf32>
    %cst_8 = arith.constant 1.000000e+00 : f32
    %11 = vector.broadcast %cst_8 : f32 to vector<64x256xf32>
    %12 = arith.mulf %11, %8 : vector<64x256xf32>
    %13 = arith.select %10, %8, %12 : vector<64x256xi1>, vector<64x256xf32>
    %c0_9 = arith.constant 0 : index
    %c0_10 = arith.constant 0 : index
    %14 = vector.load %arg5[%c0_9, %c0_10] : memref<64x256xf32, #tpu.memory_space<vmem>>, vector<64x256xf32>
    tpu.vector_store %arg5[%c0_9, %c0_10], %13 {strides = array<i32>} : memref<64x256xf32, #tpu.memory_space<vmem>>, vector<64x256xf32>,
    return
  }
  func.func @transform_0(%arg0: i32) -> (i32, i32) {
    %c0_i32 = arith.constant 0 : i32
    %c0_i32_0 = arith.constant 0 : i32
    return %arg0, %c0_i32 : i32, i32
  }
  func.func @transform_1(%arg0: i32) -> (i32, i32) {
    %c0_i32 = arith.constant 0 : i32
    %c0_i32_0 = arith.constant 0 : i32
    %c0_i32_1 = arith.constant 0 : i32
    return %c0_i32, %c0_i32_0 : i32, i32
  }
  func.func @transform_2(%arg0: i32) -> (i32, i32) {
    %c0_i32 = arith.constant 0 : i32
    %c0_i32_0 = arith.constant 0 : i32
    %c0_i32_1 = arith.constant 0 : i32
    return %c0_i32, %c0_i32_0 : i32, i32
  }
  func.func @transform_3(%arg0: i32) -> (i32, i32) {
    %c0_i32 = arith.constant 0 : i32
    %c0_i32_0 = arith.constant 0 : i32
    %c0_i32_1 = arith.constant 0 : i32
    return %c0_i32, %c0_i32_0 : i32, i32
  }
  func.func @transform_4(%arg0: i32) -> (i32, i32) {
    %c0_i32 = arith.constant 0 : i32
    %c0_i32_0 = arith.constant 0 : i32
    return %arg0, %c0_i32 : i32, i32
  }
}

module attributes {stable_mosaic.version = 11 : i64} {
  func.func @_bn_fc_softmax_kernel(%arg0: i32, %arg1: memref<56x32xf32, #tpu.memory_space<vmem>>, %arg2: memref<1x32xf32, #tpu.memory_space<vmem>>, %arg3: memref<1x32xf32, #tpu.memory_space<vmem>>, %arg4: memref<32x128xbf16, #tpu.memory_space<vmem>>, %arg5: memref<56x128xf32, #tpu.memory_space<vmem>>) attributes {dimension_semantics = [#tpu.dimension_semantics<parallel>], iteration_bounds = array<i64: 1>, scalar_prefetch = 0 : i64, scratch_operands = 0 : i64, tpu.core_type = #tpu.core_type<tc>, window_params = [{transform_indices = @transform_0, window_bounds = array<i64: 56, 32>}, {pipeline_mode = #tpu.pipeline_mode<synchronous>, transform_indices = @transform_1, window_bounds = array<i64: 1, 32>}, {pipeline_mode = #tpu.pipeline_mode<synchronous>, transform_indices = @transform_2, window_bounds = array<i64: 1, 32>}, {pipeline_mode = #tpu.pipeline_mode<synchronous>, transform_indices = @transform_3, window_bounds = array<i64: 32, 128>}, {transform_indices = @transform_4, window_bounds = array<i64: 56, 128>}]} {
    %c0 = arith.constant 0 : index
    %c0_0 = arith.constant 0 : index
    %0 = vector.load %arg1[%c0, %c0_0] : memref<56x32xf32, #tpu.memory_space<vmem>>, vector<56x32xf32>
    %c0_1 = arith.constant 0 : index
    %c0_2 = arith.constant 0 : index
    %1 = vector.load %arg2[%c0_1, %c0_2] : memref<1x32xf32, #tpu.memory_space<vmem>>, vector<1x32xf32>
    %2 = vector.broadcast %1 : vector<1x32xf32> to vector<56x32xf32>
    %3 = arith.mulf %0, %2 : vector<56x32xf32>
    %c0_3 = arith.constant 0 : index
    %c0_4 = arith.constant 0 : index
    %4 = vector.load %arg3[%c0_3, %c0_4] : memref<1x32xf32, #tpu.memory_space<vmem>>, vector<1x32xf32>
    %5 = vector.broadcast %4 : vector<1x32xf32> to vector<56x32xf32>
    %6 = arith.addf %3, %5 : vector<56x32xf32>
    %7 = arith.truncf %6 : vector<56x32xf32> to vector<56x32xbf16>
    %c0_5 = arith.constant 0 : index
    %c0_6 = arith.constant 0 : index
    %8 = vector.load %arg4[%c0_5, %c0_6] : memref<32x128xbf16, #tpu.memory_space<vmem>>, vector<32x128xbf16>
    %cst = arith.constant dense<0.000000e+00> : vector<56x128xf32>
    %9 = tpu.matmul %7, %8, %cst {dimension_numbers = #tpu.dot_dimension_numbers<[1], [0], [0], [1], [0, 0, 1, 1], [], []>} : vector<56x32xbf16>, vector<32x128xbf16>, vector<56x128xf32> -> vector<56x128xf32>
    %10 = tpu.iota {dimensions = array<i32: 1>} : vector<56x128xi32>
    %c3_i32 = arith.constant 3 : i32
    %11 = vector.broadcast %c3_i32 : i32 to vector<56x128xi32>
    %12 = arith.cmpi slt, %10, %11 : vector<56x128xi32>
    %cst_7 = arith.constant 0xFF800000 : f32
    %13 = vector.broadcast %cst_7 : f32 to vector<56x128xf32>
    %14 = arith.select %12, %9, %13 : vector<56x128xi1>, vector<56x128xf32>
    %cst_8 = arith.constant dense<0xFF800000> : vector<56xf32>
    %15 = vector.multi_reduction <maximumf>, %14, %cst_8 [1] : vector<56x128xf32> to vector<56xf32>
    %16 = vector.shape_cast %15 : vector<56xf32> to vector<56x1xf32>
    %17 = vector.broadcast %16 : vector<56x1xf32> to vector<56x128xf32>
    %18 = arith.subf %14, %17 : vector<56x128xf32>
    %19 = math.exp %18 : vector<56x128xf32>
    %cst_9 = arith.constant dense<0.000000e+00> : vector<56xf32>
    %20 = vector.multi_reduction <add>, %19, %cst_9 [1] : vector<56x128xf32> to vector<56xf32>
    %21 = vector.shape_cast %20 : vector<56xf32> to vector<56x1xf32>
    %22 = vector.broadcast %21 : vector<56x1xf32> to vector<56x128xf32>
    %23 = arith.divf %19, %22 : vector<56x128xf32>
    %c0_10 = arith.constant 0 : index
    %c0_11 = arith.constant 0 : index
    %24 = vector.load %arg5[%c0_10, %c0_11] : memref<56x128xf32, #tpu.memory_space<vmem>>, vector<56x128xf32>
    tpu.vector_store %arg5[%c0_10, %c0_11], %23 {strides = array<i32>} : memref<56x128xf32, #tpu.memory_space<vmem>>, vector<56x128xf32>,
    return
  }
  func.func @transform_0(%arg0: i32) -> (i32, i32) {
    %c0_i32 = arith.constant 0 : i32
    %c0_i32_0 = arith.constant 0 : i32
    return %arg0, %c0_i32 : i32, i32
  }
  func.func @transform_1(%arg0: i32) -> (i32, i32) {
    %c0_i32 = arith.constant 0 : i32
    %c0_i32_0 = arith.constant 0 : i32
    %c0_i32_1 = arith.constant 0 : i32
    return %c0_i32, %c0_i32_0 : i32, i32
  }
  func.func @transform_2(%arg0: i32) -> (i32, i32) {
    %c0_i32 = arith.constant 0 : i32
    %c0_i32_0 = arith.constant 0 : i32
    %c0_i32_1 = arith.constant 0 : i32
    return %c0_i32, %c0_i32_0 : i32, i32
  }
  func.func @transform_3(%arg0: i32) -> (i32, i32) {
    %c0_i32 = arith.constant 0 : i32
    %c0_i32_0 = arith.constant 0 : i32
    %c0_i32_1 = arith.constant 0 : i32
    return %c0_i32, %c0_i32_0 : i32, i32
  }
  func.func @transform_4(%arg0: i32) -> (i32, i32) {
    %c0_i32 = arith.constant 0 : i32
    %c0_i32_0 = arith.constant 0 : i32
    return %arg0, %c0_i32 : i32, i32
  }
}

</mosaic_0001>

<bundles_post_ra>
// kernel: deepspeech_forward.7
= control target key start
LH: loop header
LB: loop body
LE: loop exit
PB: predicated region body
PF: predicated region fallthrough
CT: control target
= control target key end

     0   :  { %vm66_vm0 = vcmask 326656   ;;  %vm79_vm1 = vcmask 1043456   ;;  %vm202_vm2 = vcmask 130048   ;;  %s352_s1 = inlined_call_operand.vmem [shape: bf16[40,16], index: 1, kind: input, shape index: {}]   ;;  %s353_s0 = inlined_call_operand.vmem [shape: bf16[64,40], index: 0, kind: input, shape index: {}]   ;;  %s354_s2 = inlined_call_operand.vmem [shape: f32[1,16], index: 2, kind: input, shape index: {}]   ;;  %s355_s3 = inlined_call_operand.vmem [shape: f32[1,16], index: 3, kind: input, shape index: {}]   ;;  %s356_s4 = inlined_call_operand.vmem [shape: f32[64,16], index: 4, kind: output, shape index: {}]  }
   0x1   :  { %v257_v0 = vld [vmem:[%s352_s1] sm:$0xff]   ;;  %v258_v1 = vld [vmem:[%s352_s1 + $0x8] sm:$0xff]   ;;  %v259_v2 = vld [vmem:[%s352_s1 + $0x10] ss:$0 sps:$4 sm:$0xff]  }
   0x2   :  { %235 = vmatprep.subr.bf16.mxu0 %v257_v0  ;;  %249 = vmatprep.subr.bf16.mxu1 %v257_v0  ;;  %v260_v3 = vld [vmem:[%s353_s0] sm:$0xff]   ;;  %v261_v4 = vld [vmem:[%s353_s0 + $0x10] sm:$0xff]   ;;  %v81_v5 = vsel %vm79_vm1, %v259_v2, 0  ;;  %v262_v6 = vld [vmem:[%s353_s0 + $0x8] sm:$0xff]  }
   0x3   :  { %236 = vmatpush3.bf16.msra.mxu0 %v257_v0  ;;  %252 = vmatpush3.bf16.msra.mxu1 %v257_v0  ;;  %v263_v7 = vld [vmem:[%s353_s0 + $0x18] sm:$0xff]   ;;  %v226_v8 = vld [vmem:[%s354_s2] ss:$0 sm:$0xff] }
   0x4   :  { %237 = vmatprep.subr.bf16.mxu0 %v258_v1  ;;  %250 = vmatprep.subr.bf16.mxu1 %v258_v1  ;;  %v227_v10 = vld [vmem:[%s355_s3] ss:$0 sm:$0xff] }
   0x5   :  { %241 = vmatprep.mubr.msk.bf16.mxu0 %vm66_vm0, %v260_v3  ;;  %245 = vmatprep.mubr.msk.bf16.mxu1 %vm66_vm0, %v261_v4 }
   0x7   :  { %238 = vmatpush3.bf16.msra.mxu0 %v258_v1  ;;  %253 = vmatpush3.bf16.msra.mxu1 %v258_v1 }
   0x8   :  { %255 = vmatprep.subr.msk.bf16.mxu0 %vm79_vm1, %v259_v2  ;;  %256 = vmatprep.subr.msk.bf16.mxu1 %vm79_vm1, %v259_v2 }
   0xb   :  { %240 = vmatpush3.bf16.msra.mxu0 %v81_v5  ;;  %254 = vmatpush3.bf16.msra.mxu1 %v81_v5 }
   0xe   :  { %242 = vmatmul.mubr.msk.bf16.vlgmr.msra.gmra.mrb[0].mxu0 %vm66_vm0, %v262_v6  ;;  %246 = vmatmul.mubr.msk.bf16.vlgmr.msra.gmra.mrb[0].mxu1 %vm66_vm0, %v263_v7 }
  0xe1   :  { %v243_v9 = vpop.f32.mrb[0].mxu0  ;;  %v247_v11 = vpop.f32.mrb[0].mxu1 }
  0xe2   :  { %v157_v12 = vmul.f32 %v243_v9, %v226_v8  ;;  %v161_v13 = vmul.f32 %v247_v11, %v226_v8  ;;  %v117_v14 = vpop.f32.mrb[1].mxu0  ;;  %v133_v15 = vpop.f32.mrb[1].mxu1 }
  0xe3   :  { %v155_v16 = vmul.f32 %v226_v8, %v117_v14  ;;  %v159_v17 = vmul.f32 %v226_v8, %v133_v15  ;;  %v244_v18 = vpop.f32.mrb[2].mxu0  ;;  %v248_v19 = vpop.f32.mrb[2].mxu1 }
  0xe4   :  { %v172_v20 = vadd.f32 %v227_v10, %v157_v12  ;;  %v176_v21 = vadd.f32 %v227_v10, %v161_v13  ;;  %v158_v22 = vmul.f32 %v244_v18, %v226_v8  ;;  %v162_v23 = vmul.f32 %v248_v19, %v226_v8  ;;  %v120_v24 = vpop.f32.mrb[3].mxu0  ;;  %v136_v25 = vpop.f32.mrb[3].mxu1 }
  0xe5   :  { %v170_v26 = vadd.f32 %v227_v10, %v155_v16  ;;  %v174_v27 = vadd.f32 %v227_v10, %v159_v17  ;;  %v156_v28 = vmul.f32 %v226_v8, %v120_v24  ;;  %v160_v29 = vmul.f32 %v226_v8, %v136_v25 }
  0xe6   :  { %vm180_vm3 = vcmp.ge.f32.partialorder %v172_v20, 0.0  ;;  %v188_v30 = vmul.f32 16.0, %v172_v20  ;;  %vm184_vm4 = vcmp.ge.f32.partialorder %v176_v21, 0.0  ;;  %v192_v31 = vmul.f32 16.0, %v176_v21 }
  0xe7   :  { %vm178_vm5 = vcmp.ge.f32.partialorder %v170_v26, 0.0  ;;  %v186_v32 = vmul.f32 16.0, %v170_v26  ;;  %vm182_vm6 = vcmp.ge.f32.partialorder %v174_v27, 0.0  ;;  %v190_v33 = vmul.f32 16.0, %v174_v27 }
  0xe8   :  { %v196_v34 = vsel %vm180_vm3, %v172_v20, %v188_v30  ;;  %v200_v35 = vsel %vm184_vm4, %v176_v21, %v192_v31  ;;  %v173_v36 = vadd.f32 %v227_v10, %v158_v22  ;;  %v177_v37 = vadd.f32 %v227_v10, %v162_v23 }
  0xe9   :  { %205 = vst.msk [vmem:[%s356_s4 + $0x10] sm:$0xff] %vm202_vm2, %v196_v34  ;;  %209 = vst.msk [vmem:[%s356_s4 + $0x30] sm:$0xff] %vm202_vm2, %v200_v35  ;;  %v194_v38 = vsel %vm178_vm5, %v170_v26, %v186_v32  ;;  %v198_v39 = vsel %vm182_vm6, %v174_v27, %v190_v33  ;;  %v171_v40 = vadd.f32 %v227_v10, %v156_v28 }
  0xea   :  { %v175_v41 = vadd.f32 %v227_v10, %v160_v29  ;;  %203 = vst.msk [vmem:[%s356_s4] sm:$0xff] %vm202_vm2, %v194_v38  ;;  %207 = vst.msk [vmem:[%s356_s4 + $0x20] sm:$0xff] %vm202_vm2, %v198_v39  ;;  %vm181_vm7 = vcmp.ge.f32.partialorder %v173_v36, 0.0  ;;  %v189_v42 = vmul.f32 16.0, %v173_v36  ;;  %vm185_vm8 = vcmp.ge.f32.partialorder %v177_v37, 0.0 }
  0xeb   :  { %v193_v43 = vmul.f32 16.0, %v177_v37  ;;  %vm179_vm9 = vcmp.ge.f32.partialorder %v171_v40, 0.0  ;;  %v187_v44 = vmul.f32 16.0, %v171_v40 }
  0xec   :  { %vm183_vm10 = vcmp.ge.f32.partialorder %v175_v41, 0.0  ;;  %v191_v45 = vmul.f32 16.0, %v175_v41  ;;  %v197_v46 = vsel %vm181_vm7, %v173_v36, %v189_v42 }
  0xed   :  { %v201_v47 = vsel %vm185_vm8, %v177_v37, %v193_v43  ;;  %206 = vst.msk [vmem:[%s356_s4 + $0x18] sm:$0xff] %vm202_vm2, %v197_v46  ;;  %v195_v48 = vsel %vm179_vm9, %v171_v40, %v187_v44 }
  0xee   :  { %210 = vst.msk [vmem:[%s356_s4 + $0x38] sm:$0xff] %vm202_vm2, %v201_v47  ;;  %v199_v49 = vsel %vm183_vm10, %v175_v41, %v191_v45  ;;  %204 = vst.msk [vmem:[%s356_s4 + $0x8] sm:$0xff] %vm202_vm2, %v195_v48 }
  0xef   :  { %208 = vst.msk [vmem:[%s356_s4 + $0x28] sm:$0xff] %vm202_vm2, %v199_v49 }

// kernel: deepspeech_forward.8
= control target key start
LH: loop header
LB: loop body
LE: loop exit
PB: predicated region body
PF: predicated region fallthrough
CT: control target
= control target key end

     0   :  { %vm86_vm0 = vcmask 654336   ;;  %vm218_vm1 = vcmask 130048   ;;  %s386_s1 = inlined_call_operand.vmem [shape: bf16[80,16], index: 1, kind: input, shape index: {}]   ;;  %s387_s0 = inlined_call_operand.vmem [shape: bf16[64,80], index: 0, kind: input, shape index: {}]   ;;  %s388_s2 = inlined_call_operand.vmem [shape: f32[1,16], index: 2, kind: input, shape index: {}]   ;;  %s389_s3 = inlined_call_operand.vmem [shape: f32[1,16], index: 3, kind: input, shape index: {}]   ;;  %s390_s4 = inlined_call_operand.vmem [shape: f32[64,16], index: 4, kind: output, shape index: {}]  }
   0x1   :  { %v283_v0 = vld [vmem:[%s386_s1] sm:$0xff]   ;;  %v284_v1 = vld [vmem:[%s386_s1 + $0x8] sm:$0xff]   ;;  %v285_v2 = vld [vmem:[%s386_s1 + $0x10] sm:$0xff]  }
   0x2   :  { %255 = vmatprep.subr.bf16.mxu0 %v283_v0  ;;  %273 = vmatprep.subr.bf16.mxu1 %v283_v0  ;;  %v288_v3 = vld [vmem:[%s387_s0] sm:$0xff]   ;;  %v289_v4 = vld [vmem:[%s387_s0 + $0x10] sm:$0xff]   ;;  %v286_v5 = vld [vmem:[%s386_s1 + $0x18] sm:$0xff]  }
   0x3   :  { %256 = vmatpush3.bf16.msra.mxu0 %v283_v0  ;;  %278 = vmatpush3.bf16.msra.mxu1 %v283_v0  ;;  %v287_v6 = vld [vmem:[%s386_s1 + $0x20] sm:$0xff]   ;;  %v290_v7 = vld [vmem:[%s387_s0 + $0x8] sm:$0xff]   ;;  %v291_v8 = vld [vmem:[%s387_s0 + $0x18] sm:$0xff]  }
   0x4   :  { %257 = vmatprep.subr.bf16.mxu0 %v284_v1  ;;  %274 = vmatprep.subr.bf16.mxu1 %v284_v1  ;;  %v244_v9 = vld [vmem:[%s388_s2] ss:$0 sm:$0xff] }
   0x5   :  { %265 = vmatprep.mubr.msk.bf16.mxu0 %vm86_vm0, %v288_v3  ;;  %269 = vmatprep.mubr.msk.bf16.mxu1 %vm86_vm0, %v289_v4  ;;  %v245_v11 = vld [vmem:[%s389_s3] ss:$0 sm:$0xff] }
   0x7   :  { %258 = vmatpush3.bf16.msra.mxu0 %v284_v1  ;;  %279 = vmatpush3.bf16.msra.mxu1 %v284_v1 }
   0x8   :  { %259 = vmatprep.subr.bf16.mxu0 %v285_v2  ;;  %275 = vmatprep.subr.bf16.mxu1 %v285_v2 }
   0xb   :  { %260 = vmatpush3.bf16.msra.mxu0 %v285_v2  ;;  %280 = vmatpush3.bf16.msra.mxu1 %v285_v2 }
   0xc   :  { %261 = vmatprep.subr.bf16.mxu0 %v286_v5  ;;  %276 = vmatprep.subr.bf16.mxu1 %v286_v5 }
   0xf   :  { %262 = vmatpush3.bf16.msra.mxu0 %v286_v5  ;;  %281 = vmatpush3.bf16.msra.mxu1 %v286_v5 }
  0x10   :  { %263 = vmatprep.subr.bf16.mxu0 %v287_v6  ;;  %277 = vmatprep.subr.bf16.mxu1 %v287_v6 }
  0x13   :  { %264 = vmatpush3.bf16.msra.mxu0 %v287_v6  ;;  %282 = vmatpush3.bf16.msra.mxu1 %v287_v6 }
  0x16   :  { %266 = vmatmul.mubr.msk.bf16.vlgmr.msra.gmra.mrb[0].mxu0 %vm86_vm0, %v290_v7  ;;  %270 = vmatmul.mubr.msk.bf16.vlgmr.msra.gmra.mrb[0].mxu1 %vm86_vm0, %v291_v8 }
  0xe9   :  { %v267_v10 = vpop.f32.mrb[0].mxu0  ;;  %v271_v12 = vpop.f32.mrb[0].mxu1 }
  0xea   :  { %v173_v13 = vmul.f32 %v267_v10, %v244_v9  ;;  %v177_v14 = vmul.f32 %v271_v12, %v244_v9  ;;  %v133_v15 = vpop.f32.mrb[1].mxu0  ;;  %v149_v16 = vpop.f32.mrb[1].mxu1 }
  0xeb   :  { %v171_v17 = vmul.f32 %v244_v9, %v133_v15  ;;  %v175_v18 = vmul.f32 %v244_v9, %v149_v16  ;;  %v268_v19 = vpop.f32.mrb[2].mxu0  ;;  %v272_v20 = vpop.f32.mrb[2].mxu1 }
  0xec   :  { %v188_v21 = vadd.f32 %v245_v11, %v173_v13  ;;  %v192_v22 = vadd.f32 %v245_v11, %v177_v14  ;;  %v174_v23 = vmul.f32 %v268_v19, %v244_v9  ;;  %v178_v24 = vmul.f32 %v272_v20, %v244_v9  ;;  %v136_v25 = vpop.f32.mrb[3].mxu0  ;;  %v152_v26 = vpop.f32.mrb[3].mxu1 }
  0xed   :  { %v186_v27 = vadd.f32 %v245_v11, %v171_v17  ;;  %v190_v28 = vadd.f32 %v245_v11, %v175_v18  ;;  %v172_v29 = vmul.f32 %v244_v9, %v136_v25  ;;  %v176_v30 = vmul.f32 %v244_v9, %v152_v26 }
  0xee   :  { %vm196_vm2 = vcmp.ge.f32.partialorder %v188_v21, 0.0  ;;  %v204_v31 = vmul.f32 16.0, %v188_v21  ;;  %vm200_vm3 = vcmp.ge.f32.partialorder %v192_v22, 0.0  ;;  %v208_v32 = vmul.f32 16.0, %v192_v22 }
  0xef   :  { %vm194_vm4 = vcmp.ge.f32.partialorder %v186_v27, 0.0  ;;  %v202_v33 = vmul.f32 16.0, %v186_v27  ;;  %vm198_vm5 = vcmp.ge.f32.partialorder %v190_v28, 0.0  ;;  %v206_v34 = vmul.f32 16.0, %v190_v28 }
  0xf0   :  { %v212_v35 = vsel %vm196_vm2, %v188_v21, %v204_v31  ;;  %v216_v36 = vsel %vm200_vm3, %v192_v22, %v208_v32  ;;  %v189_v37 = vadd.f32 %v245_v11, %v174_v23  ;;  %v193_v38 = vadd.f32 %v245_v11, %v178_v24 }
  0xf1   :  { %221 = vst.msk [vmem:[%s390_s4 + $0x10] sm:$0xff] %vm218_vm1, %v212_v35  ;;  %225 = vst.msk [vmem:[%s390_s4 + $0x30] sm:$0xff] %vm218_vm1, %v216_v36  ;;  %v210_v39 = vsel %vm194_vm4, %v186_v27, %v202_v33  ;;  %v214_v40 = vsel %vm198_vm5, %v190_v28, %v206_v34  ;;  %v187_v41 = vadd.f32 %v245_v11, %v172_v29 }
  0xf2   :  { %v191_v42 = vadd.f32 %v245_v11, %v176_v30  ;;  %219 = vst.msk [vmem:[%s390_s4] sm:$0xff] %vm218_vm1, %v210_v39  ;;  %223 = vst.msk [vmem:[%s390_s4 + $0x20] sm:$0xff] %vm218_vm1, %v214_v40  ;;  %vm197_vm6 = vcmp.ge.f32.partialorder %v189_v37, 0.0  ;;  %v205_v43 = vmul.f32 16.0, %v189_v37  ;;  %vm201_vm7 = vcmp.ge.f32.partialorder %v193_v38, 0.0 }
  0xf3   :  { %v209_v44 = vmul.f32 16.0, %v193_v38  ;;  %vm195_vm8 = vcmp.ge.f32.partialorder %v187_v41, 0.0  ;;  %v203_v45 = vmul.f32 16.0, %v187_v41 }
  0xf4   :  { %vm199_vm9 = vcmp.ge.f32.partialorder %v191_v42, 0.0  ;;  %v207_v46 = vmul.f32 16.0, %v191_v42  ;;  %v213_v47 = vsel %vm197_vm6, %v189_v37, %v205_v43 }
  0xf5   :  { %v217_v48 = vsel %vm201_vm7, %v193_v38, %v209_v44  ;;  %222 = vst.msk [vmem:[%s390_s4 + $0x18] sm:$0xff] %vm218_vm1, %v213_v47  ;;  %v211_v49 = vsel %vm195_vm8, %v187_v41, %v203_v45 }
  0xf6   :  { %226 = vst.msk [vmem:[%s390_s4 + $0x38] sm:$0xff] %vm218_vm1, %v217_v48  ;;  %v215_v50 = vsel %vm199_vm9, %v191_v42, %v207_v46  ;;  %220 = vst.msk [vmem:[%s390_s4 + $0x8] sm:$0xff] %vm218_vm1, %v211_v49 }
  0xf7   :  { %224 = vst.msk [vmem:[%s390_s4 + $0x28] sm:$0xff] %vm218_vm1, %v215_v50 }

// kernel: deepspeech_forward.9
= control target key start
LH: loop header
LB: loop body
LE: loop exit
PB: predicated region body
PF: predicated region fallthrough
CT: control target
= control target key end

     0   :  { %v240_v1 = vmov 0   ;;  %vm58_vm0 = vcmask 130048   ;;  %v146_v7 = vlaneseq  ;;  %s338_s1 = inlined_call_operand.vmem [shape: bf16[16,256], index: 1, kind: input, shape index: {}]   ;;  %s339_s0 = inlined_call_operand.vmem [shape: bf16[64,16], index: 0, kind: input, shape index: {}]   ;;  %s340_s2 = inlined_call_operand.vmem [shape: f32[1,256], index: 2, kind: input, shape index: {}]   ;;  %s341_s3 = inlined_call_operand.vmem [shape: f32[1,256], index: 3, kind: input, shape index: {}]   ;;  %s342_s4 = inlined_call_operand.vmem [shape: f32[64,256], index: 4, kind: output, shape index: {}]  }
   0x1   :  { %v233_v0 = vld [vmem:[%s338_s1 + $0x4] ss:$8 sps:$4 sm:$0xff]   ;;  %103 = vmatprep.mubr.bf16.mxu0 %v240_v1  ;;  %123 = vmatprep.mubr.bf16.mxu1 %v240_v1  ;;  %v235_v2 = vld [vmem:[%s338_s1] ss:$8 sps:$4 sm:$0xff]   ;;  %v237_v4 = vld [vmem:[%s339_s0 + $0x10] sm:$0xff]  }
   0x2   :  { %71 = vmatprep.subr.bf16.mxu0 %v233_v0  ;;  %230 = vmatprep.subr.bf16.mxu1 %v233_v0  ;;  %v236_v3 = vld [vmem:[%s339_s0] sm:$0xff]   ;;  %v238_v5 = vld [vmem:[%s339_s0 + $0x8] sm:$0xff]   ;;  %v239_v6 = vld [vmem:[%s339_s0 + $0x18] sm:$0xff]   ;;  %v147_v8 = vshrl.u32 %v146_v7, 7 }
   0x3   :  { %72 = vmatpush1.bf16.msra.mxu0 %v235_v2  ;;  %231 = vmatpush1.bf16.msra.mxu1 %v235_v2  ;;  %v144_v10 = vld [vmem:[%s340_s2] sm:$0x3] }
   0x4   :  { %v148_v9 = vsub.s32 0, %v147_v8  ;;  %v152_v11 = vsub.s32 1, %v147_v8  ;;  %v172_v12 = vld [vmem:[%s341_s3] sm:$0x3] }
   0x6   :  { %226 = vmatmul.mubr.msk.bf16.vlgmr.msra.gmra.mrb[0].mxu0 %vm58_vm0, %v236_v3  ;;  %228 = vmatmul.mubr.msk.bf16.vlgmr.msra.gmra.mrb[0].mxu1 %vm58_vm0, %v237_v4  ;;  %v149_v13 = vrot.slane %v144_v10, %v148_v9  ;;  %v153_v14 = vrot.slane %v144_v10, %v152_v11  ;;  %v177_v15 = vrot.slane %v172_v12, %v148_v9 }
   0x7   :  { %113 = vmatprep.mubr.bf16.mxu0 %v240_v1  ;;  %133 = vmatprep.mubr.bf16.mxu1 %v240_v1  ;;  %v181_v18 = vrot.slane %v172_v12, %v152_v11 }
   0xe   :  { %227 = vmatmul.mubr.msk.bf16.gmra.mrb[4].mxu0 %vm58_vm0, %v238_v5  ;;  %229 = vmatmul.mubr.msk.bf16.gmra.mrb[4].mxu1 %vm58_vm0, %v239_v6 }
  0xd9   :  { %v105_v16 = vpop.f32.mrb[0].mxu0  ;;  %v125_v17 = vpop.f32.mrb[0].mxu1 }
  0xda   :  { %v156_v19 = vmul.f32 %v149_v13, %v105_v16  ;;  %v164_v20 = vmul.f32 %v149_v13, %v125_v17  ;;  %v107_v21 = vpop.f32.mrb[1].mxu0  ;;  %v127_v22 = vpop.f32.mrb[1].mxu1 }
  0xdb   :  { %v157_v23 = vmul.f32 %v153_v14, %v107_v21  ;;  %v165_v24 = vmul.f32 %v153_v14, %v127_v22  ;;  %v109_v25 = vpop.f32.mrb[2].mxu0  ;;  %v129_v26 = vpop.f32.mrb[2].mxu1 }
  0xdc   :  { %v184_v27 = vadd.f32 %v177_v15, %v156_v19  ;;  %v192_v28 = vadd.f32 %v177_v15, %v164_v20  ;;  %v158_v29 = vmul.f32 %v149_v13, %v109_v25  ;;  %v166_v30 = vmul.f32 %v149_v13, %v129_v26  ;;  %v111_v31 = vpop.f32.mrb[3].mxu0  ;;  %v131_v32 = vpop.f32.mrb[3].mxu1 }
  0xdd   :  { %v185_v33 = vadd.f32 %v181_v18, %v157_v23  ;;  %v193_v34 = vadd.f32 %v181_v18, %v165_v24  ;;  %v159_v35 = vmul.f32 %v153_v14, %v111_v31  ;;  %v167_v36 = vmul.f32 %v153_v14, %v131_v32 }
  0xde   :  { %200 = vst [vmem:[%s342_s4] sm:$0xff] %v184_v27  ;;  %208 = vst [vmem:[%s342_s4 + $0x40] sm:$0xff] %v192_v28  ;;  %v186_v37 = vadd.f32 %v177_v15, %v158_v29  ;;  %v194_v38 = vadd.f32 %v177_v15, %v166_v30 }
  0xdf   :  { %201 = vst [vmem:[%s342_s4 + $0x8] sm:$0xff] %v185_v33  ;;  %209 = vst [vmem:[%s342_s4 + $0x48] sm:$0xff] %v193_v34  ;;  %v187_v39 = vadd.f32 %v181_v18, %v159_v35  ;;  %v195_v40 = vadd.f32 %v181_v18, %v167_v36 }
  0xe0   :  { %202 = vst [vmem:[%s342_s4 + $0x10] sm:$0xff] %v186_v37  ;;  %210 = vst [vmem:[%s342_s4 + $0x50] sm:$0xff] %v194_v38 }
  0xe1   :  { %203 = vst [vmem:[%s342_s4 + $0x18] sm:$0xff] %v187_v39  ;;  %211 = vst [vmem:[%s342_s4 + $0x58] sm:$0xff] %v195_v40  ;;  %v115_v41 = vpop.f32.mrb[4].mxu0  ;;  %v135_v42 = vpop.f32.mrb[4].mxu1 }
  0xe2   :  { %v160_v43 = vmul.f32 %v149_v13, %v115_v41  ;;  %v168_v44 = vmul.f32 %v149_v13, %v135_v42  ;;  %v117_v45 = vpop.f32.mrb[5].mxu0  ;;  %v137_v46 = vpop.f32.mrb[5].mxu1 }
  0xe3   :  { %v161_v47 = vmul.f32 %v153_v14, %v117_v45  ;;  %v169_v48 = vmul.f32 %v153_v14, %v137_v46  ;;  %v119_v49 = vpop.f32.mrb[6].mxu0  ;;  %v139_v50 = vpop.f32.mrb[6].mxu1 }
  0xe4   :  { %v188_v51 = vadd.f32 %v177_v15, %v160_v43  ;;  %v196_v52 = vadd.f32 %v177_v15, %v168_v44  ;;  %v162_v53 = vmul.f32 %v149_v13, %v119_v49  ;;  %v170_v54 = vmul.f32 %v149_v13, %v139_v50  ;;  %v121_v55 = vpop.f32.mrb[7].mxu0  ;;  %v141_v56 = vpop.f32.mrb[7].mxu1 }
  0xe5   :  { %v189_v57 = vadd.f32 %v181_v18, %v161_v47  ;;  %v197_v58 = vadd.f32 %v181_v18, %v169_v48  ;;  %v163_v59 = vmul.f32 %v153_v14, %v121_v55  ;;  %v171_v60 = vmul.f32 %v153_v14, %v141_v56 }
  0xe6   :  { %204 = vst [vmem:[%s342_s4 + $0x20] sm:$0xff] %v188_v51  ;;  %212 = vst [vmem:[%s342_s4 + $0x60] sm:$0xff] %v196_v52  ;;  %v190_v61 = vadd.f32 %v177_v15, %v162_v53  ;;  %v198_v62 = vadd.f32 %v177_v15, %v170_v54 }
  0xe7   :  { %205 = vst [vmem:[%s342_s4 + $0x28] sm:$0xff] %v189_v57  ;;  %213 = vst [vmem:[%s342_s4 + $0x68] sm:$0xff] %v197_v58  ;;  %v191_v63 = vadd.f32 %v181_v18, %v163_v59  ;;  %v199_v0 = vadd.f32 %v181_v18, %v171_v60 }
  0xe8   :  { %206 = vst [vmem:[%s342_s4 + $0x30] sm:$0xff] %v190_v61  ;;  %214 = vst [vmem:[%s342_s4 + $0x70] sm:$0xff] %v198_v62 }
  0xe9   :  { %207 = vst [vmem:[%s342_s4 + $0x38] sm:$0xff] %v191_v63  ;;  %215 = vst [vmem:[%s342_s4 + $0x78] sm:$0xff] %v199_v0 }

// kernel: deepspeech_forward.11
= control target key start
LH: loop header
LB: loop body
LE: loop exit
PB: predicated region body
PF: predicated region fallthrough
CT: control target
= control target key end

     0   :  { %v259_v1 = vmov 0   ;;  %vm70_vm0 = vcmask 261120   ;;  %v158_v9 = vlaneseq  ;;  %s363_s1 = inlined_call_operand.vmem [shape: bf16[32,256], index: 1, kind: input, shape index: {}]   ;;  %s364_s0 = inlined_call_operand.vmem [shape: bf16[64,32], index: 0, kind: input, shape index: {}]   ;;  %s365_s2 = inlined_call_operand.vmem [shape: f32[1,256], index: 2, kind: input, shape index: {}]   ;;  %s366_s3 = inlined_call_operand.vmem [shape: f32[1,256], index: 3, kind: input, shape index: {}]   ;;  %s367_s4 = inlined_call_operand.vmem [shape: f32[64,256], index: 4, kind: output, shape index: {}]  }
   0x1   :  { %v249_v0 = vld [vmem:[%s363_s1 + $0x4] ss:$8 sps:$4 sm:$0xff]   ;;  %115 = vmatprep.mubr.bf16.mxu0 %v259_v1  ;;  %135 = vmatprep.mubr.bf16.mxu1 %v259_v1  ;;  %v251_v2 = vld [vmem:[%s363_s1] ss:$8 sps:$4 sm:$0xff]   ;;  %v252_v3 = vld [vmem:[%s363_s1 + $0x14] ss:$8 sps:$4 sm:$0xff]  }
   0x2   :  { %83 = vmatprep.subr.bf16.mxu0 %v249_v0  ;;  %244 = vmatprep.subr.bf16.mxu1 %v249_v0  ;;  %v254_v4 = vld [vmem:[%s363_s1 + $0x10] ss:$8 sps:$4 sm:$0xff]   ;;  %v255_v5 = vld [vmem:[%s364_s0] sm:$0xff]   ;;  %v257_v7 = vld [vmem:[%s364_s0 + $0x8] sm:$0xff]   ;;  %v159_v10 = vshrl.u32 %v158_v9, 7 }
   0x3   :  { %84 = vmatpush1.bf16.msra.mxu0 %v251_v2  ;;  %246 = vmatpush1.bf16.msra.mxu1 %v251_v2  ;;  %v256_v6 = vld [vmem:[%s364_s0 + $0x10] sm:$0xff]   ;;  %v258_v8 = vld [vmem:[%s364_s0 + $0x18] sm:$0xff]   ;;  %v156_v12 = vld [vmem:[%s365_s2] sm:$0x3] }
   0x4   :  { %85 = vmatprep.subr.bf16.mxu0 %v252_v3  ;;  %245 = vmatprep.subr.bf16.mxu1 %v252_v3  ;;  %v160_v11 = vsub.s32 0, %v159_v10  ;;  %v164_v13 = vsub.s32 1, %v159_v10  ;;  %v184_v14 = vld [vmem:[%s366_s3] sm:$0x3] }
   0x6   :  { %v161_v15 = vrot.slane %v156_v12, %v160_v11  ;;  %v165_v16 = vrot.slane %v156_v12, %v164_v13  ;;  %v189_v17 = vrot.slane %v184_v14, %v160_v11  ;;  %v193_v20 = vrot.slane %v184_v14, %v164_v13 }
   0x7   :  { %86 = vmatpush1.bf16.msra.mxu0 %v254_v4  ;;  %247 = vmatpush1.bf16.msra.mxu1 %v254_v4 }
   0xa   :  { %240 = vmatmul.mubr.msk.bf16.vlgmr.msra.gmra.mrb[0].mxu0 %vm70_vm0, %v255_v5  ;;  %242 = vmatmul.mubr.msk.bf16.vlgmr.msra.gmra.mrb[0].mxu1 %vm70_vm0, %v256_v6 }
   0xb   :  { %125 = vmatprep.mubr.bf16.mxu0 %v259_v1  ;;  %145 = vmatprep.mubr.bf16.mxu1 %v259_v1 }
  0x12   :  { %241 = vmatmul.mubr.msk.bf16.gmra.mrb[4].mxu0 %vm70_vm0, %v257_v7  ;;  %243 = vmatmul.mubr.msk.bf16.gmra.mrb[4].mxu1 %vm70_vm0, %v258_v8 }
  0xdd   :  { %v117_v18 = vpop.f32.mrb[0].mxu0  ;;  %v137_v19 = vpop.f32.mrb[0].mxu1 }
  0xde   :  { %v168_v21 = vmul.f32 %v161_v15, %v117_v18  ;;  %v176_v22 = vmul.f32 %v161_v15, %v137_v19  ;;  %v119_v23 = vpop.f32.mrb[1].mxu0  ;;  %v139_v24 = vpop.f32.mrb[1].mxu1 }
  0xdf   :  { %v169_v25 = vmul.f32 %v165_v16, %v119_v23  ;;  %v177_v26 = vmul.f32 %v165_v16, %v139_v24  ;;  %v121_v27 = vpop.f32.mrb[2].mxu0  ;;  %v141_v28 = vpop.f32.mrb[2].mxu1 }
  0xe0   :  { %v196_v29 = vadd.f32 %v189_v17, %v168_v21  ;;  %v204_v30 = vadd.f32 %v189_v17, %v176_v22  ;;  %v170_v31 = vmul.f32 %v161_v15, %v121_v27  ;;  %v178_v32 = vmul.f32 %v161_v15, %v141_v28  ;;  %v123_v33 = vpop.f32.mrb[3].mxu0  ;;  %v143_v34 = vpop.f32.mrb[3].mxu1 }
  0xe1   :  { %v197_v35 = vadd.f32 %v193_v20, %v169_v25  ;;  %v205_v36 = vadd.f32 %v193_v20, %v177_v26  ;;  %v171_v37 = vmul.f32 %v165_v16, %v123_v33  ;;  %v179_v38 = vmul.f32 %v165_v16, %v143_v34 }
  0xe2   :  { %212 = vst [vmem:[%s367_s4] sm:$0xff] %v196_v29  ;;  %220 = vst [vmem:[%s367_s4 + $0x40] sm:$0xff] %v204_v30  ;;  %v198_v39 = vadd.f32 %v189_v17, %v170_v31  ;;  %v206_v40 = vadd.f32 %v189_v17, %v178_v32 }
  0xe3   :  { %213 = vst [vmem:[%s367_s4 + $0x8] sm:$0xff] %v197_v35  ;;  %221 = vst [vmem:[%s367_s4 + $0x48] sm:$0xff] %v205_v36  ;;  %v199_v41 = vadd.f32 %v193_v20, %v171_v37  ;;  %v207_v42 = vadd.f32 %v193_v20, %v179_v38 }
  0xe4   :  { %214 = vst [vmem:[%s367_s4 + $0x10] sm:$0xff] %v198_v39  ;;  %222 = vst [vmem:[%s367_s4 + $0x50] sm:$0xff] %v206_v40 }
  0xe5   :  { %215 = vst [vmem:[%s367_s4 + $0x18] sm:$0xff] %v199_v41  ;;  %223 = vst [vmem:[%s367_s4 + $0x58] sm:$0xff] %v207_v42  ;;  %v127_v43 = vpop.f32.mrb[4].mxu0  ;;  %v147_v44 = vpop.f32.mrb[4].mxu1 }
  0xe6   :  { %v172_v45 = vmul.f32 %v161_v15, %v127_v43  ;;  %v180_v46 = vmul.f32 %v161_v15, %v147_v44  ;;  %v129_v47 = vpop.f32.mrb[5].mxu0  ;;  %v149_v48 = vpop.f32.mrb[5].mxu1 }
  0xe7   :  { %v173_v49 = vmul.f32 %v165_v16, %v129_v47  ;;  %v181_v50 = vmul.f32 %v165_v16, %v149_v48  ;;  %v131_v51 = vpop.f32.mrb[6].mxu0  ;;  %v151_v52 = vpop.f32.mrb[6].mxu1 }
  0xe8   :  { %v200_v53 = vadd.f32 %v189_v17, %v172_v45  ;;  %v208_v54 = vadd.f32 %v189_v17, %v180_v46  ;;  %v174_v55 = vmul.f32 %v161_v15, %v131_v51  ;;  %v182_v56 = vmul.f32 %v161_v15, %v151_v52  ;;  %v133_v57 = vpop.f32.mrb[7].mxu0  ;;  %v153_v58 = vpop.f32.mrb[7].mxu1 }
  0xe9   :  { %v201_v59 = vadd.f32 %v193_v20, %v173_v49  ;;  %v209_v60 = vadd.f32 %v193_v20, %v181_v50  ;;  %v175_v61 = vmul.f32 %v165_v16, %v133_v57  ;;  %v183_v62 = vmul.f32 %v165_v16, %v153_v58 }
  0xea   :  { %216 = vst [vmem:[%s367_s4 + $0x20] sm:$0xff] %v200_v53  ;;  %224 = vst [vmem:[%s367_s4 + $0x60] sm:$0xff] %v208_v54  ;;  %v202_v63 = vadd.f32 %v189_v17, %v174_v55  ;;  %v210_v0 = vadd.f32 %v189_v17, %v182_v56 }
  0xeb   :  { %217 = vst [vmem:[%s367_s4 + $0x28] sm:$0xff] %v201_v59  ;;  %225 = vst [vmem:[%s367_s4 + $0x68] sm:$0xff] %v209_v60  ;;  %v203_v1 = vadd.f32 %v193_v20, %v175_v61  ;;  %v211_v2 = vadd.f32 %v193_v20, %v183_v62 }
  0xec   :  { %218 = vst [vmem:[%s367_s4 + $0x30] sm:$0xff] %v202_v63  ;;  %226 = vst [vmem:[%s367_s4 + $0x70] sm:$0xff] %v210_v0 }
  0xed   :  { %219 = vst [vmem:[%s367_s4 + $0x38] sm:$0xff] %v203_v1  ;;  %227 = vst [vmem:[%s367_s4 + $0x78] sm:$0xff] %v211_v2 }

// kernel: deepspeech_forward.13
= control target key start
LH: loop header
LB: loop body
LE: loop exit
PB: predicated region body
PF: predicated region fallthrough
CT: control target
= control target key end

     0   :  { %vm73_vm0 = vcmask 261120   ;;  %v150_v29 = vlaneseq  ;;  %s384_s3 = inlined_call_operand.vmem [shape: bf16[32,128], index: 3, kind: input, shape index: {}]   ;;  %s385_s0 = inlined_call_operand.vmem [shape: f32[56,32], index: 0, kind: input, shape index: {}]   ;;  %s386_s1 = inlined_call_operand.vmem [shape: f32[1,32], index: 1, kind: input, shape index: {}]   ;;  %s387_s2 = inlined_call_operand.vmem [shape: f32[1,32], index: 2, kind: input, shape index: {}]   ;;  %s388_s4 = inlined_call_operand.vmem [shape: f32[56,128], index: 4, kind: output, shape index: {}]  }
   0x1   :  { %v264_v0 = vld [vmem:[%s384_s3] sm:$0xff]   ;;  %v265_v1 = vld [vmem:[%s384_s3 + $0x8] sm:$0xff]   ;;  %v20_v8 = vld [vmem:[%s385_s0 + $0x10] sm:$0xff] }
   0x2   :  { %248 = vmatprep.subr.bf16.mxu0 %v264_v0  ;;  %260 = vmatprep.subr.bf16.mxu1 %v264_v0  ;;  %v18_v2 = vld [vmem:[%s385_s0] sm:$0xff]  ;;  %v19_v3 = vld [vmem:[%s385_s0 + $0x8] sm:$0xff]  ;;  %v21_v9 = vld [vmem:[%s385_s0 + $0x18] sm:$0xff]  ;;  %v151_v30 = vand.u32 127, %v150_v29 }
   0x3   :  { %v234_v4 = vld [vmem:[%s386_s1] ss:$0 sm:$0xff]  ;;  %249 = vmatpush3.bf16.msra.mxu0 %v264_v0  ;;  %262 = vmatpush3.bf16.msra.mxu1 %v264_v0  ;;  %v23_v13 = vld [vmem:[%s385_s0 + $0x28] sm:$0xff]  ;;  %v24_v14 = vld [vmem:[%s385_s0 + $0x30] sm:$0xff] }
   0x4   :  { %v32_v5 = vmul.f32 %v234_v4, %v18_v2  ;;  %v33_v6 = vmul.f32 %v234_v4, %v19_v3  ;;  %v235_v7 = vld [vmem:[%s387_s2] ss:$0 sm:$0xff]  ;;  %250 = vmatprep.subr.bf16.mxu0 %v265_v1  ;;  %261 = vmatprep.subr.bf16.mxu1 %v265_v1  ;;  %v34_v10 = vmul.f32 %v234_v4, %v20_v8  ;;  %vm152_vm1 = vcmp.lt.s32.totalorder %v151_v30, 3 }
   0x5   :  { %v35_v11 = vmul.f32 %v234_v4, %v21_v9  ;;  %v22_v12 = vld [vmem:[%s385_s0 + $0x20] sm:$0xff]  ;;  %v37_v18 = vmul.f32 %v234_v4, %v23_v13  ;;  %v38_v21 = vmul.f32 %v234_v4, %v24_v14 }
   0x6   :  { %v46_v15 = vadd.f32 %v235_v7, %v32_v5  ;;  %v47_v16 = vadd.f32 %v235_v7, %v33_v6  ;;  %v36_v17 = vmul.f32 %v234_v4, %v22_v12  ;;  %v48_v19 = vadd.f32 %v235_v7, %v34_v10 }
   0x7   :  { %v49_v20 = vadd.f32 %v235_v7, %v35_v11  ;;  %251 = vmatpush3.bf16.msra.mxu0 %v265_v1  ;;  %263 = vmatpush3.bf16.msra.mxu1 %v265_v1  ;;  %v51_v24 = vadd.f32 %v235_v7, %v37_v18  ;;  %v52_v26 = vadd.f32 %v235_v7, %v38_v21 }
   0x8   :  { %v53_v22 = vpack.c.bf16 %v47_v16, %v46_v15  ;;  %v50_v23 = vadd.f32 %v235_v7, %v36_v17 }
   0x9   :  { %v54_v25 = vpack.c.bf16 %v49_v20, %v48_v19  ;;  %v56_v28 = vpack.c.bf16 %v52_v26, %v52_v26 }
   0xa   :  { %252 = vmatprep.mubr.msk.bf16.mxu0 %vm73_vm0, %v53_v22  ;;  %v55_v27 = vpack.c.bf16 %v51_v24, %v50_v23 }
   0xb   :  { %253 = vmatmul.mubr.msk.bf16.vlgmr.msra.gmra.mrb[0].mxu0 %vm73_vm0, %v54_v25 }
   0xc   :  { %256 = vmatprep.mubr.msk.bf16.mxu1 %vm73_vm0, %v55_v27 }
   0xd   :  { %257 = vmatmul.mubr.msk.bf16.vlgmr.msra.gmra.mrb[0].mxu1 %vm73_vm0, %v56_v28 }
  0xde   :  { %v254_v31 = vpop.f32.mrb[0].mxu0 }
  0xdf   :  { %v120_v32 = vpop.f32.mrb[1].mxu0  ;;  %v155_v33 = vsel %vm152_vm1, %v254_v31, -inf }
  0xe0   :  { %v258_v34 = vpop.f32.mrb[0].mxu1  ;;  %164 = vmax.xlane.f32.xlu1 %v155_v33  ;;  %v255_v35 = vpop.f32.mrb[2].mxu0  ;;  %v153_v36 = vsel %vm152_vm1, %v120_v32, -inf }
  0xe1   :  { %v136_v37 = vpop.f32.mrb[1].mxu1  ;;  %160 = vmax.xlane.f32.xlu0 %v153_v36  ;;  %v123_v38 = vpop.f32.mrb[3].mxu0  ;;  %v156_v42 = vsel %vm152_vm1, %v255_v35, -inf  ;;  %v159_v45 = vsel %vm152_vm1, %v258_v34, -inf }
  0xe2   :  { %v259_v39 = vpop.f32.mrb[2].mxu1  ;;  %v157_v40 = vsel %vm152_vm1, %v136_v37, -inf  ;;  %v154_v44 = vsel %vm152_vm1, %v123_v38, -inf }
  0xe3   :  { %v139_v41 = vpop.f32.mrb[3].mxu1 }
  0xe4   :  { %166 = vmax.xlane.f32.xlu1 %v156_v42  ;;  %v158_v43 = vsel %vm152_vm1, %v139_v41, -inf }
  0xe5   :  { %168 = vmax.xlane.f32.xlu0 %v157_v40 }
  0xe8   :  { %170 = vmax.xlane.f32.xlu1 %v158_v43 }
  0xe9   :  { %162 = vmax.xlane.f32.xlu0 %v154_v44 }
  0xed   :  { %172 = vmax.xlane.f32.xlu0 %v159_v45 }
 0x16d   :  { %v165_v46 = vpop.xlane.xlu1 %164 }
 0x16e   :  { %v176_v47 = vsub.f32 %v155_v33, %v165_v46  ;;  %v161_v48 = vpop.xlane.xlu0 %160 }
 0x16f   :  { %v174_v49 = vsub.f32 %v153_v36, %v161_v48 }
 0x170   :  { %v185_v50 = vmul.f32 1.442695, %v176_v47 }
 0x171   :  { %v181_v51 = vmul.f32 1.442695, %v174_v49  ;;  %v167_v52 = vpop.xlane.xlu1 %166 }
 0x172   :  { %266 = vpow2.f32 %v185_v50  ;;  %v177_v53 = vsub.f32 %v156_v42, %v167_v52  ;;  %v169_v54 = vpop.xlane.xlu0 %168 }
 0x173   :  { %v178_v55 = vsub.f32 %v157_v40, %v169_v54  ;;  %268 = vpow2.f32 %v181_v51 }
 0x174   :  { %v187_v56 = vmul.f32 1.442695, %v177_v53 }
 0x175   :  { %v171_v57 = vpop.xlane.xlu1 %170  ;;  %v189_v58 = vmul.f32 1.442695, %v178_v55 }
 0x176   :  { %270 = vpow2.f32 %v187_v56  ;;  %v179_v59 = vsub.f32 %v158_v43, %v171_v57  ;;  %v163_v60 = vpop.xlane.xlu0 %162 }
 0x177   :  { %v175_v61 = vsub.f32 %v154_v44, %v163_v60  ;;  %272 = vpow2.f32 %v189_v58 }
 0x178   :  { %v191_v63 = vmul.f32 1.442695, %v179_v59 }
 0x179   :  { %v183_v62 = vmul.f32 1.442695, %v175_v61 }
 0x17a   :  { %v173_v0 = vpop.xlane.xlu0 %172 }
 0x17b   :  { %274 = vpow2.f32 %v183_v62  ;;  %v180_v1 = vsub.f32 %v159_v45, %v173_v0 }
 0x17c   :  { %v267_v2 = vpop.eup %266  ;;  %276 = vpow2.f32 %v191_v63 }
 0x17d   :  { %v193_v3 = vmul.f32 1.442695, %v180_v1  ;;  %199 = vadd.xlane.f32.xlu1 %v267_v2  ;;  %v269_v4 = vpop.eup %268 }
 0x17f   :  { %278 = vpow2.f32 %v193_v3 }
 0x180   :  { %v271_v5 = vpop.eup %270 }
 0x181   :  { %195 = vadd.xlane.f32.xlu1 %v269_v4  ;;  %201 = vadd.xlane.f32.xlu0 %v271_v5  ;;  %v273_v6 = vpop.eup %272 }
 0x185   :  { %v275_v7 = vpop.eup %274  ;;  %203 = vadd.xlane.f32.xlu1 %v273_v6 }
 0x186   :  { %197 = vadd.xlane.f32.xlu0 %v275_v7  ;;  %v277_v8 = vpop.eup %276 }
 0x189   :  { %v279_v9 = vpop.eup %278 }
 0x18a   :  { %205 = vadd.xlane.f32.xlu0 %v277_v8  ;;  %207 = vadd.xlane.f32.xlu1 %v279_v9 }
 0x20a   :  { %v200_v10 = vpop.xlane.xlu1 %199 }
 0x20b   :  { %280 = vrcp.f32 %v200_v10 }
 0x20e   :  { %v196_v11 = vpop.xlane.xlu1 %195  ;;  %v202_v12 = vpop.xlane.xlu0 %201 }
 0x20f   :  { %282 = vrcp.f32 %v196_v11 }
 0x210   :  { %284 = vrcp.f32 %v202_v12 }
 0x212   :  { %v204_v13 = vpop.xlane.xlu1 %203 }
 0x213   :  { %286 = vrcp.f32 %v204_v13  ;;  %v198_v14 = vpop.xlane.xlu0 %197 }
 0x214   :  { %288 = vrcp.f32 %v198_v14 }
 0x215   :  { %v281_v15 = vpop.eup %280 }
 0x216   :  { %v214_v16 = vmul.f32 %v281_v15, %v267_v2 }
 0x217   :  { %v208_v17 = vpop.xlane.xlu1 %207  ;;  %v206_v18 = vpop.xlane.xlu0 %205 }
 0x218   :  { %225 = vst [vmem:[%s388_s4 + $0x10] sm:$0xff] %v214_v16  ;;  %290 = vrcp.f32 %v208_v17 }
 0x219   :  { %v283_v19 = vpop.eup %282  ;;  %292 = vrcp.f32 %v206_v18 }
 0x21a   :  { %v285_v20 = vpop.eup %284  ;;  %v210_v21 = vmul.f32 %v283_v19, %v269_v4 }
 0x21b   :  { %v216_v22 = vmul.f32 %v285_v20, %v271_v5 }
 0x21c   :  { %223 = vst [vmem:[%s388_s4] sm:$0xff] %v210_v21 }
 0x21d   :  { %v287_v23 = vpop.eup %286  ;;  %226 = vst [vmem:[%s388_s4 + $0x18] sm:$0xff] %v216_v22 }
 0x21e   :  { %v289_v24 = vpop.eup %288  ;;  %v218_v25 = vmul.f32 %v287_v23, %v273_v6 }
 0x21f   :  { %v212_v26 = vmul.f32 %v289_v24, %v275_v7 }
 0x220   :  { %227 = vst [vmem:[%s388_s4 + $0x20] sm:$0xff] %v218_v25 }
 0x221   :  { %224 = vst [vmem:[%s388_s4 + $0x8] sm:$0xff] %v212_v26 }
 0x222   :  { %v291_v27 = vpop.eup %290 }
 0x223   :  { %v293_v28 = vpop.eup %292  ;;  %v222_v29 = vmul.f32 %v291_v27, %v279_v9 }
 0x224   :  { %v220_v30 = vmul.f32 %v293_v28, %v277_v8 }
 0x225   :  { %229 = vst [vmem:[%s388_s4 + $0x30] sm:$0xff] %v222_v29 }
 0x226   :  { %228 = vst [vmem:[%s388_s4 + $0x28] sm:$0xff] %v220_v30 }

// kernel: deepspeech_forward.10
= control target key start
LH: loop header
LB: loop body
LE: loop exit
PB: predicated region body
PF: predicated region fallthrough
CT: control target
= control target key end

     0   :  { %s5218_s9 = smov 0   ;;  %s5220_s10 = smov 0   ;;  %s5923_s0 = inlined_call_operand.vmem [shape: f32[2,32,4,2,32], index: 0, kind: input, shape index: {}]   ;;  %s5924_s1 = inlined_call_operand.vmem [shape: bf16[2,4,32,32], index: 1, kind: input, shape index: {}]   ;;  %s5925_s2 = inlined_call_operand.vmem [shape: f32[2,32,2,32], index: 2, kind: output, shape index: {}]  }
   0x1   :  { %s5222_s11 = smov 0   ;;  %s5224_s12 = smov 0  }
   0x2   :  { %s5226_s13 = smov 0  }
   0x3 LB: > { %s21_s14 = sadd.s32 1, %s5190_s11  ;;  %s24_s15 = sadd.s32 1, %s5194_s12  ;;  %s5198_s13 = sphi %s5226_s13, %s12_s13   ;;  %s5194_s12 = sphi %s5224_s12, %s5929_s12   ;;  %s5190_s11 = sphi %s5222_s11, %s5928_s11   ;;  %s5186_s10 = sphi %s5220_s10, %s5927_s10   ;;  %s5182_s9 = sphi %s5218_s9, %s5926_s9  }
   0x4   : > { %p22_p0 = scmp.ge.s32.totalorder %s21_s14, 2  ;;  %p3883_p1 = scmp.ge.s32.totalorder %s5198_s13, 1 }
   0x5   : > { %p168_p2 = scmp.lt.s32.totalorder %s5198_s13, 5 }
   0x6   : > { %s5931_s14 = smov (%p22_p0, %s21_s14), 0  ;;  %s5933_s15 = smov (!%p22_p0, %s24_s15), %s5194_s12 }
   0x7   : > { %p169_p3 = pnand %p3883_p1, %p168_p2  ;;  %p26_p4 = scmp.ge.s32.totalorder %s5933_s15, 2 }
   0x8   : > { %s3884_s16 = sshll.u32 (!%p169_p3), %s5182_s9, 1  ;;  %p217_p5 = scmp.lt.s32.totalorder (!%p169_p3), %s5186_s10, 1 }
   0x9   : > { %s5935_s15 = smov (%p26_p4, %s5933_s15), 0  ;;  %172 = sbr.rel (%p169_p3) target bundleno = 4312 (0x10d8), region = 28 }
   0xa   : > { %s213_s17 = ssub.s32 (!%p169_p3), 1, %s3884_s16  ;;  %p3895_p7 = scmp.ne.s32.totalorder (!%p169_p3), %s5182_s9, 0 }
   0xb   : > { %s214_s18 = smul.u32 (!%p169_p3), %s5186_s10, %s213_s17 }
   0xd   : > { %s215_s20 = sadd.s32 (!%p169_p3), %s5182_s9, %s214_s18 }
   0xe   : > { %s3885_s21 = sshll.u32 (!%p169_p3), %s215_s20, 4 }
   0xf   : > { %p219_p6 = scmp.lt.s32.totalorder (!%p169_p3), %s3885_s21, 31 }
  0x10   : > { %s218_s19 = scalar_select %p217_p5, %s5186_s10, 1 }
  0x11   : > { %s5937_s21 = smov (!%p219_p6, %s3885_s21), 31  ;;  %258 = sbr.rel (%p3895_p7) target bundleno = 24 (0x18), region = 32 }
  0x12   : > { %s3887_s22 = sshll.u32 %s218_s19, 7  ;;  %s4132_s23 = sshll.u32 %s218_s19, 6  ;;  %vm259_vm0 = vcmask (!%p3895_p7), 254976   ;;  %v5200_v0 = vmov (!%p3895_p7), 0.0  }
  0x13   : > { %s5260_s26 = scalar_lea.vmem %s5924_s1, %s4132_s23  ;;  %s3893_s27 = sshll.u32 %s218_s19, 5  ;;  %260 = vst.msk [vmem:[#allocation2] sm:$0x3] (!%p3895_p7), %vm259_vm0, %v5200_v0  ;;  %261 = vst.msk [vmem:[#allocation3] sm:$0x3] (!%p3895_p7), %vm259_vm0, %v5200_v0 }
  0x14   : > { %s3886_s28 = sshll.u32 %s5937_s21, 2  ;;  %s246_s29 = sadd.s32 %s3893_s27, %s5937_s21 }
  0x15   : > { %s223_s30 = sadd.s32 %s3887_s22, %s3886_s28  ;;  %s3894_s3 = sshll.u32 %s246_s29, 1 }
  0x16   : > { %s3888_s4 = sshll.u32 %s223_s30, 1  ;;  %s5265_s7 = scalar_lea.vmem %s5925_s2, %s3894_s3 }
  0x17   : > { %s5270_s17 = scalar_lea.vmem %s5923_s0, %s3888_s4 }
  0x18 PF: > { %v5274_v1 = vld [vmem:[%s5260_s26] sm:$0xff]   ;;  %v5201_v2 = vmov 0.0   ;;  %v5279_v3 = vld [vmem:[%s5260_s26 + $0x10] sm:$0xff]   ;;  %v5283_v4 = vld [vmem:[%s5260_s26 + $0x8] sm:$0xff]   ;;  %vm5202_vm1 = vmmov 0   ;;  %vm302_vm2 = vcmask 261120  }
  0x19   : > { %4325 = vmatprep.subr.bf16.mxu0 %v5201_v2  ;;  %4333 = vmatprep.subr.bf16.mxu1 %v5201_v2  ;;  %v5290_v5 = vld [vmem:[%s5260_s26 + $0x18] sm:$0xff]   ;;  %v5297_v8 = vld [vmem:[%s5260_s26 + $0x20] sm:$0xff]   ;;  %v5302_v9 = vld [vmem:[%s5260_s26 + $0x30] sm:$0xff]   ;;  %s3908_s9 = smul.u32 120, %s5186_s10  ;;  %vm531_vm3 = vcmask 254976  }
  0x1a   : > { %4326 = vmatpush3.bf16.msra.mxu0 %v5274_v1  ;;  %4329 = vmatprep.mubr.msk.bf16.mxu0 %vm5202_vm1, %v5201_v2  ;;  %v288_v6 = vld [vmem:[#allocation2] sm:$0x3]  ;;  %v5309_v10 = vld [vmem:[%s5260_s26 + $0x28] sm:$0xff]   ;;  %v5314_v11 = vld [vmem:[%s5260_s26 + $0x38] sm:$0xff]   ;;  %s3924_s19 = smul.u32 30, %s5186_s10 }
  0x1b   : > { %4334 = vmatpush3.bf16.msra.mxu1 %v5279_v3  ;;  %4327 = vmatprep.subr.bf16.mxu0 %v5201_v2  ;;  %v289_v7 = vpack.c.bf16 %v288_v6, %v288_v6  ;;  %s283_s18 = scalar_lea.vmem %s5270_s17, %s3908_s9  ;;  %v525_v45 = vld [vmem:[#allocation3] sm:$0x3]  ;;  %s3925_s21 = smul.u32 104, %s5186_s10 }
  0x1c   : > { %4335 = vmatprep.subr.bf16.mxu1 %v5201_v2  ;;  %4337 = vmatprep.mubr.msk.bf16.mxu1 %vm5202_vm1, %v5201_v2  ;;  %v284_v12 = vld [vmem:[%s283_s18] sm:$0x3]  ;;  %v285_v13 = vld [vmem:[%s283_s18 + $0x2] sm:$0x3]  ;;  %v287_v26 = vld [vmem:[%s283_s18 + $0x6] sm:$0x3]  ;;  %s535_s20 = scalar_lea.vmem %s5265_s7, %s3924_s19 }
  0x1d   : > { %v286_v28 = vld [vmem:[%s283_s18 + $0x4] sm:$0x3]  ;;  %s3717_s22 = scalar_lea.vmem %s5270_s17, %s3925_s21  ;;  %s3937_s23 = smul.u32 26, %s5186_s10 }
  0x1e   : > { %4328 = vmatpush3.bf16.msra.mxu0 %v5283_v4  ;;  %v3926_v57 = vld [vmem:[%s3717_s22 + $0x8] sm:$0x3]  ;;  %v3927_v58 = vld [vmem:[%s3717_s22 + $0xa] sm:$0x3]  ;;  %s3939_s25 = smul.u32 88, %s5186_s10 }
  0x1f   : > { %4336 = vmatpush3.bf16.msra.mxu1 %v5290_v5  ;;  %4341 = vmatprep.subr.bf16.mxu0 %v5201_v2  ;;  %s3721_s24 = scalar_lea.vmem %s5265_s7, %s3937_s23  ;;  %s3951_s28 = smul.u32 22, %s5186_s10 }
  0x20   : > { %4349 = vmatprep.subr.bf16.mxu1 %v5201_v2  ;;  %s3725_s27 = scalar_lea.vmem %s5270_s17, %s3939_s25  ;;  %s3953_s30 = smul.u32 72, %s5186_s10 }
  0x21   : > { %4330 = vmatmul.mubr.msk.bf16.vlgmr.msra.gmra.mrb[0].mxu0 %vm302_vm2, %v289_v7  ;;  %s3729_s29 = scalar_lea.vmem %s5265_s7, %s3951_s28  ;;  %s3965_s4 = smul.u32 18, %s5186_s10 }
  0x22   : > { %4338 = vmatmul.mubr.msk.bf16.vlgmr.msra.gmra.mrb[0].mxu1 %vm302_vm2, %v289_v7  ;;  %4342 = vmatpush3.bf16.msra.mxu0 %v5297_v8  ;;  %s3733_s3 = scalar_lea.vmem %s5270_s17, %s3953_s30  ;;  %s3967_s6 = smul.u32 56, %s5186_s10 }
  0x23   : > { %4350 = vmatpush3.bf16.msra.mxu1 %v5302_v9  ;;  %4343 = vmatprep.subr.bf16.mxu0 %v5201_v2  ;;  %s3737_s5 = scalar_lea.vmem %s5265_s7, %s3965_s4  ;;  %s3979_s16 = smul.u32 14, %s5186_s10 }
  0x24   : > { %4351 = vmatprep.subr.bf16.mxu1 %v5201_v2  ;;  %4345 = vmatprep.mubr.msk.bf16.mxu0 %vm5202_vm1, %v5201_v2  ;;  %s3741_s8 = scalar_lea.vmem %s5270_s17, %s3967_s6  ;;  %s3981_s18 = smul.u32 40, %s5186_s10 }
  0x25   : > { %4353 = vmatprep.mubr.msk.bf16.mxu1 %vm5202_vm1, %v5201_v2  ;;  %s3745_s9 = scalar_lea.vmem %s5265_s7, %s3979_s16  ;;  %s4032_s16 = smul.u32 4294967272, %s5186_s10 }
  0x26   : > { %4344 = vmatpush3.bf16.msra.mxu0 %v5309_v10  ;;  %s3749_s19 = scalar_lea.vmem %s5270_s17, %s3981_s18  ;;  %s4044_s18 = smul.u32 4294967290, %s5186_s10 }
  0x27   : > { %4352 = vmatpush3.bf16.msra.mxu1 %v5314_v11  ;;  %4357 = vmatprep.subr.bf16.mxu0 %v5201_v2 }
  0x28   : > { %4365 = vmatprep.subr.bf16.mxu1 %v5201_v2 }
  0x29   : > { %4346 = vmatmul.mubr.msk.bf16.vlgmr.msra.gmra.mrb[4].mxu0 %vm302_vm2, %v289_v7 }
  0x2a   : > { %4354 = vmatmul.mubr.msk.bf16.vlgmr.msra.gmra.mrb[4].mxu1 %vm302_vm2, %v289_v7  ;;  %4358 = vmatpush3.bf16.msra.mxu0 %v5274_v1 }
  0x2b   : > { %4366 = vmatpush3.bf16.msra.mxu1 %v5279_v3  ;;  %4359 = vmatprep.subr.bf16.mxu0 %v5201_v2 }
  0x2c   : > { %4367 = vmatprep.subr.bf16.mxu1 %v5201_v2  ;;  %4361 = vmatprep.mubr.msk.bf16.mxu0 %vm5202_vm1, %v5201_v2 }
  0x2d   : > { %4369 = vmatprep.mubr.msk.bf16.mxu1 %vm5202_vm1, %v5201_v2 }
  0x2e   : > { %4360 = vmatpush3.bf16.msra.mxu0 %v5283_v4 }
  0x2f   : > { %4368 = vmatpush3.bf16.msra.mxu1 %v5290_v5  ;;  %4373 = vmatprep.subr.bf16.mxu0 %v5201_v2 }
  0x30   : > { %4381 = vmatprep.subr.bf16.mxu1 %v5201_v2 }
  0xf4   : > { %v340_v14 = vpop.f32.mrb[0].mxu0 }
  0xf5   : > { %v346_v15 = vadd.f32 %v340_v14, %v284_v12  ;;  %v399_v16 = vpop.f32.mrb[0].mxu1  ;;  %v4331_v17 = vpop.f32.mrb[1].mxu0 }
  0xf6   : > { %v405_v18 = vadd.f32 %v399_v16, %v285_v13  ;;  %v4339_v19 = vpop.f32.mrb[1].mxu1  ;;  %v343_v20 = vpop.f32.mrb[2].mxu0  ;;  %v3929_v16 = vld [vmem:[%s3717_s22 + $0xe] sm:$0x3] }
  0xf7   : > { %v3912_v21 = vmul.f32 -1.442695, %v346_v15  ;;  %v402_v22 = vpop.f32.mrb[2].mxu1  ;;  %v4332_v23 = vpop.f32.mrb[3].mxu0 }
  0xf8   : > { %v3916_v24 = vmul.f32 -1.442695, %v405_v18  ;;  %v4340_v25 = vpop.f32.mrb[3].mxu1  ;;  %v3928_v22 = vld [vmem:[%s3717_s22 + $0xc] sm:$0x3]  ;;  %s3995_s22 = smul.u32 24, %s5186_s10 }
  0xf9   : > { %4888 = vpow2.f32 %v3912_v21 }
  0xfa   : > { %4890 = vpow2.f32 %v3916_v24  ;;  %s3757_s23 = scalar_lea.vmem %s5270_s17, %s3995_s22  ;;  %s4058_s22 = smul.u32 4294967286, %s5186_s10 }
  0xfc   : > { %v458_v27 = vpop.f32.mrb[4].mxu0 }
  0xfd   : > { %v512_v29 = vpop.f32.mrb[4].mxu1  ;;  %v4347_v30 = vpop.f32.mrb[5].mxu0  ;;  %v464_v36 = vadd.f32 %v458_v27, %v286_v28 }
  0xfe   : > { %v518_v31 = vadd.f32 %v512_v29, %v287_v26  ;;  %v4355_v32 = vpop.f32.mrb[5].mxu1  ;;  %v461_v33 = vpop.f32.mrb[6].mxu0 }
  0xff   : > { %v515_v34 = vpop.f32.mrb[6].mxu1  ;;  %v4348_v35 = vpop.f32.mrb[7].mxu0 }
 0x100   : > { %v3923_v37 = vmul.f32 -1.442695, %v518_v31  ;;  %v4356_v38 = vpop.f32.mrb[7].mxu1 }
 0x102   : > { %4892 = vpow2.f32 %v3923_v37 }
 0x103   : > { %v4889_v39 = vpop.eup %4888  ;;  %4894 = vtanh.f32 %v464_v36 }
 0x104   : > { %v4891_v40 = vpop.eup %4890  ;;  %v350_v41 = vadd.f32 1.0, %v4889_v39 }
 0x105   : > { %v409_v42 = vadd.f32 1.0, %v4891_v40 }
 0x106   : > { %4896 = vrcp.f32 %v350_v41 }
 0x107   : > { %4898 = vrcp.f32 %v409_v42 }
 0x10c   : > { %v4893_v43 = vpop.eup %4892 }
 0x10d   : > { %v4895_v44 = vpop.eup %4894  ;;  %v522_v47 = vadd.f32 1.0, %v4893_v43 }
 0x10f   : > { %4900 = vrcp.f32 %v522_v47  ;;  %v3940_v47 = vld [vmem:[%s3725_s27 + $0x10] sm:$0x3] }
 0x110   : > { %v4897_v46 = vpop.eup %4896 }
 0x111   : > { %v4899_v48 = vpop.eup %4898  ;;  %v527_v49 = vmul.f32 %v4897_v46, %v4895_v44 }
 0x112   : > { %v526_v50 = vmul.f32 %v4899_v48, %v525_v45  ;;  %v3941_v48 = vld [vmem:[%s3725_s27 + $0x12] sm:$0x3] }
 0x114   : > { %v528_v51 = vadd.f32 %v527_v49, %v526_v50 }
 0x116   : > { %4902 = vtanh.f32 %v528_v51  ;;  %532 = vst.msk [vmem:[#allocation3] sm:$0x3] %vm531_vm3, %v528_v51 }
 0x119   : > { %v4901_v52 = vpop.eup %4900 }
 0x11d   : > { %v733_v37 = vld [vmem:[#allocation3] sm:$0x3] }
 0x120   : > { %v4903_v53 = vpop.eup %4902 }
 0x121   : > { %v530_v54 = vmul.f32 %v4903_v53, %v4901_v52 }
 0x123   : > { %533 = vst.msk [vmem:[#allocation2] sm:$0x3] %vm531_vm3, %v530_v54  ;;  %536 = vst.msk [vmem:[%s535_s20] sm:$0x3] %vm531_vm3, %v530_v54  ;;  %s3993_s20 = smul.u32 10, %s5186_s10 }
 0x125   : > { %s3753_s21 = scalar_lea.vmem %s5265_s7, %s3993_s20  ;;  %s4046_s20 = smul.u32 4294967256, %s5186_s10 }
 0x12a   : > { %v545_v55 = vld [vmem:[#allocation2] sm:$0x3] }
 0x12b   : > { %v546_v56 = vpack.c.bf16 %v545_v55, %v545_v55 }
 0x12d   : > { %4362 = vmatmul.mubr.msk.bf16.vlgmr.msra.gmra.mrb[8].mxu0 %vm302_vm2, %v546_v56  ;;  %4370 = vmatmul.mubr.msk.bf16.vlgmr.msra.gmra.mrb[8].mxu1 %vm302_vm2, %v546_v56 }
 0x12e   : > { %4374 = vmatpush3.bf16.msra.mxu0 %v5297_v8  ;;  %4382 = vmatpush3.bf16.msra.mxu1 %v5302_v9 }
 0x12f   : > { %4375 = vmatprep.subr.bf16.mxu0 %v5201_v2  ;;  %4383 = vmatprep.subr.bf16.mxu1 %v5201_v2 }
 0x130   : > { %4377 = vmatprep.mubr.msk.bf16.mxu0 %vm5202_vm1, %v5201_v2  ;;  %4385 = vmatprep.mubr.msk.bf16.mxu1 %vm5202_vm1, %v5201_v2 }
 0x132   : > { %4376 = vmatpush3.bf16.msra.mxu0 %v5309_v10  ;;  %4384 = vmatpush3.bf16.msra.mxu1 %v5314_v11 }
 0x133   : > { %4389 = vmatprep.subr.bf16.mxu0 %v5201_v2  ;;  %4397 = vmatprep.subr.bf16.mxu1 %v5201_v2 }
 0x135   : > { %4378 = vmatmul.mubr.msk.bf16.vlgmr.msra.gmra.mrb[12].mxu0 %vm302_vm2, %v546_v56  ;;  %4386 = vmatmul.mubr.msk.bf16.vlgmr.msra.gmra.mrb[12].mxu1 %vm302_vm2, %v546_v56 }
 0x136   : > { %4390 = vmatpush3.bf16.msra.mxu0 %v5274_v1  ;;  %4398 = vmatpush3.bf16.msra.mxu1 %v5279_v3 }
 0x137   : > { %4391 = vmatprep.subr.bf16.mxu0 %v5201_v2  ;;  %4399 = vmatprep.subr.bf16.mxu1 %v5201_v2 }
 0x138   : > { %4393 = vmatprep.mubr.msk.bf16.mxu0 %vm5202_vm1, %v5201_v2  ;;  %4401 = vmatprep.mubr.msk.bf16.mxu1 %vm5202_vm1, %v5201_v2 }
 0x13a   : > { %4392 = vmatpush3.bf16.msra.mxu0 %v5283_v4  ;;  %4400 = vmatpush3.bf16.msra.mxu1 %v5290_v5 }
 0x13b   : > { %4405 = vmatprep.subr.bf16.mxu0 %v5201_v2  ;;  %4413 = vmatprep.subr.bf16.mxu1 %v5201_v2 }
 0x200   : > { %v584_v59 = vpop.f32.mrb[8].mxu0  ;;  %v631_v60 = vpop.f32.mrb[8].mxu1 }
 0x201   : > { %v590_v61 = vadd.f32 %v3926_v57, %v584_v59  ;;  %v637_v62 = vadd.f32 %v3927_v58, %v631_v60  ;;  %v4363_v63 = vpop.f32.mrb[9].mxu0  ;;  %v4371_v0 = vpop.f32.mrb[9].mxu1 }
 0x202   : > { %v587_v6 = vpop.f32.mrb[10].mxu0  ;;  %v634_v7 = vpop.f32.mrb[10].mxu1 }
 0x203   : > { %v3931_v12 = vmul.f32 -1.442695, %v590_v61  ;;  %v3933_v13 = vmul.f32 -1.442695, %v637_v62  ;;  %v4364_v14 = vpop.f32.mrb[11].mxu0  ;;  %v4372_v15 = vpop.f32.mrb[11].mxu1 }
 0x204   : > { %v3943_v61 = vld [vmem:[%s3725_s27 + $0x16] sm:$0x3] }
 0x205   : > { %4904 = vpow2.f32 %v3931_v12  ;;  %v3942_v12 = vld [vmem:[%s3725_s27 + $0x14] sm:$0x3]  ;;  %s4009_s27 = sshll.u32 %s5186_s10, 3 }
 0x206   : > { %4906 = vpow2.f32 %v3933_v13  ;;  %s3764_s28 = scalar_lea.vmem %s5270_s17, %s4009_s27  ;;  %s4072_s27 = smul.u32 4294967282, %s5186_s10 }
 0x208   : > { %v678_v17 = vpop.f32.mrb[12].mxu0  ;;  %v720_v18 = vpop.f32.mrb[12].mxu1 }
 0x209   : > { %v726_v19 = vadd.f32 %v3929_v16, %v720_v18  ;;  %v4379_v20 = vpop.f32.mrb[13].mxu0  ;;  %v4387_v21 = vpop.f32.mrb[13].mxu1  ;;  %v684_v28 = vadd.f32 %v3928_v22, %v678_v17 }
 0x20a   : > { %v681_v23 = vpop.f32.mrb[14].mxu0  ;;  %v723_v24 = vpop.f32.mrb[14].mxu1 }
 0x20b   : > { %v4380_v25 = vpop.f32.mrb[15].mxu0  ;;  %v4388_v26 = vpop.f32.mrb[15].mxu1  ;;  %v3936_v27 = vmul.f32 -1.442695, %v726_v19 }
 0x20d   : > { %4908 = vpow2.f32 %v3936_v27 }
 0x20e   : > { %4910 = vtanh.f32 %v684_v28 }
 0x20f   : > { %v4905_v29 = vpop.eup %4904 }
 0x210   : > { %v4907_v30 = vpop.eup %4906  ;;  %v594_v31 = vadd.f32 1.0, %v4905_v29 }
 0x211   : > { %v641_v32 = vadd.f32 1.0, %v4907_v30 }
 0x212   : > { %4912 = vrcp.f32 %v594_v31 }
 0x213   : > { %4914 = vrcp.f32 %v641_v32 }
 0x217   : > { %v4909_v33 = vpop.eup %4908 }
 0x218   : > { %v4911_v34 = vpop.eup %4910  ;;  %v730_v39 = vadd.f32 1.0, %v4909_v33 }
 0x21a   : > { %4916 = vrcp.f32 %v730_v39 }
 0x21c   : > { %v4913_v35 = vpop.eup %4912 }
 0x21d   : > { %v4915_v36 = vpop.eup %4914  ;;  %v735_v38 = vmul.f32 %v4913_v35, %v4911_v34 }
 0x21e   : > { %v734_v40 = vmul.f32 %v4915_v36, %v733_v37  ;;  %v3954_v37 = vld [vmem:[%s3733_s3 + $0x18] sm:$0x3] }
 0x220   : > { %v736_v41 = vadd.f32 %v735_v38, %v734_v40  ;;  %v3955_v38 = vld [vmem:[%s3733_s3 + $0x1a] sm:$0x3] }
 0x222   : > { %4918 = vtanh.f32 %v736_v41  ;;  %739 = vst.msk [vmem:[#allocation3] sm:$0x3] %vm531_vm3, %v736_v41 }
 0x224   : > { %v4917_v42 = vpop.eup %4916 }
 0x229   : > { %v940_v27 = vld [vmem:[#allocation3] sm:$0x3] }
 0x22c   : > { %v4919_v43 = vpop.eup %4918 }
 0x22d   : > { %v738_v44 = vmul.f32 %v4919_v43, %v4917_v42 }
 0x22f   : > { %740 = vst.msk [vmem:[#allocation2] sm:$0x3] %vm531_vm3, %v738_v44  ;;  %3938 = vst.msk [vmem:[%s3721_s24 + $0x2] sm:$0x3] %vm531_vm3, %v738_v44  ;;  %s4007_s24 = smul.u32 6, %s5186_s10 }
 0x231   : > { %s3761_s25 = scalar_lea.vmem %s5265_s7, %s4007_s24  ;;  %s4060_s24 = smul.u32 4294967240, %s5186_s10 }
 0x236   : > { %v752_v45 = vld [vmem:[#allocation2] sm:$0x3] }
 0x237   : > { %v753_v46 = vpack.c.bf16 %v752_v45, %v752_v45 }
 0x239   : > { %4394 = vmatmul.mubr.msk.bf16.vlgmr.msra.gmra.mrb[16].mxu0 %vm302_vm2, %v753_v46  ;;  %4402 = vmatmul.mubr.msk.bf16.vlgmr.msra.gmra.mrb[16].mxu1 %vm302_vm2, %v753_v46 }
 0x23a   : > { %4406 = vmatpush3.bf16.msra.mxu0 %v5297_v8  ;;  %4414 = vmatpush3.bf16.msra.mxu1 %v5302_v9 }
 0x23b   : > { %4407 = vmatprep.subr.bf16.mxu0 %v5201_v2  ;;  %4415 = vmatprep.subr.bf16.mxu1 %v5201_v2 }
 0x23c   : > { %4409 = vmatprep.mubr.msk.bf16.mxu0 %vm5202_vm1, %v5201_v2  ;;  %4417 = vmatprep.mubr.msk.bf16.mxu1 %vm5202_vm1, %v5201_v2 }
 0x23e   : > { %4408 = vmatpush3.bf16.msra.mxu0 %v5309_v10  ;;  %4416 = vmatpush3.bf16.msra.mxu1 %v5314_v11 }
 0x23f   : > { %4421 = vmatprep.subr.bf16.mxu0 %v5201_v2  ;;  %4429 = vmatprep.subr.bf16.mxu1 %v5201_v2 }
 0x241   : > { %4410 = vmatmul.mubr.msk.bf16.vlgmr.msra.gmra.mrb[20].mxu0 %vm302_vm2, %v753_v46  ;;  %4418 = vmatmul.mubr.msk.bf16.vlgmr.msra.gmra.mrb[20].mxu1 %vm302_vm2, %v753_v46 }
 0x242   : > { %4422 = vmatpush3.bf16.msra.mxu0 %v5274_v1  ;;  %4430 = vmatpush3.bf16.msra.mxu1 %v5279_v3 }
 0x243   : > { %4423 = vmatprep.subr.bf16.mxu0 %v5201_v2  ;;  %4431 = vmatprep.subr.bf16.mxu1 %v5201_v2 }
 0x244   : > { %4425 = vmatprep.mubr.msk.bf16.mxu0 %vm5202_vm1, %v5201_v2  ;;  %4433 = vmatprep.mubr.msk.bf16.mxu1 %vm5202_vm1, %v5201_v2 }
 0x246   : > { %4424 = vmatpush3.bf16.msra.mxu0 %v5283_v4  ;;  %4432 = vmatpush3.bf16.msra.mxu1 %v5290_v5 }
 0x247   : > { %4437 = vmatprep.subr.bf16.mxu0 %v5201_v2  ;;  %4445 = vmatprep.subr.bf16.mxu1 %v5201_v2 }
 0x30c   : > { %v791_v49 = vpop.f32.mrb[16].mxu0  ;;  %v838_v50 = vpop.f32.mrb[16].mxu1 }
 0x30d   : > { %v797_v51 = vadd.f32 %v3940_v47, %v791_v49  ;;  %v844_v52 = vadd.f32 %v3941_v48, %v838_v50  ;;  %v4395_v53 = vpop.f32.mrb[17].mxu0  ;;  %v4403_v54 = vpop.f32.mrb[17].mxu1 }
 0x30e   : > { %v794_v55 = vpop.f32.mrb[18].mxu0  ;;  %v841_v56 = vpop.f32.mrb[18].mxu1 }
 0x30f   : > { %v3945_v57 = vmul.f32 -1.442695, %v797_v51  ;;  %v3947_v58 = vmul.f32 -1.442695, %v844_v52  ;;  %v4396_v59 = vpop.f32.mrb[19].mxu0  ;;  %v4404_v60 = vpop.f32.mrb[19].mxu1 }
 0x310   : > { %v3957_v51 = vld [vmem:[%s3733_s3 + $0x1e] sm:$0x3] }
 0x311   : > { %4920 = vpow2.f32 %v3945_v57  ;;  %v3956_v57 = vld [vmem:[%s3733_s3 + $0x1c] sm:$0x3]  ;;  %s1985_s3 = ssub.s32 8, %s5186_s10 }
 0x312   : > { %4922 = vpow2.f32 %v3947_v58  ;;  %s4023_s4 = sshll.u32 %s1985_s3, 3  ;;  %s4031_s6 = sshll.u32 %s1985_s3, 1 }
 0x313   : > { %s4086_s3 = smul.u32 4294967278, %s5186_s10 }
 0x314   : > { %v885_v62 = vpop.f32.mrb[20].mxu0  ;;  %v927_v63 = vpop.f32.mrb[20].mxu1 }
 0x315   : > { %v933_v0 = vadd.f32 %v3943_v61, %v927_v63  ;;  %v4411_v6 = vpop.f32.mrb[21].mxu0  ;;  %v4419_v7 = vpop.f32.mrb[21].mxu1  ;;  %v891_v18 = vadd.f32 %v3942_v12, %v885_v62 }
 0x316   : > { %v888_v13 = vpop.f32.mrb[22].mxu0  ;;  %v930_v14 = vpop.f32.mrb[22].mxu1 }
 0x317   : > { %v4412_v15 = vpop.f32.mrb[23].mxu0  ;;  %v4420_v16 = vpop.f32.mrb[23].mxu1  ;;  %v3950_v17 = vmul.f32 -1.442695, %v933_v0 }
 0x319   : > { %4924 = vpow2.f32 %v3950_v17 }
 0x31a   : > { %4926 = vtanh.f32 %v891_v18 }
 0x31b   : > { %v4921_v19 = vpop.eup %4920 }
 0x31c   : > { %v4923_v20 = vpop.eup %4922  ;;  %v801_v21 = vadd.f32 1.0, %v4921_v19 }
 0x31d   : > { %v848_v22 = vadd.f32 1.0, %v4923_v20 }
 0x31e   : > { %4928 = vrcp.f32 %v801_v21 }
 0x31f   : > { %4930 = vrcp.f32 %v848_v22 }
 0x323   : > { %v4925_v23 = vpop.eup %4924 }
 0x324   : > { %v4927_v24 = vpop.eup %4926  ;;  %v937_v29 = vadd.f32 1.0, %v4925_v23 }
 0x326   : > { %4932 = vrcp.f32 %v937_v29 }
 0x328   : > { %v4929_v25 = vpop.eup %4928 }
 0x329   : > { %v4931_v26 = vpop.eup %4930  ;;  %v942_v28 = vmul.f32 %v4929_v25, %v4927_v24 }
 0x32a   : > { %v941_v30 = vmul.f32 %v4931_v26, %v940_v27  ;;  %v3968_v27 = vld [vmem:[%s3741_s8 + $0x20] sm:$0x3] }
 0x32c   : > { %v943_v31 = vadd.f32 %v942_v28, %v941_v30  ;;  %v3969_v28 = vld [vmem:[%s3741_s8 + $0x22] sm:$0x3] }
 0x32e   : > { %4934 = vtanh.f32 %v943_v31  ;;  %946 = vst.msk [vmem:[#allocation3] sm:$0x3] %vm531_vm3, %v943_v31 }
 0x330   : > { %v4933_v32 = vpop.eup %4932 }
 0x335   : > { %v1147_v17 = vld [vmem:[#allocation3] sm:$0x3] }
 0x338   : > { %v4935_v33 = vpop.eup %4934 }
 0x339   : > { %v945_v34 = vmul.f32 %v4935_v33, %v4933_v32 }
 0x33b   : > { %947 = vst.msk [vmem:[#allocation2] sm:$0x3] %vm531_vm3, %v945_v34  ;;  %3952 = vst.msk [vmem:[%s3729_s29 + $0x4] sm:$0x3] %vm531_vm3, %v945_v34  ;;  %s4021_s29 = sshll.u32 %s5186_s10, 1 }
 0x33c   : > { %s3767_s30 = scalar_lea.vmem %s5265_s7, %s4021_s29  ;;  %s4074_s29 = smul.u32 4294967224, %s5186_s10 }
 0x342   : > { %v959_v35 = vld [vmem:[#allocation2] sm:$0x3] }
 0x343   : > { %v960_v36 = vpack.c.bf16 %v959_v35, %v959_v35 }
 0x345   : > { %4426 = vmatmul.mubr.msk.bf16.vlgmr.msra.gmra.mrb[24].mxu0 %vm302_vm2, %v960_v36  ;;  %4434 = vmatmul.mubr.msk.bf16.vlgmr.msra.gmra.mrb[24].mxu1 %vm302_vm2, %v960_v36 }
 0x346   : > { %4438 = vmatpush3.bf16.msra.mxu0 %v5297_v8  ;;  %4446 = vmatpush3.bf16.msra.mxu1 %v5302_v9 }
 0x347   : > { %4439 = vmatprep.subr.bf16.mxu0 %v5201_v2  ;;  %4447 = vmatprep.subr.bf16.mxu1 %v5201_v2 }
 0x348   : > { %4441 = vmatprep.mubr.msk.bf16.mxu0 %vm5202_vm1, %v5201_v2  ;;  %4449 = vmatprep.mubr.msk.bf16.mxu1 %vm5202_vm1, %v5201_v2 }
 0x34a   : > { %4440 = vmatpush3.bf16.msra.mxu0 %v5309_v10  ;;  %4448 = vmatpush3.bf16.msra.mxu1 %v5314_v11 }
 0x34b   : > { %4453 = vmatprep.subr.bf16.mxu0 %v5201_v2  ;;  %4461 = vmatprep.subr.bf16.mxu1 %v5201_v2 }
 0x34d   : > { %4442 = vmatmul.mubr.msk.bf16.vlgmr.msra.gmra.mrb[28].mxu0 %vm302_vm2, %v960_v36  ;;  %4450 = vmatmul.mubr.msk.bf16.vlgmr.msra.gmra.mrb[28].mxu1 %vm302_vm2, %v960_v36 }
 0x34e   : > { %4454 = vmatpush3.bf16.msra.mxu0 %v5274_v1  ;;  %4462 = vmatpush3.bf16.msra.mxu1 %v5279_v3 }
 0x34f   : > { %4455 = vmatprep.subr.bf16.mxu0 %v5201_v2  ;;  %4463 = vmatprep.subr.bf16.mxu1 %v5201_v2 }
 0x350   : > { %4457 = vmatprep.mubr.msk.bf16.mxu0 %vm5202_vm1, %v5201_v2  ;;  %4465 = vmatprep.mubr.msk.bf16.mxu1 %vm5202_vm1, %v5201_v2 }
 0x352   : > { %4456 = vmatpush3.bf16.msra.mxu0 %v5283_v4  ;;  %4464 = vmatpush3.bf16.msra.mxu1 %v5290_v5 }
 0x353   : > { %4469 = vmatprep.subr.bf16.mxu0 %v5201_v2  ;;  %4477 = vmatprep.subr.bf16.mxu1 %v5201_v2 }
 0x418   : > { %v998_v39 = vpop.f32.mrb[24].mxu0  ;;  %v1045_v40 = vpop.f32.mrb[24].mxu1 }
 0x419   : > { %v1004_v41 = vadd.f32 %v3954_v37, %v998_v39  ;;  %v1051_v42 = vadd.f32 %v3955_v38, %v1045_v40  ;;  %v4427_v43 = vpop.f32.mrb[25].mxu0  ;;  %v4435_v44 = vpop.f32.mrb[25].mxu1 }
 0x41a   : > { %v1001_v45 = vpop.f32.mrb[26].mxu0  ;;  %v1048_v46 = vpop.f32.mrb[26].mxu1 }
 0x41b   : > { %v3959_v47 = vmul.f32 -1.442695, %v1004_v41  ;;  %v3961_v48 = vmul.f32 -1.442695, %v1051_v42  ;;  %v4428_v49 = vpop.f32.mrb[27].mxu0  ;;  %v4436_v50 = vpop.f32.mrb[27].mxu1 }
 0x41c   : > { %v3971_v41 = vld [vmem:[%s3741_s8 + $0x26] sm:$0x3] }
 0x41d   : > { %4936 = vpow2.f32 %v3959_v47  ;;  %v3970_v47 = vld [vmem:[%s3741_s8 + $0x24] sm:$0x3]  ;;  %s2189_s8 = scalar_lea.vmem %s5265_s7, %s4031_s6 }
 0x41e   : > { %4938 = vpow2.f32 %v3961_v48 }
 0x420   : > { %v1092_v52 = vpop.f32.mrb[28].mxu0  ;;  %v1134_v53 = vpop.f32.mrb[28].mxu1 }
 0x421   : > { %v1140_v54 = vadd.f32 %v3957_v51, %v1134_v53  ;;  %v4443_v55 = vpop.f32.mrb[29].mxu0  ;;  %v4451_v56 = vpop.f32.mrb[29].mxu1  ;;  %v1098_v63 = vadd.f32 %v3956_v57, %v1092_v52 }
 0x422   : > { %v1095_v58 = vpop.f32.mrb[30].mxu0  ;;  %v1137_v59 = vpop.f32.mrb[30].mxu1 }
 0x423   : > { %v4444_v60 = vpop.f32.mrb[31].mxu0  ;;  %v4452_v61 = vpop.f32.mrb[31].mxu1  ;;  %v3964_v62 = vmul.f32 -1.442695, %v1140_v54 }
 0x425   : > { %4940 = vpow2.f32 %v3964_v62 }
 0x426   : > { %4942 = vtanh.f32 %v1098_v63 }
 0x427   : > { %v4937_v0 = vpop.eup %4936 }
 0x428   : > { %v4939_v6 = vpop.eup %4938  ;;  %v1008_v7 = vadd.f32 1.0, %v4937_v0 }
 0x429   : > { %v1055_v12 = vadd.f32 1.0, %v4939_v6 }
 0x42a   : > { %4944 = vrcp.f32 %v1008_v7 }
 0x42b   : > { %4946 = vrcp.f32 %v1055_v12 }
 0x42f   : > { %v4941_v13 = vpop.eup %4940 }
 0x430   : > { %v4943_v14 = vpop.eup %4942  ;;  %v1144_v19 = vadd.f32 1.0, %v4941_v13 }
 0x432   : > { %4948 = vrcp.f32 %v1144_v19 }
 0x434   : > { %v4945_v15 = vpop.eup %4944 }
 0x435   : > { %v4947_v16 = vpop.eup %4946  ;;  %v1149_v18 = vmul.f32 %v4945_v15, %v4943_v14 }
 0x436   : > { %v1148_v20 = vmul.f32 %v4947_v16, %v1147_v17 }
 0x438   : > { %v1150_v21 = vadd.f32 %v1149_v18, %v1148_v20 }
 0x43a   : > { %4950 = vtanh.f32 %v1150_v21  ;;  %1153 = vst.msk [vmem:[#allocation3] sm:$0x3] %vm531_vm3, %v1150_v21 }
 0x43c   : > { %v4949_v22 = vpop.eup %4948 }
 0x441   : > { %v1354_v62 = vld [vmem:[#allocation3] sm:$0x3] }
 0x444   : > { %v4951_v23 = vpop.eup %4950 }
 0x445   : > { %v1152_v24 = vmul.f32 %v4951_v23, %v4949_v22 }
 0x447   : > { %1154 = vst.msk [vmem:[#allocation2] sm:$0x3] %vm531_vm3, %v1152_v24  ;;  %3966 = vst.msk [vmem:[%s3737_s5 + $0x6] sm:$0x3] %vm531_vm3, %v1152_v24  ;;  %v3985_v24 = vld [vmem:[%s3749_s19 + $0x2e] sm:$0x3]  ;;  %s1987_s5 = scalar_lea.vmem %s5270_s17, %s4023_s4  ;;  %s3803_s4 = scalar_lea.vmem %s5265_s7, %s4086_s3 }
 0x44e   : > { %v1166_v25 = vld [vmem:[#allocation2] sm:$0x3] }
 0x44f   : > { %v1167_v26 = vpack.c.bf16 %v1166_v25, %v1166_v25 }
 0x451   : > { %4458 = vmatmul.mubr.msk.bf16.vlgmr.msra.gmra.mrb[32].mxu0 %vm302_vm2, %v1167_v26  ;;  %4466 = vmatmul.mubr.msk.bf16.vlgmr.msra.gmra.mrb[32].mxu1 %vm302_vm2, %v1167_v26 }
 0x452   : > { %4470 = vmatpush3.bf16.msra.mxu0 %v5297_v8  ;;  %4478 = vmatpush3.bf16.msra.mxu1 %v5302_v9 }
 0x453   : > { %4471 = vmatprep.subr.bf16.mxu0 %v5201_v2  ;;  %4479 = vmatprep.subr.bf16.mxu1 %v5201_v2 }
 0x454   : > { %4473 = vmatprep.mubr.msk.bf16.mxu0 %vm5202_vm1, %v5201_v2  ;;  %4481 = vmatprep.mubr.msk.bf16.mxu1 %vm5202_vm1, %v5201_v2 }
 0x456   : > { %4472 = vmatpush3.bf16.msra.mxu0 %v5309_v10  ;;  %4480 = vmatpush3.bf16.msra.mxu1 %v5314_v11 }
 0x457   : > { %4485 = vmatprep.subr.bf16.mxu0 %v5201_v2  ;;  %4493 = vmatprep.subr.bf16.mxu1 %v5201_v2 }
 0x459   : > { %4474 = vmatmul.mubr.msk.bf16.vlgmr.msra.gmra.mrb[36].mxu0 %vm302_vm2, %v1167_v26  ;;  %4482 = vmatmul.mubr.msk.bf16.vlgmr.msra.gmra.mrb[36].mxu1 %vm302_vm2, %v1167_v26 }
 0x45a   : > { %4486 = vmatpush3.bf16.msra.mxu0 %v5274_v1  ;;  %4494 = vmatpush3.bf16.msra.mxu1 %v5279_v3 }
 0x45b   : > { %4487 = vmatprep.subr.bf16.mxu0 %v5201_v2  ;;  %4495 = vmatprep.subr.bf16.mxu1 %v5201_v2 }
 0x45c   : > { %4489 = vmatprep.mubr.msk.bf16.mxu0 %vm5202_vm1, %v5201_v2  ;;  %4497 = vmatprep.mubr.msk.bf16.mxu1 %vm5202_vm1, %v5201_v2 }
 0x45e   : > { %4488 = vmatpush3.bf16.msra.mxu0 %v5283_v4  ;;  %4496 = vmatpush3.bf16.msra.mxu1 %v5290_v5 }
 0x45f   : > { %4501 = vmatprep.subr.bf16.mxu0 %v5201_v2  ;;  %4509 = vmatprep.subr.bf16.mxu1 %v5201_v2 }
 0x524   : > { %v1205_v29 = vpop.f32.mrb[32].mxu0  ;;  %v1252_v30 = vpop.f32.mrb[32].mxu1 }
 0x525   : > { %v1211_v31 = vadd.f32 %v3968_v27, %v1205_v29  ;;  %v1258_v32 = vadd.f32 %v3969_v28, %v1252_v30  ;;  %v4459_v33 = vpop.f32.mrb[33].mxu0  ;;  %v4467_v34 = vpop.f32.mrb[33].mxu1  ;;  %v3984_v30 = vld [vmem:[%s3749_s19 + $0x2c] sm:$0x3] }
 0x526   : > { %v1208_v35 = vpop.f32.mrb[34].mxu0  ;;  %v1255_v36 = vpop.f32.mrb[34].mxu1 }
 0x527   : > { %v3973_v37 = vmul.f32 -1.442695, %v1211_v31  ;;  %v3975_v38 = vmul.f32 -1.442695, %v1258_v32  ;;  %v4460_v39 = vpop.f32.mrb[35].mxu0  ;;  %v4468_v40 = vpop.f32.mrb[35].mxu1 }
 0x529   : > { %4952 = vpow2.f32 %v3973_v37 }
 0x52a   : > { %4954 = vpow2.f32 %v3975_v38 }
 0x52c   : > { %v1299_v42 = vpop.f32.mrb[36].mxu0  ;;  %v1341_v43 = vpop.f32.mrb[36].mxu1 }
 0x52d   : > { %v1347_v44 = vadd.f32 %v3971_v41, %v1341_v43  ;;  %v4475_v45 = vpop.f32.mrb[37].mxu0  ;;  %v4483_v46 = vpop.f32.mrb[37].mxu1  ;;  %v1305_v53 = vadd.f32 %v3970_v47, %v1299_v42 }
 0x52e   : > { %v1302_v48 = vpop.f32.mrb[38].mxu0  ;;  %v1344_v49 = vpop.f32.mrb[38].mxu1 }
 0x52f   : > { %v4476_v50 = vpop.f32.mrb[39].mxu0  ;;  %v4484_v51 = vpop.f32.mrb[39].mxu1  ;;  %v3978_v52 = vmul.f32 -1.442695, %v1347_v44 }
 0x531   : > { %4956 = vpow2.f32 %v3978_v52 }
 0x532   : > { %4958 = vtanh.f32 %v1305_v53 }
 0x533   : > { %v4953_v54 = vpop.eup %4952 }
 0x534   : > { %v4955_v55 = vpop.eup %4954  ;;  %v1215_v56 = vadd.f32 1.0, %v4953_v54 }
 0x535   : > { %v1262_v57 = vadd.f32 1.0, %v4955_v55  ;;  %v5524_v55 = vld [vmem:[%s5260_s26 + $0x20] sm:$0xff]  }
 0x536   : > { %4960 = vrcp.f32 %v1215_v56  ;;  %v5528_v56 = vld [vmem:[%s5260_s26 + $0x30] sm:$0xff]  }
 0x537   : > { %4962 = vrcp.f32 %v1262_v57  ;;  %v5538_v57 = vld [vmem:[%s5260_s26 + $0x28] sm:$0xff]  }
 0x53b   : > { %v4957_v58 = vpop.eup %4956 }
 0x53c   : > { %v4959_v59 = vpop.eup %4958  ;;  %v1351_v0 = vadd.f32 1.0, %v4957_v58  ;;  %v5547_v58 = vld [vmem:[%s5260_s26] sm:$0xff]  }
 0x53e   : > { %4964 = vrcp.f32 %v1351_v0 }
 0x540   : > { %v4961_v60 = vpop.eup %4960 }
 0x541   : > { %v4963_v61 = vpop.eup %4962  ;;  %v1356_v63 = vmul.f32 %v4961_v60, %v4959_v59  ;;  %v5551_v59 = vld [vmem:[%s5260_s26 + $0x10] sm:$0xff]   ;;  %v5565_v60 = vld [vmem:[%s5260_s26 + $0x18] sm:$0xff]  }
 0x542   : > { %v1355_v6 = vmul.f32 %v4963_v61, %v1354_v62  ;;  %v3996_v61 = vld [vmem:[%s3757_s23 + $0x30] sm:$0x3]  ;;  %v3997_v62 = vld [vmem:[%s3757_s23 + $0x32] sm:$0x3] }
 0x544   : > { %v1357_v7 = vadd.f32 %v1356_v63, %v1355_v6 }
 0x546   : > { %4966 = vtanh.f32 %v1357_v7  ;;  %1360 = vst.msk [vmem:[#allocation3] sm:$0x3] %vm531_vm3, %v1357_v7 }
 0x548   : > { %v4965_v12 = vpop.eup %4964 }
 0x54d   : > { %v1561_v45 = vld [vmem:[#allocation3] sm:$0x3] }
 0x550   : > { %v4967_v13 = vpop.eup %4966 }
 0x551   : > { %v1359_v14 = vmul.f32 %v4967_v13, %v4965_v12 }
 0x553   : > { %1361 = vst.msk [vmem:[#allocation2] sm:$0x3] %vm531_vm3, %v1359_v14  ;;  %3980 = vst.msk [vmem:[%s3745_s9 + $0x8] sm:$0x3] %vm531_vm3, %v1359_v14  ;;  %s3775_s9 = scalar_lea.vmem %s5270_s17, %s4032_s16 }
 0x55a   : > { %v1373_v15 = vld [vmem:[#allocation2] sm:$0x3] }
 0x55b   : > { %v1374_v16 = vpack.c.bf16 %v1373_v15, %v1373_v15 }
 0x55d   : > { %4490 = vmatmul.mubr.msk.bf16.vlgmr.msra.gmra.mrb[40].mxu0 %vm302_vm2, %v1374_v16  ;;  %4498 = vmatmul.mubr.msk.bf16.vlgmr.msra.gmra.mrb[40].mxu1 %vm302_vm2, %v1374_v16 }
 0x55e   : > { %4502 = vmatpush3.bf16.msra.mxu0 %v5297_v8  ;;  %4510 = vmatpush3.bf16.msra.mxu1 %v5302_v9 }
 0x55f   : > { %4503 = vmatprep.subr.bf16.mxu0 %v5201_v2  ;;  %4511 = vmatprep.subr.bf16.mxu1 %v5201_v2 }
 0x560   : > { %4505 = vmatprep.mubr.msk.bf16.mxu0 %vm5202_vm1, %v5201_v2  ;;  %4513 = vmatprep.mubr.msk.bf16.mxu1 %vm5202_vm1, %v5201_v2 }
 0x562   : > { %4504 = vmatpush3.bf16.msra.mxu0 %v5309_v10  ;;  %4512 = vmatpush3.bf16.msra.mxu1 %v5314_v11 }
 0x563   : > { %4517 = vmatprep.subr.bf16.mxu0 %v5201_v2  ;;  %4525 = vmatprep.subr.bf16.mxu1 %v5201_v2 }
 0x565   : > { %4506 = vmatmul.mubr.msk.bf16.vlgmr.msra.gmra.mrb[44].mxu0 %vm302_vm2, %v1374_v16  ;;  %4514 = vmatmul.mubr.msk.bf16.vlgmr.msra.gmra.mrb[44].mxu1 %vm302_vm2, %v1374_v16 }
 0x566   : > { %4518 = vmatpush3.bf16.msra.mxu0 %v5274_v1  ;;  %4526 = vmatpush3.bf16.msra.mxu1 %v5279_v3  ;;  %v3982_v1 = vld [vmem:[%s3749_s19 + $0x28] sm:$0x3]  ;;  %v3983_v3 = vld [vmem:[%s3749_s19 + $0x2a] sm:$0x3]  ;;  %s3779_s19 = scalar_lea.vmem %s5265_s7, %s4044_s18  ;;  %s4114_s18 = smul.u32 4294967270, %s5186_s10 }
 0x567   : > { %4519 = vmatprep.subr.bf16.mxu0 %v5201_v2  ;;  %4527 = vmatprep.subr.bf16.mxu1 %v5201_v2 }
 0x568   : > { %4521 = vmatprep.mubr.msk.bf16.mxu0 %vm5202_vm1, %v5201_v2  ;;  %4529 = vmatprep.mubr.msk.bf16.mxu1 %vm5202_vm1, %v5201_v2 }
 0x56a   : > { %4520 = vmatpush3.bf16.msra.mxu0 %v5283_v4  ;;  %4528 = vmatpush3.bf16.msra.mxu1 %v5290_v5 }
 0x56b   : > { %4533 = vmatprep.subr.bf16.mxu0 %v5201_v2  ;;  %4541 = vmatprep.subr.bf16.mxu1 %v5201_v2 }
 0x630   : > { %v1412_v8 = vpop.f32.mrb[40].mxu0  ;;  %v1459_v9 = vpop.f32.mrb[40].mxu1 }
 0x631   : > { %v1418_v10 = vadd.f32 %v3982_v1, %v1412_v8  ;;  %v1465_v17 = vadd.f32 %v3983_v3, %v1459_v9  ;;  %v4491_v18 = vpop.f32.mrb[41].mxu0  ;;  %v4499_v19 = vpop.f32.mrb[41].mxu1  ;;  %v3999_v9 = vld [vmem:[%s3757_s23 + $0x36] sm:$0x3] }
 0x632   : > { %v1415_v20 = vpop.f32.mrb[42].mxu0  ;;  %v1462_v21 = vpop.f32.mrb[42].mxu1 }
 0x633   : > { %v3987_v22 = vmul.f32 -1.442695, %v1418_v10  ;;  %v3989_v4 = vmul.f32 -1.442695, %v1465_v17  ;;  %v4492_v23 = vpop.f32.mrb[43].mxu0  ;;  %v4500_v5 = vpop.f32.mrb[43].mxu1 }
 0x634   : > { %v3998_v21 = vld [vmem:[%s3757_s23 + $0x34] sm:$0x3]  ;;  %s3787_s23 = scalar_lea.vmem %s5265_s7, %s4058_s22 }
 0x635   : > { %4968 = vpow2.f32 %v3987_v22 }
 0x636   : > { %4970 = vpow2.f32 %v3989_v4 }
 0x638   : > { %v1506_v25 = vpop.f32.mrb[44].mxu0  ;;  %v1548_v26 = vpop.f32.mrb[44].mxu1 }
 0x639   : > { %v1554_v27 = vadd.f32 %v3985_v24, %v1548_v26  ;;  %v4507_v28 = vpop.f32.mrb[45].mxu0  ;;  %v4515_v29 = vpop.f32.mrb[45].mxu1  ;;  %v1512_v36 = vadd.f32 %v3984_v30, %v1506_v25 }
 0x63a   : > { %v1509_v31 = vpop.f32.mrb[46].mxu0  ;;  %v1551_v32 = vpop.f32.mrb[46].mxu1 }
 0x63b   : > { %v4508_v33 = vpop.f32.mrb[47].mxu0  ;;  %v4516_v34 = vpop.f32.mrb[47].mxu1  ;;  %v3992_v35 = vmul.f32 -1.442695, %v1554_v27 }
 0x63d   : > { %4972 = vpow2.f32 %v3992_v35 }
 0x63e   : > { %4974 = vtanh.f32 %v1512_v36 }
 0x63f   : > { %v4969_v37 = vpop.eup %4968 }
 0x640   : > { %v4971_v38 = vpop.eup %4970  ;;  %v1422_v39 = vadd.f32 1.0, %v4969_v37 }
 0x641   : > { %v1469_v40 = vadd.f32 1.0, %v4971_v38 }
 0x642   : > { %4976 = vrcp.f32 %v1422_v39 }
 0x643   : > { %4978 = vrcp.f32 %v1469_v40 }
 0x647   : > { %v4973_v41 = vpop.eup %4972 }
 0x648   : > { %v4975_v42 = vpop.eup %4974  ;;  %v1558_v47 = vadd.f32 1.0, %v4973_v41 }
 0x64a   : > { %4980 = vrcp.f32 %v1558_v47 }
 0x64c   : > { %v4977_v43 = vpop.eup %4976 }
 0x64d   : > { %v4979_v44 = vpop.eup %4978  ;;  %v1563_v46 = vmul.f32 %v4977_v43, %v4975_v42 }
 0x64e   : > { %v1562_v48 = vmul.f32 %v4979_v44, %v1561_v45  ;;  %v5589_v44 = vld [vmem:[%s5260_s26 + $0x38] sm:$0xff]  }
 0x64f   : > { %v4010_v45 = vld [vmem:[%s3764_s28 + $0x38] sm:$0x3] }
 0x650   : > { %v1564_v49 = vadd.f32 %v1563_v46, %v1562_v48  ;;  %v4011_v46 = vld [vmem:[%s3764_s28 + $0x3a] sm:$0x3] }
 0x652   : > { %4982 = vtanh.f32 %v1564_v49  ;;  %1567 = vst.msk [vmem:[#allocation3] sm:$0x3] %vm531_vm3, %v1564_v49 }
 0x654   : > { %v4981_v50 = vpop.eup %4980 }
 0x659   : > { %v1768_v34 = vld [vmem:[#allocation3] sm:$0x3] }
 0x65c   : > { %v4983_v51 = vpop.eup %4982 }
 0x65d   : > { %v1566_v52 = vmul.f32 %v4983_v51, %v4981_v50 }
 0x65f   : > { %1568 = vst.msk [vmem:[#allocation2] sm:$0x3] %vm531_vm3, %v1566_v52  ;;  %3994 = vst.msk [vmem:[%s3753_s21 + $0xa] sm:$0x3] %vm531_vm3, %v1566_v52  ;;  %s3783_s21 = scalar_lea.vmem %s5270_s17, %s4046_s20  ;;  %s4116_s20 = smul.u32 4294967176, %s5186_s10 }
 0x666   : > { %v1580_v53 = vld [vmem:[#allocation2] sm:$0x3] }
 0x667   : > { %v1581_v54 = vpack.c.bf16 %v1580_v53, %v1580_v53 }
 0x669   : > { %4522 = vmatmul.mubr.msk.bf16.vlgmr.msra.gmra.mrb[48].mxu0 %vm302_vm2, %v1581_v54  ;;  %4530 = vmatmul.mubr.msk.bf16.vlgmr.msra.gmra.mrb[48].mxu1 %vm302_vm2, %v1581_v54 }
 0x66a   : > { %4534 = vmatpush3.bf16.msra.mxu0 %v5524_v55  ;;  %4542 = vmatpush3.bf16.msra.mxu1 %v5528_v56 }
 0x66b   : > { %4535 = vmatprep.subr.bf16.mxu0 %v5201_v2  ;;  %4543 = vmatprep.subr.bf16.mxu1 %v5201_v2 }
 0x66c   : > { %4537 = vmatprep.mubr.msk.bf16.mxu0 %vm5202_vm1, %v5201_v2  ;;  %4545 = vmatprep.mubr.msk.bf16.mxu1 %vm5202_vm1, %v5201_v2 }
 0x66e   : > { %4536 = vmatpush3.bf16.msra.mxu0 %v5538_v57  ;;  %4544 = vmatpush3.bf16.msra.mxu1 %v5314_v11  ;;  %v5561_v11 = vld [vmem:[%s5260_s26 + $0x8] sm:$0xff]  }
 0x66f   : > { %4549 = vmatprep.subr.bf16.mxu0 %v5201_v2  ;;  %4557 = vmatprep.subr.bf16.mxu1 %v5201_v2 }
 0x671   : > { %4538 = vmatmul.mubr.msk.bf16.vlgmr.msra.gmra.mrb[52].mxu0 %vm302_vm2, %v1581_v54  ;;  %4546 = vmatmul.mubr.msk.bf16.vlgmr.msra.gmra.mrb[52].mxu1 %vm302_vm2, %v1581_v54 }
 0x672   : > { %4550 = vmatpush3.bf16.msra.mxu0 %v5547_v58  ;;  %4558 = vmatpush3.bf16.msra.mxu1 %v5551_v59 }
 0x673   : > { %4551 = vmatprep.subr.bf16.mxu0 %v5201_v2  ;;  %4559 = vmatprep.subr.bf16.mxu1 %v5201_v2 }
 0x674   : > { %4553 = vmatprep.mubr.msk.bf16.mxu0 %vm5202_vm1, %v5201_v2  ;;  %4561 = vmatprep.mubr.msk.bf16.mxu1 %vm5202_vm1, %v5201_v2 }
 0x676   : > { %4552 = vmatpush3.bf16.msra.mxu0 %v5561_v11  ;;  %4560 = vmatpush3.bf16.msra.mxu1 %v5565_v60 }
 0x677   : > { %4565 = vmatprep.subr.bf16.mxu0 %v5201_v2  ;;  %4573 = vmatprep.subr.bf16.mxu1 %v5201_v2 }
 0x73c   : > { %v1619_v63 = vpop.f32.mrb[48].mxu0  ;;  %v1666_v0 = vpop.f32.mrb[48].mxu1 }
 0x73d   : > { %v1625_v6 = vadd.f32 %v3996_v61, %v1619_v63  ;;  %v1672_v7 = vadd.f32 %v3997_v62, %v1666_v0  ;;  %v4523_v12 = vpop.f32.mrb[49].mxu0  ;;  %v4531_v13 = vpop.f32.mrb[49].mxu1 }
 0x73e   : > { %v1622_v14 = vpop.f32.mrb[50].mxu0  ;;  %v1669_v15 = vpop.f32.mrb[50].mxu1 }
 0x73f   : > { %v4001_v16 = vmul.f32 -1.442695, %v1625_v6  ;;  %v4003_v1 = vmul.f32 -1.442695, %v1672_v7  ;;  %v4524_v3 = vpop.f32.mrb[51].mxu0  ;;  %v4532_v8 = vpop.f32.mrb[51].mxu1 }
 0x740   : > { %v4013_v6 = vld [vmem:[%s3764_s28 + $0x3e] sm:$0x3] }
 0x741   : > { %4984 = vpow2.f32 %v4001_v16  ;;  %v4012_v16 = vld [vmem:[%s3764_s28 + $0x3c] sm:$0x3]  ;;  %s3795_s28 = scalar_lea.vmem %s5265_s7, %s4072_s27 }
 0x742   : > { %4986 = vpow2.f32 %v4003_v1 }
 0x744   : > { %v1713_v10 = vpop.f32.mrb[52].mxu0  ;;  %v1755_v17 = vpop.f32.mrb[52].mxu1 }
 0x745   : > { %v1761_v18 = vadd.f32 %v3999_v9, %v1755_v17  ;;  %v4539_v19 = vpop.f32.mrb[53].mxu0  ;;  %v4547_v20 = vpop.f32.mrb[53].mxu1  ;;  %v1719_v25 = vadd.f32 %v3998_v21, %v1713_v10 }
 0x746   : > { %v1716_v22 = vpop.f32.mrb[54].mxu0  ;;  %v1758_v4 = vpop.f32.mrb[54].mxu1 }
 0x747   : > { %v4540_v23 = vpop.f32.mrb[55].mxu0  ;;  %v4548_v5 = vpop.f32.mrb[55].mxu1  ;;  %v4006_v24 = vmul.f32 -1.442695, %v1761_v18 }
 0x749   : > { %4988 = vpow2.f32 %v4006_v24 }
 0x74a   : > { %4990 = vtanh.f32 %v1719_v25 }
 0x74b   : > { %v4985_v26 = vpop.eup %4984 }
 0x74c   : > { %v4987_v27 = vpop.eup %4986  ;;  %v1629_v28 = vadd.f32 1.0, %v4985_v26 }
 0x74d   : > { %v1676_v29 = vadd.f32 1.0, %v4987_v27 }
 0x74e   : > { %4992 = vrcp.f32 %v1629_v28 }
 0x74f   : > { %4994 = vrcp.f32 %v1676_v29 }
 0x753   : > { %v4989_v30 = vpop.eup %4988 }
 0x754   : > { %v4991_v31 = vpop.eup %4990  ;;  %v1765_v36 = vadd.f32 1.0, %v4989_v30 }
 0x756   : > { %4996 = vrcp.f32 %v1765_v36 }
 0x758   : > { %v4993_v32 = vpop.eup %4992 }
 0x759   : > { %v4995_v33 = vpop.eup %4994  ;;  %v1770_v35 = vmul.f32 %v4993_v32, %v4991_v31 }
 0x75a   : > { %v1769_v37 = vmul.f32 %v4995_v33, %v1768_v34  ;;  %v1988_v34 = vld [vmem:[%s1987_s5] sm:$0x3] }
 0x75c   : > { %v1771_v38 = vadd.f32 %v1770_v35, %v1769_v37  ;;  %v1989_v35 = vld [vmem:[%s1987_s5 + $0x2] sm:$0x3] }
 0x75e   : > { %4998 = vtanh.f32 %v1771_v38  ;;  %1774 = vst.msk [vmem:[#allocation3] sm:$0x3] %vm531_vm3, %v1771_v38 }
 0x760   : > { %v4997_v39 = vpop.eup %4996 }
 0x765   : > { %v1974_v24 = vld [vmem:[#allocation3] sm:$0x3] }
 0x768   : > { %v4999_v40 = vpop.eup %4998 }
 0x769   : > { %v1773_v41 = vmul.f32 %v4999_v40, %v4997_v39 }
 0x76b   : > { %1775 = vst.msk [vmem:[#allocation2] sm:$0x3] %vm531_vm3, %v1773_v41  ;;  %4008 = vst.msk [vmem:[%s3761_s25 + $0xc] sm:$0x3] %vm531_vm3, %v1773_v41  ;;  %s3791_s25 = scalar_lea.vmem %s5270_s17, %s4060_s24 }
 0x772   : > { %v1786_v42 = vld [vmem:[#allocation2] sm:$0x3] }
 0x773   : > { %v1787_v43 = vpack.c.bf16 %v1786_v42, %v1786_v42 }
 0x775   : > { %4554 = vmatmul.mubr.msk.bf16.vlgmr.msra.gmra.mrb[56].mxu0 %vm302_vm2, %v1787_v43  ;;  %4562 = vmatmul.mubr.msk.bf16.vlgmr.msra.gmra.mrb[56].mxu1 %vm302_vm2, %v1787_v43 }
 0x776   : > { %4566 = vmatpush3.bf16.msra.mxu0 %v5524_v55  ;;  %4574 = vmatpush3.bf16.msra.mxu1 %v5528_v56 }
 0x777   : > { %4567 = vmatprep.subr.bf16.mxu0 %v5201_v2  ;;  %4575 = vmatprep.subr.bf16.mxu1 %v5201_v2 }
 0x778   : > { %4569 = vmatprep.mubr.msk.bf16.mxu0 %vm5202_vm1, %v5201_v2  ;;  %4577 = vmatprep.mubr.msk.bf16.mxu1 %vm5202_vm1, %v5201_v2 }
 0x77a   : > { %4568 = vmatpush3.bf16.msra.mxu0 %v5538_v57  ;;  %4576 = vmatpush3.bf16.msra.mxu1 %v5589_v44 }
 0x77b   : > { %4581 = vmatprep.subr.bf16.mxu0 %v5201_v2  ;;  %4589 = vmatprep.subr.bf16.mxu1 %v5201_v2 }
 0x77d   : > { %4570 = vmatmul.mubr.msk.bf16.vlgmr.msra.gmra.mrb[60].mxu0 %vm302_vm2, %v1787_v43  ;;  %4578 = vmatmul.mubr.msk.bf16.vlgmr.msra.gmra.mrb[60].mxu1 %vm302_vm2, %v1787_v43 }
 0x77e   : > { %4582 = vmatpush3.bf16.msra.mxu0 %v5547_v58  ;;  %4590 = vmatpush3.bf16.msra.mxu1 %v5551_v59 }
 0x77f   : > { %4583 = vmatprep.subr.bf16.mxu0 %v5201_v2  ;;  %4591 = vmatprep.subr.bf16.mxu1 %v5201_v2 }
 0x780   : > { %4585 = vmatprep.mubr.msk.bf16.mxu0 %vm5202_vm1, %v5201_v2  ;;  %4593 = vmatprep.mubr.msk.bf16.mxu1 %vm5202_vm1, %v5201_v2 }
 0x782   : > { %4584 = vmatpush3.bf16.msra.mxu0 %v5561_v11  ;;  %4592 = vmatpush3.bf16.msra.mxu1 %v5565_v60 }
 0x783   : > { %4597 = vmatprep.subr.bf16.mxu0 %v5201_v2  ;;  %4605 = vmatprep.subr.bf16.mxu1 %v5201_v2 }
 0x848   : > { %v1825_v47 = vpop.f32.mrb[56].mxu0  ;;  %v1872_v48 = vpop.f32.mrb[56].mxu1 }
 0x849   : > { %v1831_v49 = vadd.f32 %v4010_v45, %v1825_v47  ;;  %v1878_v50 = vadd.f32 %v4011_v46, %v1872_v48  ;;  %v4555_v51 = vpop.f32.mrb[57].mxu0  ;;  %v4563_v52 = vpop.f32.mrb[57].mxu1 }
 0x84a   : > { %v1828_v53 = vpop.f32.mrb[58].mxu0  ;;  %v1875_v54 = vpop.f32.mrb[58].mxu1 }
 0x84b   : > { %v4015_v61 = vmul.f32 -1.442695, %v1831_v49  ;;  %v4017_v62 = vmul.f32 -1.442695, %v1878_v50  ;;  %v4556_v63 = vpop.f32.mrb[59].mxu0  ;;  %v4564_v0 = vpop.f32.mrb[59].mxu1 }
 0x84c   : > { %v1991_v49 = vld [vmem:[%s1987_s5 + $0x6] sm:$0x3] }
 0x84d   : > { %5000 = vpow2.f32 %v4015_v61  ;;  %v1990_v61 = vld [vmem:[%s1987_s5 + $0x4] sm:$0x3]  ;;  %s4088_s5 = smul.u32 4294967208, %s5186_s10 }
 0x84e   : > { %5002 = vpow2.f32 %v4017_v62 }
 0x84f   : > { %s3807_s6 = scalar_lea.vmem %s5270_s17, %s4088_s5 }
 0x850   : > { %v1919_v7 = vpop.f32.mrb[60].mxu0  ;;  %v1961_v12 = vpop.f32.mrb[60].mxu1 }
 0x851   : > { %v1967_v13 = vadd.f32 %v4013_v6, %v1961_v12  ;;  %v4571_v14 = vpop.f32.mrb[61].mxu0  ;;  %v4579_v15 = vpop.f32.mrb[61].mxu1  ;;  %v1925_v17 = vadd.f32 %v4012_v16, %v1919_v7 }
 0x852   : > { %v1922_v1 = vpop.f32.mrb[62].mxu0  ;;  %v1964_v3 = vpop.f32.mrb[62].mxu1 }
 0x853   : > { %v4572_v8 = vpop.f32.mrb[63].mxu0  ;;  %v4580_v9 = vpop.f32.mrb[63].mxu1  ;;  %v4020_v10 = vmul.f32 -1.442695, %v1967_v13 }
 0x855   : > { %5004 = vpow2.f32 %v4020_v10 }
 0x856   : > { %5006 = vtanh.f32 %v1925_v17 }
 0x857   : > { %v5001_v18 = vpop.eup %5000 }
 0x858   : > { %v5003_v19 = vpop.eup %5002  ;;  %v1835_v20 = vadd.f32 1.0, %v5001_v18 }
 0x859   : > { %v1882_v21 = vadd.f32 1.0, %v5003_v19 }
 0x85a   : > { %5008 = vrcp.f32 %v1835_v20 }
 0x85b   : > { %5010 = vrcp.f32 %v1882_v21 }
 0x85f   : > { %v5005_v22 = vpop.eup %5004 }
 0x860   : > { %v5007_v4 = vpop.eup %5006  ;;  %v1971_v26 = vadd.f32 1.0, %v5005_v22 }
 0x862   : > { %5012 = vrcp.f32 %v1971_v26 }
 0x864   : > { %v5009_v23 = vpop.eup %5008 }
 0x865   : > { %v5011_v5 = vpop.eup %5010  ;;  %v1976_v25 = vmul.f32 %v5009_v23, %v5007_v4 }
 0x866   : > { %v1975_v27 = vmul.f32 %v5011_v5, %v1974_v24  ;;  %v4033_v24 = vld [vmem:[%s3775_s9 + $0x48] sm:$0x3] }
 0x868   : > { %v1977_v28 = vadd.f32 %v1976_v25, %v1975_v27  ;;  %v4034_v25 = vld [vmem:[%s3775_s9 + $0x4a] sm:$0x3] }
 0x86a   : > { %5014 = vtanh.f32 %v1977_v28  ;;  %1980 = vst.msk [vmem:[#allocation3] sm:$0x3] %vm531_vm3, %v1977_v28 }
 0x86c   : > { %v5013_v29 = vpop.eup %5012 }
 0x871   : > { %v2180_v10 = vld [vmem:[#allocation3] sm:$0x3] }
 0x874   : > { %v5015_v30 = vpop.eup %5014 }
 0x875   : > { %v1979_v31 = vmul.f32 %v5015_v30, %v5013_v29 }
 0x877   : > { %4022 = vst.msk [vmem:[%s3767_s30 + $0xe] sm:$0x3] %vm531_vm3, %v1979_v31  ;;  %1981 = vst.msk [vmem:[#allocation2] sm:$0x3] %vm531_vm3, %v1979_v31  ;;  %s3799_s30 = scalar_lea.vmem %s5270_s17, %s4074_s29 }
 0x87e   : > { %v1992_v32 = vld [vmem:[#allocation2] sm:$0x3] }
 0x87f   : > { %v1993_v33 = vpack.c.bf16 %v1992_v32, %v1992_v32 }
 0x881   : > { %4586 = vmatmul.mubr.msk.bf16.vlgmr.msra.gmra.mrb[64].mxu0 %vm302_vm2, %v1993_v33  ;;  %4594 = vmatmul.mubr.msk.bf16.vlgmr.msra.gmra.mrb[64].mxu1 %vm302_vm2, %v1993_v33 }
 0x882   : > { %4598 = vmatpush3.bf16.msra.mxu0 %v5524_v55  ;;  %4606 = vmatpush3.bf16.msra.mxu1 %v5528_v56 }
 0x883   : > { %4599 = vmatprep.subr.bf16.mxu0 %v5201_v2  ;;  %4607 = vmatprep.subr.bf16.mxu1 %v5201_v2 }
 0x884   : > { %4601 = vmatprep.mubr.msk.bf16.mxu0 %vm5202_vm1, %v5201_v2  ;;  %4609 = vmatprep.mubr.msk.bf16.mxu1 %vm5202_vm1, %v5201_v2 }
 0x886   : > { %4600 = vmatpush3.bf16.msra.mxu0 %v5538_v57  ;;  %4608 = vmatpush3.bf16.msra.mxu1 %v5589_v44 }
 0x887   : > { %4613 = vmatprep.subr.bf16.mxu0 %v5201_v2  ;;  %4621 = vmatprep.subr.bf16.mxu1 %v5201_v2 }
 0x889   : > { %4602 = vmatmul.mubr.msk.bf16.vlgmr.msra.gmra.mrb[68].mxu0 %vm302_vm2, %v1993_v33  ;;  %4610 = vmatmul.mubr.msk.bf16.vlgmr.msra.gmra.mrb[68].mxu1 %vm302_vm2, %v1993_v33 }
 0x88a   : > { %4614 = vmatpush3.bf16.msra.mxu0 %v5547_v58  ;;  %4622 = vmatpush3.bf16.msra.mxu1 %v5551_v59 }
 0x88b   : > { %4615 = vmatprep.subr.bf16.mxu0 %v5201_v2  ;;  %4623 = vmatprep.subr.bf16.mxu1 %v5201_v2 }
 0x88c   : > { %4617 = vmatprep.mubr.msk.bf16.mxu0 %vm5202_vm1, %v5201_v2  ;;  %4625 = vmatprep.mubr.msk.bf16.mxu1 %vm5202_vm1, %v5201_v2 }
 0x88e   : > { %4616 = vmatpush3.bf16.msra.mxu0 %v5561_v11  ;;  %4624 = vmatpush3.bf16.msra.mxu1 %v5565_v60 }
 0x88f   : > { %4629 = vmatprep.subr.bf16.mxu0 %v5201_v2  ;;  %4637 = vmatprep.subr.bf16.mxu1 %v5201_v2 }
 0x954   : > { %v2031_v36 = vpop.f32.mrb[64].mxu0  ;;  %v2078_v37 = vpop.f32.mrb[64].mxu1 }
 0x955   : > { %v2037_v38 = vadd.f32 %v2031_v36, %v1988_v34  ;;  %v2084_v39 = vadd.f32 %v2078_v37, %v1989_v35  ;;  %v4587_v40 = vpop.f32.mrb[65].mxu0  ;;  %v4595_v41 = vpop.f32.mrb[65].mxu1 }
 0x956   : > { %v2034_v42 = vpop.f32.mrb[66].mxu0  ;;  %v2081_v43 = vpop.f32.mrb[66].mxu1 }
 0x957   : > { %v4025_v45 = vmul.f32 -1.442695, %v2037_v38  ;;  %v4027_v46 = vmul.f32 -1.442695, %v2084_v39  ;;  %v4588_v47 = vpop.f32.mrb[67].mxu0  ;;  %v4596_v48 = vpop.f32.mrb[67].mxu1 }
 0x958   : > { %v4036_v38 = vld [vmem:[%s3775_s9 + $0x4e] sm:$0x3] }
 0x959   : > { %5016 = vpow2.f32 %v4025_v45  ;;  %v4035_v45 = vld [vmem:[%s3775_s9 + $0x4c] sm:$0x3] }
 0x95a   : > { %5018 = vpow2.f32 %v4027_v46 }
 0x95c   : > { %v2125_v50 = vpop.f32.mrb[68].mxu0  ;;  %v2167_v51 = vpop.f32.mrb[68].mxu1 }
 0x95d   : > { %v2173_v52 = vadd.f32 %v2167_v51, %v1991_v49  ;;  %v4603_v53 = vpop.f32.mrb[69].mxu0  ;;  %v4611_v54 = vpop.f32.mrb[69].mxu1  ;;  %v2131_v12 = vadd.f32 %v2125_v50, %v1990_v61 }
 0x95e   : > { %v2128_v62 = vpop.f32.mrb[70].mxu0  ;;  %v2170_v63 = vpop.f32.mrb[70].mxu1 }
 0x95f   : > { %v4604_v0 = vpop.f32.mrb[71].mxu0  ;;  %v4612_v6 = vpop.f32.mrb[71].mxu1  ;;  %v4030_v7 = vmul.f32 -1.442695, %v2173_v52 }
 0x961   : > { %5020 = vpow2.f32 %v4030_v7 }
 0x962   : > { %5022 = vtanh.f32 %v2131_v12 }
 0x963   : > { %v5017_v13 = vpop.eup %5016 }
 0x964   : > { %v5019_v14 = vpop.eup %5018  ;;  %v2041_v15 = vadd.f32 1.0, %v5017_v13 }
 0x965   : > { %v2088_v16 = vadd.f32 1.0, %v5019_v14 }
 0x966   : > { %5024 = vrcp.f32 %v2041_v15 }
 0x967   : > { %5026 = vrcp.f32 %v2088_v16 }
 0x96b   : > { %v5021_v1 = vpop.eup %5020 }
 0x96c   : > { %v5023_v3 = vpop.eup %5022  ;;  %v2177_v18 = vadd.f32 1.0, %v5021_v1 }
 0x96e   : > { %5028 = vrcp.f32 %v2177_v18 }
 0x970   : > { %v5025_v8 = vpop.eup %5024 }
 0x971   : > { %v5027_v9 = vpop.eup %5026  ;;  %v2182_v17 = vmul.f32 %v5025_v8, %v5023_v3 }
 0x972   : > { %v2181_v19 = vmul.f32 %v5027_v9, %v2180_v10  ;;  %v4047_v10 = vld [vmem:[%s3783_s21 + $0x50] sm:$0x3] }
 0x974   : > { %v2183_v20 = vadd.f32 %v2182_v17, %v2181_v19  ;;  %v4048_v17 = vld [vmem:[%s3783_s21 + $0x52] sm:$0x3] }
 0x976   : > { %5030 = vtanh.f32 %v2183_v20  ;;  %2186 = vst.msk [vmem:[#allocation3] sm:$0x3] %vm531_vm3, %v2183_v20 }
 0x978   : > { %v5029_v21 = vpop.eup %5028 }
 0x97d   : > { %v2387_v7 = vld [vmem:[#allocation3] sm:$0x3] }
 0x980   : > { %v5031_v22 = vpop.eup %5030 }
 0x981   : > { %v2185_v4 = vmul.f32 %v5031_v22, %v5029_v21 }
 0x983   : > { %2190 = vst.msk [vmem:[%s2189_s8] sm:$0x3] %vm531_vm3, %v2185_v4  ;;  %2187 = vst.msk [vmem:[#allocation2] sm:$0x3] %vm531_vm3, %v2185_v4  ;;  %s4100_s8 = smul.u32 4294967274, %s5186_s10 }
 0x985   : > { %s3811_s16 = scalar_lea.vmem %s5265_s7, %s4100_s8 }
 0x98a   : > { %v2199_v23 = vld [vmem:[#allocation2] sm:$0x3] }
 0x98b   : > { %v2200_v5 = vpack.c.bf16 %v2199_v23, %v2199_v23 }
 0x98d   : > { %4618 = vmatmul.mubr.msk.bf16.vlgmr.msra.gmra.mrb[72].mxu0 %vm302_vm2, %v2200_v5  ;;  %4626 = vmatmul.mubr.msk.bf16.vlgmr.msra.gmra.mrb[72].mxu1 %vm302_vm2, %v2200_v5 }
 0x98e   : > { %4630 = vmatpush3.bf16.msra.mxu0 %v5524_v55  ;;  %4638 = vmatpush3.bf16.msra.mxu1 %v5528_v56 }
 0x98f   : > { %4631 = vmatprep.subr.bf16.mxu0 %v5201_v2  ;;  %4639 = vmatprep.subr.bf16.mxu1 %v5201_v2 }
 0x990   : > { %4633 = vmatprep.mubr.msk.bf16.mxu0 %vm5202_vm1, %v5201_v2  ;;  %4641 = vmatprep.mubr.msk.bf16.mxu1 %vm5202_vm1, %v5201_v2 }
 0x992   : > { %4632 = vmatpush3.bf16.msra.mxu0 %v5538_v57  ;;  %4640 = vmatpush3.bf16.msra.mxu1 %v5589_v44 }
 0x993   : > { %4645 = vmatprep.subr.bf16.mxu0 %v5201_v2  ;;  %4653 = vmatprep.subr.bf16.mxu1 %v5201_v2 }
 0x995   : > { %4634 = vmatmul.mubr.msk.bf16.vlgmr.msra.gmra.mrb[76].mxu0 %vm302_vm2, %v2200_v5  ;;  %4642 = vmatmul.mubr.msk.bf16.vlgmr.msra.gmra.mrb[76].mxu1 %vm302_vm2, %v2200_v5 }
 0x996   : > { %4646 = vmatpush3.bf16.msra.mxu0 %v5547_v58  ;;  %4654 = vmatpush3.bf16.msra.mxu1 %v5551_v59 }
 0x997   : > { %4647 = vmatprep.subr.bf16.mxu0 %v5201_v2  ;;  %4655 = vmatprep.subr.bf16.mxu1 %v5201_v2 }
 0x998   : > { %4649 = vmatprep.mubr.msk.bf16.mxu0 %vm5202_vm1, %v5201_v2  ;;  %4657 = vmatprep.mubr.msk.bf16.mxu1 %vm5202_vm1, %v5201_v2 }
 0x99a   : > { %4648 = vmatpush3.bf16.msra.mxu0 %v5561_v11  ;;  %4656 = vmatpush3.bf16.msra.mxu1 %v5565_v60 }
 0x99b   : > { %4661 = vmatprep.subr.bf16.mxu0 %v5201_v2  ;;  %4669 = vmatprep.subr.bf16.mxu1 %v5201_v2 }
 0xa60   : > { %v2238_v26 = vpop.f32.mrb[72].mxu0  ;;  %v2285_v27 = vpop.f32.mrb[72].mxu1 }
 0xa61   : > { %v2244_v28 = vadd.f32 %v4033_v24, %v2238_v26  ;;  %v2291_v29 = vadd.f32 %v4034_v25, %v2285_v27  ;;  %v4619_v30 = vpop.f32.mrb[73].mxu0  ;;  %v4627_v31 = vpop.f32.mrb[73].mxu1 }
 0xa62   : > { %v2241_v32 = vpop.f32.mrb[74].mxu0  ;;  %v2288_v33 = vpop.f32.mrb[74].mxu1 }
 0xa63   : > { %v4038_v34 = vmul.f32 -1.442695, %v2244_v28  ;;  %v4040_v35 = vmul.f32 -1.442695, %v2291_v29  ;;  %v4620_v36 = vpop.f32.mrb[75].mxu0  ;;  %v4628_v37 = vpop.f32.mrb[75].mxu1 }
 0xa64   : > { %v4050_v28 = vld [vmem:[%s3783_s21 + $0x56] sm:$0x3] }
 0xa65   : > { %5032 = vpow2.f32 %v4038_v34  ;;  %v4049_v34 = vld [vmem:[%s3783_s21 + $0x54] sm:$0x3]  ;;  %s3823_s21 = scalar_lea.vmem %s5270_s17, %s4116_s20 }
 0xa66   : > { %5034 = vpow2.f32 %v4040_v35 }
 0xa68   : > { %v2332_v39 = vpop.f32.mrb[76].mxu0  ;;  %v2374_v40 = vpop.f32.mrb[76].mxu1 }
 0xa69   : > { %v2380_v41 = vadd.f32 %v4036_v38, %v2374_v40  ;;  %v4635_v42 = vpop.f32.mrb[77].mxu0  ;;  %v4643_v43 = vpop.f32.mrb[77].mxu1  ;;  %v2338_v51 = vadd.f32 %v4035_v45, %v2332_v39 }
 0xa6a   : > { %v2335_v46 = vpop.f32.mrb[78].mxu0  ;;  %v2377_v47 = vpop.f32.mrb[78].mxu1 }
 0xa6b   : > { %v4636_v48 = vpop.f32.mrb[79].mxu0  ;;  %v4644_v49 = vpop.f32.mrb[79].mxu1  ;;  %v4043_v50 = vmul.f32 -1.442695, %v2380_v41 }
 0xa6d   : > { %5036 = vpow2.f32 %v4043_v50 }
 0xa6e   : > { %5038 = vtanh.f32 %v2338_v51 }
 0xa6f   : > { %v5033_v52 = vpop.eup %5032 }
 0xa70   : > { %v5035_v53 = vpop.eup %5034  ;;  %v2248_v54 = vadd.f32 1.0, %v5033_v52 }
 0xa71   : > { %v2295_v61 = vadd.f32 1.0, %v5035_v53 }
 0xa72   : > { %5040 = vrcp.f32 %v2248_v54 }
 0xa73   : > { %5042 = vrcp.f32 %v2295_v61 }
 0xa77   : > { %v5037_v62 = vpop.eup %5036 }
 0xa78   : > { %v5039_v63 = vpop.eup %5038  ;;  %v2384_v13 = vadd.f32 1.0, %v5037_v62 }
 0xa7a   : > { %5044 = vrcp.f32 %v2384_v13 }
 0xa7c   : > { %v5041_v0 = vpop.eup %5040 }
 0xa7d   : > { %v5043_v6 = vpop.eup %5042  ;;  %v2389_v12 = vmul.f32 %v5041_v0, %v5039_v63 }
 0xa7e   : > { %v2388_v14 = vmul.f32 %v5043_v6, %v2387_v7  ;;  %v4061_v7 = vld [vmem:[%s3791_s25 + $0x58] sm:$0x3] }
 0xa80   : > { %v2390_v15 = vadd.f32 %v2389_v12, %v2388_v14  ;;  %v4062_v12 = vld [vmem:[%s3791_s25 + $0x5a] sm:$0x3] }
 0xa82   : > { %5046 = vtanh.f32 %v2390_v15  ;;  %2393 = vst.msk [vmem:[#allocation3] sm:$0x3] %vm531_vm3, %v2390_v15 }
 0xa84   : > { %v5045_v16 = vpop.eup %5044 }
 0xa89   : > { %v2594_v50 = vld [vmem:[#allocation3] sm:$0x3] }
 0xa8c   : > { %v5047_v1 = vpop.eup %5046 }
 0xa8d   : > { %v2392_v3 = vmul.f32 %v5047_v1, %v5045_v16 }
 0xa8f   : > { %4045 = vst.msk [vmem:[%s3779_s19 + $0x12] sm:$0x3] %vm531_vm3, %v2392_v3  ;;  %2394 = vst.msk [vmem:[#allocation2] sm:$0x3] %vm531_vm3, %v2392_v3  ;;  %s3819_s19 = scalar_lea.vmem %s5265_s7, %s4114_s18 }
 0xa96   : > { %v2406_v8 = vld [vmem:[#allocation2] sm:$0x3] }
 0xa97   : > { %v2407_v9 = vpack.c.bf16 %v2406_v8, %v2406_v8 }
 0xa99   : > { %4650 = vmatmul.mubr.msk.bf16.vlgmr.msra.gmra.mrb[80].mxu0 %vm302_vm2, %v2407_v9  ;;  %4658 = vmatmul.mubr.msk.bf16.vlgmr.msra.gmra.mrb[80].mxu1 %vm302_vm2, %v2407_v9 }
 0xa9a   : > { %4662 = vmatpush3.bf16.msra.mxu0 %v5524_v55  ;;  %4670 = vmatpush3.bf16.msra.mxu1 %v5528_v56 }
 0xa9b   : > { %4663 = vmatprep.subr.bf16.mxu0 %v5201_v2  ;;  %4671 = vmatprep.subr.bf16.mxu1 %v5201_v2 }
 0xa9c   : > { %4665 = vmatprep.mubr.msk.bf16.mxu0 %vm5202_vm1, %v5201_v2  ;;  %4673 = vmatprep.mubr.msk.bf16.mxu1 %vm5202_vm1, %v5201_v2 }
 0xa9e   : > { %4664 = vmatpush3.bf16.msra.mxu0 %v5538_v57  ;;  %4672 = vmatpush3.bf16.msra.mxu1 %v5589_v44 }
 0xa9f   : > { %4677 = vmatprep.subr.bf16.mxu0 %v5201_v2  ;;  %4685 = vmatprep.subr.bf16.mxu1 %v5201_v2 }
 0xaa1   : > { %4666 = vmatmul.mubr.msk.bf16.vlgmr.msra.gmra.mrb[84].mxu0 %vm302_vm2, %v2407_v9  ;;  %4674 = vmatmul.mubr.msk.bf16.vlgmr.msra.gmra.mrb[84].mxu1 %vm302_vm2, %v2407_v9 }
 0xaa2   : > { %4678 = vmatpush3.bf16.msra.mxu0 %v5547_v58  ;;  %4686 = vmatpush3.bf16.msra.mxu1 %v5551_v59 }
 0xaa3   : > { %4679 = vmatprep.subr.bf16.mxu0 %v5201_v2  ;;  %4687 = vmatprep.subr.bf16.mxu1 %v5201_v2 }
 0xaa4   : > { %4681 = vmatprep.mubr.msk.bf16.mxu0 %vm5202_vm1, %v5201_v2  ;;  %4689 = vmatprep.mubr.msk.bf16.mxu1 %vm5202_vm1, %v5201_v2 }
 0xaa6   : > { %4680 = vmatpush3.bf16.msra.mxu0 %v5561_v11  ;;  %4688 = vmatpush3.bf16.msra.mxu1 %v5565_v60 }
 0xaa7   : > { %4693 = vmatprep.subr.bf16.mxu0 %v5201_v2  ;;  %4701 = vmatprep.subr.bf16.mxu1 %v5201_v2 }
 0xb6c   : > { %v2445_v18 = vpop.f32.mrb[80].mxu0  ;;  %v2492_v19 = vpop.f32.mrb[80].mxu1 }
 0xb6d   : > { %v2451_v20 = vadd.f32 %v4047_v10, %v2445_v18  ;;  %v2498_v21 = vadd.f32 %v4048_v17, %v2492_v19  ;;  %v4651_v22 = vpop.f32.mrb[81].mxu0  ;;  %v4659_v4 = vpop.f32.mrb[81].mxu1 }
 0xb6e   : > { %v2448_v23 = vpop.f32.mrb[82].mxu0  ;;  %v2495_v5 = vpop.f32.mrb[82].mxu1 }
 0xb6f   : > { %v4052_v24 = vmul.f32 -1.442695, %v2451_v20  ;;  %v4054_v25 = vmul.f32 -1.442695, %v2498_v21  ;;  %v4652_v26 = vpop.f32.mrb[83].mxu0  ;;  %v4660_v27 = vpop.f32.mrb[83].mxu1 }
 0xb70   : > { %v4064_v20 = vld [vmem:[%s3791_s25 + $0x5e] sm:$0x3] }
 0xb71   : > { %5048 = vpow2.f32 %v4052_v24  ;;  %v4063_v24 = vld [vmem:[%s3791_s25 + $0x5c] sm:$0x3] }
 0xb72   : > { %5050 = vpow2.f32 %v4054_v25 }
 0xb74   : > { %v2539_v29 = vpop.f32.mrb[84].mxu0  ;;  %v2581_v30 = vpop.f32.mrb[84].mxu1 }
 0xb75   : > { %v2587_v31 = vadd.f32 %v4050_v28, %v2581_v30  ;;  %v4667_v32 = vpop.f32.mrb[85].mxu0  ;;  %v4675_v33 = vpop.f32.mrb[85].mxu1  ;;  %v2545_v40 = vadd.f32 %v4049_v34, %v2539_v29 }
 0xb76   : > { %v2542_v35 = vpop.f32.mrb[86].mxu0  ;;  %v2584_v36 = vpop.f32.mrb[86].mxu1 }
 0xb77   : > { %v4668_v37 = vpop.f32.mrb[87].mxu0  ;;  %v4676_v38 = vpop.f32.mrb[87].mxu1  ;;  %v4057_v39 = vmul.f32 -1.442695, %v2587_v31 }
 0xb79   : > { %5052 = vpow2.f32 %v4057_v39 }
 0xb7a   : > { %5054 = vtanh.f32 %v2545_v40 }
 0xb7b   : > { %v5049_v41 = vpop.eup %5048 }
 0xb7c   : > { %v5051_v42 = vpop.eup %5050  ;;  %v2455_v43 = vadd.f32 1.0, %v5049_v41 }
 0xb7d   : > { %v2502_v45 = vadd.f32 1.0, %v5051_v42 }
 0xb7e   : > { %5056 = vrcp.f32 %v2455_v43 }
 0xb7f   : > { %5058 = vrcp.f32 %v2502_v45 }
 0xb83   : > { %v5053_v46 = vpop.eup %5052 }
 0xb84   : > { %v5055_v47 = vpop.eup %5054  ;;  %v2591_v52 = vadd.f32 1.0, %v5053_v46 }
 0xb86   : > { %5060 = vrcp.f32 %v2591_v52 }
 0xb88   : > { %v5057_v48 = vpop.eup %5056 }
 0xb89   : > { %v5059_v49 = vpop.eup %5058  ;;  %v2596_v51 = vmul.f32 %v5057_v48, %v5055_v47 }
 0xb8a   : > { %v2595_v53 = vmul.f32 %v5059_v49, %v2594_v50 }
 0xb8c   : > { %v2597_v54 = vadd.f32 %v2596_v51, %v2595_v53 }
 0xb8e   : > { %5062 = vtanh.f32 %v2597_v54  ;;  %2600 = vst.msk [vmem:[#allocation3] sm:$0x3] %vm531_vm3, %v2597_v54 }
 0xb90   : > { %v5061_v61 = vpop.eup %5060 }
 0xb95   : > { %v2801_v39 = vld [vmem:[#allocation3] sm:$0x3] }
 0xb98   : > { %v5063_v62 = vpop.eup %5062 }
 0xb99   : > { %v2599_v63 = vmul.f32 %v5063_v62, %v5061_v61 }
 0xb9b   : > { %4059 = vst.msk [vmem:[%s3787_s23 + $0x14] sm:$0x3] %vm531_vm3, %v2599_v63  ;;  %2601 = vst.msk [vmem:[#allocation2] sm:$0x3] %vm531_vm3, %v2599_v63  ;;  %v4078_v63 = vld [vmem:[%s3799_s30 + $0x66] sm:$0x3] }
 0xba2   : > { %v2613_v0 = vld [vmem:[#allocation2] sm:$0x3] }
 0xba3   : > { %v2614_v6 = vpack.c.bf16 %v2613_v0, %v2613_v0 }
 0xba5   : > { %4682 = vmatmul.mubr.msk.bf16.vlgmr.msra.gmra.mrb[88].mxu0 %vm302_vm2, %v2614_v6  ;;  %4690 = vmatmul.mubr.msk.bf16.vlgmr.msra.gmra.mrb[88].mxu1 %vm302_vm2, %v2614_v6 }
 0xba6   : > { %4694 = vmatpush3.bf16.msra.mxu0 %v5524_v55  ;;  %4702 = vmatpush3.bf16.msra.mxu1 %v5528_v56 }
 0xba7   : > { %4695 = vmatprep.subr.bf16.mxu0 %v5201_v2  ;;  %4703 = vmatprep.subr.bf16.mxu1 %v5201_v2 }
 0xba8   : > { %4697 = vmatprep.mubr.msk.bf16.mxu0 %vm5202_vm1, %v5201_v2  ;;  %4705 = vmatprep.mubr.msk.bf16.mxu1 %vm5202_vm1, %v5201_v2 }
 0xbaa   : > { %4696 = vmatpush3.bf16.msra.mxu0 %v5538_v57  ;;  %4704 = vmatpush3.bf16.msra.mxu1 %v5589_v44 }
 0xbab   : > { %4709 = vmatprep.subr.bf16.mxu0 %v5201_v2  ;;  %4717 = vmatprep.subr.bf16.mxu1 %v5201_v2 }
 0xbad   : > { %4698 = vmatmul.mubr.msk.bf16.vlgmr.msra.gmra.mrb[92].mxu0 %vm302_vm2, %v2614_v6  ;;  %4706 = vmatmul.mubr.msk.bf16.vlgmr.msra.gmra.mrb[92].mxu1 %vm302_vm2, %v2614_v6 }
 0xbae   : > { %4710 = vmatpush3.bf16.msra.mxu0 %v5547_v58  ;;  %4718 = vmatpush3.bf16.msra.mxu1 %v5551_v59 }
 0xbaf   : > { %4711 = vmatprep.subr.bf16.mxu0 %v5201_v2  ;;  %4719 = vmatprep.subr.bf16.mxu1 %v5201_v2 }
 0xbb0   : > { %4713 = vmatprep.mubr.msk.bf16.mxu0 %vm5202_vm1, %v5201_v2  ;;  %4721 = vmatprep.mubr.msk.bf16.mxu1 %vm5202_vm1, %v5201_v2 }
 0xbb2   : > { %4712 = vmatpush3.bf16.msra.mxu0 %v5561_v11  ;;  %4720 = vmatpush3.bf16.msra.mxu1 %v5565_v60 }
 0xbb3   : > { %4725 = vmatprep.subr.bf16.mxu0 %v5201_v2  ;;  %4733 = vmatprep.subr.bf16.mxu1 %v5201_v2 }
 0xc78   : > { %v2652_v13 = vpop.f32.mrb[88].mxu0  ;;  %v2699_v14 = vpop.f32.mrb[88].mxu1 }
 0xc79   : > { %v2658_v15 = vadd.f32 %v4061_v7, %v2652_v13  ;;  %v2705_v16 = vadd.f32 %v4062_v12, %v2699_v14  ;;  %v4683_v1 = vpop.f32.mrb[89].mxu0  ;;  %v4691_v3 = vpop.f32.mrb[89].mxu1  ;;  %v4077_v14 = vld [vmem:[%s3799_s30 + $0x64] sm:$0x3] }
 0xc7a   : > { %v2655_v8 = vpop.f32.mrb[90].mxu0  ;;  %v2702_v9 = vpop.f32.mrb[90].mxu1 }
 0xc7b   : > { %v4066_v10 = vmul.f32 -1.442695, %v2658_v15  ;;  %v4068_v17 = vmul.f32 -1.442695, %v2705_v16  ;;  %v4684_v18 = vpop.f32.mrb[91].mxu0  ;;  %v4692_v19 = vpop.f32.mrb[91].mxu1 }
 0xc7d   : > { %5064 = vpow2.f32 %v4066_v10 }
 0xc7e   : > { %5066 = vpow2.f32 %v4068_v17 }
 0xc80   : > { %v2746_v21 = vpop.f32.mrb[92].mxu0  ;;  %v2788_v22 = vpop.f32.mrb[92].mxu1 }
 0xc81   : > { %v2794_v4 = vadd.f32 %v4064_v20, %v2788_v22  ;;  %v4699_v23 = vpop.f32.mrb[93].mxu0  ;;  %v4707_v5 = vpop.f32.mrb[93].mxu1  ;;  %v2752_v30 = vadd.f32 %v4063_v24, %v2746_v21 }
 0xc82   : > { %v2749_v25 = vpop.f32.mrb[94].mxu0  ;;  %v2791_v26 = vpop.f32.mrb[94].mxu1 }
 0xc83   : > { %v4700_v27 = vpop.f32.mrb[95].mxu0  ;;  %v4708_v28 = vpop.f32.mrb[95].mxu1  ;;  %v4071_v29 = vmul.f32 -1.442695, %v2794_v4 }
 0xc85   : > { %5068 = vpow2.f32 %v4071_v29 }
 0xc86   : > { %5070 = vtanh.f32 %v2752_v30 }
 0xc87   : > { %v5065_v31 = vpop.eup %5064 }
 0xc88   : > { %v5067_v32 = vpop.eup %5066  ;;  %v2662_v33 = vadd.f32 1.0, %v5065_v31 }
 0xc89   : > { %v2709_v34 = vadd.f32 1.0, %v5067_v32  ;;  %v5796_v32 = vld [vmem:[%s5260_s26 + $0x20] sm:$0xff]  }
 0xc8a   : > { %5072 = vrcp.f32 %v2662_v33  ;;  %v5800_v33 = vld [vmem:[%s5260_s26 + $0x30] sm:$0xff]  }
 0xc8b   : > { %5074 = vrcp.f32 %v2709_v34  ;;  %v5810_v34 = vld [vmem:[%s5260_s26 + $0x28] sm:$0xff]  }
 0xc8f   : > { %v5069_v35 = vpop.eup %5068 }
 0xc90   : > { %v5071_v36 = vpop.eup %5070  ;;  %v2798_v41 = vadd.f32 1.0, %v5069_v35  ;;  %v5819_v35 = vld [vmem:[%s5260_s26] sm:$0xff]  }
 0xc92   : > { %5076 = vrcp.f32 %v2798_v41 }
 0xc94   : > { %v5073_v37 = vpop.eup %5072 }
 0xc95   : > { %v5075_v38 = vpop.eup %5074  ;;  %v2803_v40 = vmul.f32 %v5073_v37, %v5071_v36  ;;  %v5823_v36 = vld [vmem:[%s5260_s26 + $0x10] sm:$0xff]   ;;  %v5837_v37 = vld [vmem:[%s5260_s26 + $0x18] sm:$0xff]  }
 0xc96   : > { %v2802_v42 = vmul.f32 %v5075_v38, %v2801_v39  ;;  %v4089_v38 = vld [vmem:[%s3807_s6 + $0x68] sm:$0x3]  ;;  %v4090_v39 = vld [vmem:[%s3807_s6 + $0x6a] sm:$0x3] }
 0xc98   : > { %v2804_v43 = vadd.f32 %v2803_v40, %v2802_v42 }
 0xc9a   : > { %5078 = vtanh.f32 %v2804_v43  ;;  %2807 = vst.msk [vmem:[#allocation3] sm:$0x3] %vm531_vm3, %v2804_v43 }
 0xc9c   : > { %v5077_v45 = vpop.eup %5076 }
 0xca1   : > { %v3008_v23 = vld [vmem:[#allocation3] sm:$0x3] }
 0xca4   : > { %v5079_v46 = vpop.eup %5078 }
 0xca5   : > { %v2806_v47 = vmul.f32 %v5079_v46, %v5077_v45 }
 0xca7   : > { %4073 = vst.msk [vmem:[%s3795_s28 + $0x16] sm:$0x3] %vm531_vm3, %v2806_v47  ;;  %2808 = vst.msk [vmem:[#allocation2] sm:$0x3] %vm531_vm3, %v2806_v47 }
 0xcae   : > { %v2820_v48 = vld [vmem:[#allocation2] sm:$0x3] }
 0xcaf   : > { %v2821_v49 = vpack.c.bf16 %v2820_v48, %v2820_v48 }
 0xcb1   : > { %4714 = vmatmul.mubr.msk.bf16.vlgmr.msra.gmra.mrb[96].mxu0 %vm302_vm2, %v2821_v49  ;;  %4722 = vmatmul.mubr.msk.bf16.vlgmr.msra.gmra.mrb[96].mxu1 %vm302_vm2, %v2821_v49 }
 0xcb2   : > { %4726 = vmatpush3.bf16.msra.mxu0 %v5524_v55  ;;  %4734 = vmatpush3.bf16.msra.mxu1 %v5528_v56  ;;  %v4075_v55 = vld [vmem:[%s3799_s30 + $0x60] sm:$0x3]  ;;  %v4076_v56 = vld [vmem:[%s3799_s30 + $0x62] sm:$0x3] }
 0xcb3   : > { %4727 = vmatprep.subr.bf16.mxu0 %v5201_v2  ;;  %4735 = vmatprep.subr.bf16.mxu1 %v5201_v2 }
 0xcb4   : > { %4729 = vmatprep.mubr.msk.bf16.mxu0 %vm5202_vm1, %v5201_v2  ;;  %4737 = vmatprep.mubr.msk.bf16.mxu1 %vm5202_vm1, %v5201_v2 }
 0xcb6   : > { %4728 = vmatpush3.bf16.msra.mxu0 %v5538_v57  ;;  %4736 = vmatpush3.bf16.msra.mxu1 %v5589_v44 }
 0xcb7   : > { %4741 = vmatprep.subr.bf16.mxu0 %v5201_v2  ;;  %4749 = vmatprep.subr.bf16.mxu1 %v5201_v2 }
 0xcb9   : > { %4730 = vmatmul.mubr.msk.bf16.vlgmr.msra.gmra.mrb[100].mxu0 %vm302_vm2, %v2821_v49  ;;  %4738 = vmatmul.mubr.msk.bf16.vlgmr.msra.gmra.mrb[100].mxu1 %vm302_vm2, %v2821_v49 }
 0xcba   : > { %4742 = vmatpush3.bf16.msra.mxu0 %v5547_v58  ;;  %4750 = vmatpush3.bf16.msra.mxu1 %v5551_v59 }
 0xcbb   : > { %4743 = vmatprep.subr.bf16.mxu0 %v5201_v2  ;;  %4751 = vmatprep.subr.bf16.mxu1 %v5201_v2 }
 0xcbc   : > { %4745 = vmatprep.mubr.msk.bf16.mxu0 %vm5202_vm1, %v5201_v2  ;;  %4753 = vmatprep.mubr.msk.bf16.mxu1 %vm5202_vm1, %v5201_v2 }
 0xcbe   : > { %4744 = vmatpush3.bf16.msra.mxu0 %v5561_v11  ;;  %4752 = vmatpush3.bf16.msra.mxu1 %v5565_v60 }
 0xcbf   : > { %4757 = vmatprep.subr.bf16.mxu0 %v5201_v2  ;;  %4765 = vmatprep.subr.bf16.mxu1 %v5201_v2 }
 0xd84   : > { %v2859_v57 = vpop.f32.mrb[96].mxu0  ;;  %v2906_v58 = vpop.f32.mrb[96].mxu1 }
 0xd85   : > { %v2865_v59 = vadd.f32 %v4075_v55, %v2859_v57  ;;  %v2912_v50 = vadd.f32 %v4076_v56, %v2906_v58  ;;  %v4715_v51 = vpop.f32.mrb[97].mxu0  ;;  %v4723_v52 = vpop.f32.mrb[97].mxu1  ;;  %v4092_v58 = vld [vmem:[%s3807_s6 + $0x6e] sm:$0x3] }
 0xd86   : > { %v2862_v53 = vpop.f32.mrb[98].mxu0  ;;  %v2909_v54 = vpop.f32.mrb[98].mxu1 }
 0xd87   : > { %v4080_v61 = vmul.f32 -1.442695, %v2865_v59  ;;  %v4082_v11 = vmul.f32 -1.442695, %v2912_v50  ;;  %v4716_v62 = vpop.f32.mrb[99].mxu0  ;;  %v4724_v60 = vpop.f32.mrb[99].mxu1 }
 0xd88   : > { %v4091_v54 = vld [vmem:[%s3807_s6 + $0x6c] sm:$0x3] }
 0xd89   : > { %5080 = vpow2.f32 %v4080_v61 }
 0xd8a   : > { %5082 = vpow2.f32 %v4082_v11 }
 0xd8c   : > { %v2953_v0 = vpop.f32.mrb[100].mxu0  ;;  %v2995_v6 = vpop.f32.mrb[100].mxu1 }
 0xd8d   : > { %v3001_v7 = vadd.f32 %v4078_v63, %v2995_v6  ;;  %v4731_v12 = vpop.f32.mrb[101].mxu0  ;;  %v4739_v13 = vpop.f32.mrb[101].mxu1  ;;  %v2959_v9 = vadd.f32 %v4077_v14, %v2953_v0 }
 0xd8e   : > { %v2956_v15 = vpop.f32.mrb[102].mxu0  ;;  %v2998_v16 = vpop.f32.mrb[102].mxu1 }
 0xd8f   : > { %v4732_v1 = vpop.f32.mrb[103].mxu0  ;;  %v4740_v3 = vpop.f32.mrb[103].mxu1  ;;  %v4085_v8 = vmul.f32 -1.442695, %v3001_v7 }
 0xd91   : > { %5084 = vpow2.f32 %v4085_v8 }
 0xd92   : > { %5086 = vtanh.f32 %v2959_v9 }
 0xd93   : > { %v5081_v10 = vpop.eup %5080 }
 0xd94   : > { %v5083_v17 = vpop.eup %5082  ;;  %v2869_v18 = vadd.f32 1.0, %v5081_v10 }
 0xd95   : > { %v2916_v19 = vadd.f32 1.0, %v5083_v17 }
 0xd96   : > { %5088 = vrcp.f32 %v2869_v18 }
 0xd97   : > { %5090 = vrcp.f32 %v2916_v19 }
 0xd9b   : > { %v5085_v20 = vpop.eup %5084 }
 0xd9c   : > { %v5087_v21 = vpop.eup %5086  ;;  %v3005_v24 = vadd.f32 1.0, %v5085_v20 }
 0xd9e   : > { %5092 = vrcp.f32 %v3005_v24 }
 0xda0   : > { %v5089_v22 = vpop.eup %5088 }
 0xda1   : > { %v5091_v4 = vpop.eup %5090  ;;  %v3010_v5 = vmul.f32 %v5089_v22, %v5087_v21 }
 0xda2   : > { %v3009_v25 = vmul.f32 %v5091_v4, %v3008_v23  ;;  %v5861_v4 = vld [vmem:[%s5260_s26 + $0x38] sm:$0xff]  }
 0xda4   : > { %v3011_v26 = vadd.f32 %v3010_v5, %v3009_v25 }
 0xda6   : > { %5094 = vtanh.f32 %v3011_v26  ;;  %3014 = vst.msk [vmem:[#allocation3] sm:$0x3] %vm531_vm3, %v3011_v26 }
 0xda8   : > { %v5093_v27 = vpop.eup %5092 }
 0xdad   : > { %v3215_v3 = vld [vmem:[#allocation3] sm:$0x3] }
 0xdb0   : > { %v5095_v28 = vpop.eup %5094 }
 0xdb1   : > { %v3013_v29 = vmul.f32 %v5095_v28, %v5093_v27 }
 0xdb3   : > { %4087 = vst.msk [vmem:[%s3803_s4 + $0x18] sm:$0x3] %vm531_vm3, %v3013_v29  ;;  %3015 = vst.msk [vmem:[#allocation2] sm:$0x3] %vm531_vm3, %v3013_v29 }
 0xdba   : > { %v3027_v30 = vld [vmem:[#allocation2] sm:$0x3] }
 0xdbb   : > { %v3028_v31 = vpack.c.bf16 %v3027_v30, %v3027_v30 }
 0xdbd   : > { %4746 = vmatmul.mubr.msk.bf16.vlgmr.msra.gmra.mrb[104].mxu0 %vm302_vm2, %v3028_v31  ;;  %4754 = vmatmul.mubr.msk.bf16.vlgmr.msra.gmra.mrb[104].mxu1 %vm302_vm2, %v3028_v31 }
 0xdbe   : > { %4758 = vmatpush3.bf16.msra.mxu0 %v5796_v32  ;;  %4766 = vmatpush3.bf16.msra.mxu1 %v5800_v33 }
 0xdbf   : > { %4759 = vmatprep.subr.bf16.mxu0 %v5201_v2  ;;  %4767 = vmatprep.subr.bf16.mxu1 %v5201_v2 }
 0xdc0   : > { %4761 = vmatprep.mubr.msk.bf16.mxu0 %vm5202_vm1, %v5201_v2  ;;  %4769 = vmatprep.mubr.msk.bf16.mxu1 %vm5202_vm1, %v5201_v2 }
 0xdc2   : > { %4760 = vmatpush3.bf16.msra.mxu0 %v5810_v34  ;;  %4768 = vmatpush3.bf16.msra.mxu1 %v5589_v44  ;;  %v5833_v44 = vld [vmem:[%s5260_s26 + $0x8] sm:$0xff]   ;;  %s4102_s26 = smul.u32 4294967192, %s5186_s10 }
 0xdc3   : > { %4773 = vmatprep.subr.bf16.mxu0 %v5201_v2  ;;  %4781 = vmatprep.subr.bf16.mxu1 %v5201_v2 }
 0xdc4   : > { %s3815_s9 = scalar_lea.vmem %s5270_s17, %s4102_s26  ;;  %s4128_s17 = smul.u32 4294967266, %s5186_s10 }
 0xdc5   : > { %4762 = vmatmul.mubr.msk.bf16.vlgmr.msra.gmra.mrb[108].mxu0 %vm302_vm2, %v3028_v31  ;;  %4770 = vmatmul.mubr.msk.bf16.vlgmr.msra.gmra.mrb[108].mxu1 %vm302_vm2, %v3028_v31  ;;  %v4103_v23 = vld [vmem:[%s3815_s9 + $0x70] sm:$0x3]  ;;  %v4104_v5 = vld [vmem:[%s3815_s9 + $0x72] sm:$0x3] }
 0xdc6   : > { %4774 = vmatpush3.bf16.msra.mxu0 %v5819_v35  ;;  %4782 = vmatpush3.bf16.msra.mxu1 %v5823_v36  ;;  %s3827_s22 = scalar_lea.vmem %s5265_s7, %s4128_s17 }
 0xdc7   : > { %4775 = vmatprep.subr.bf16.mxu0 %v5201_v2  ;;  %4783 = vmatprep.subr.bf16.mxu1 %v5201_v2 }
 0xdc8   : > { %4777 = vmatprep.mubr.msk.bf16.mxu0 %vm5202_vm1, %v5201_v2  ;;  %4785 = vmatprep.mubr.msk.bf16.mxu1 %vm5202_vm1, %v5201_v2 }
 0xdca   : > { %4776 = vmatpush3.bf16.msra.mxu0 %v5833_v44  ;;  %4784 = vmatpush3.bf16.msra.mxu1 %v5837_v37 }
 0xdcb   : > { %4789 = vmatprep.subr.bf16.mxu0 %v5201_v2  ;;  %4797 = vmatprep.subr.bf16.mxu1 %v5201_v2 }
 0xe90   : > { %v3066_v40 = vpop.f32.mrb[104].mxu0  ;;  %v3113_v41 = vpop.f32.mrb[104].mxu1 }
 0xe91   : > { %v3072_v42 = vadd.f32 %v4089_v38, %v3066_v40  ;;  %v3119_v43 = vadd.f32 %v4090_v39, %v3113_v41  ;;  %v4747_v45 = vpop.f32.mrb[105].mxu0  ;;  %v4755_v46 = vpop.f32.mrb[105].mxu1  ;;  %v4106_v38 = vld [vmem:[%s3815_s9 + $0x76] sm:$0x3] }
 0xe92   : > { %v3069_v47 = vpop.f32.mrb[106].mxu0  ;;  %v3116_v48 = vpop.f32.mrb[106].mxu1  ;;  %v4105_v45 = vld [vmem:[%s3815_s9 + $0x74] sm:$0x3] }
 0xe93   : > { %v4094_v49 = vmul.f32 -1.442695, %v3072_v42  ;;  %v4096_v55 = vmul.f32 -1.442695, %v3119_v43  ;;  %v4748_v56 = vpop.f32.mrb[107].mxu0  ;;  %v4756_v57 = vpop.f32.mrb[107].mxu1 }
 0xe95   : > { %5096 = vpow2.f32 %v4094_v49 }
 0xe96   : > { %5098 = vpow2.f32 %v4096_v55 }
 0xe98   : > { %v3160_v59 = vpop.f32.mrb[108].mxu0  ;;  %v3202_v50 = vpop.f32.mrb[108].mxu1 }
 0xe99   : > { %v3208_v51 = vadd.f32 %v4092_v58, %v3202_v50  ;;  %v4763_v52 = vpop.f32.mrb[109].mxu0  ;;  %v4771_v53 = vpop.f32.mrb[109].mxu1  ;;  %v3166_v0 = vadd.f32 %v4091_v54, %v3160_v59 }
 0xe9a   : > { %v3163_v61 = vpop.f32.mrb[110].mxu0  ;;  %v3205_v11 = vpop.f32.mrb[110].mxu1 }
 0xe9b   : > { %v4764_v62 = vpop.f32.mrb[111].mxu0  ;;  %v4772_v60 = vpop.f32.mrb[111].mxu1  ;;  %v4099_v63 = vmul.f32 -1.442695, %v3208_v51 }
 0xe9d   : > { %5100 = vpow2.f32 %v4099_v63 }
 0xe9e   : > { %5102 = vtanh.f32 %v3166_v0 }
 0xe9f   : > { %v5097_v6 = vpop.eup %5096 }
 0xea0   : > { %v5099_v7 = vpop.eup %5098  ;;  %v3076_v12 = vadd.f32 1.0, %v5097_v6 }
 0xea1   : > { %v3123_v13 = vadd.f32 1.0, %v5099_v7 }
 0xea2   : > { %5104 = vrcp.f32 %v3076_v12 }
 0xea3   : > { %5106 = vrcp.f32 %v3123_v13 }
 0xea7   : > { %v5101_v14 = vpop.eup %5100 }
 0xea8   : > { %v5103_v15 = vpop.eup %5102  ;;  %v3212_v9 = vadd.f32 1.0, %v5101_v14 }
 0xeaa   : > { %5108 = vrcp.f32 %v3212_v9 }
 0xeac   : > { %v5105_v16 = vpop.eup %5104 }
 0xead   : > { %v5107_v1 = vpop.eup %5106  ;;  %v3217_v8 = vmul.f32 %v5105_v16, %v5103_v15 }
 0xeae   : > { %v3216_v10 = vmul.f32 %v5107_v1, %v3215_v3 }
 0xeb0   : > { %v3218_v17 = vadd.f32 %v3217_v8, %v3216_v10 }
 0xeb2   : > { %5110 = vtanh.f32 %v3218_v17  ;;  %3221 = vst.msk [vmem:[#allocation3] sm:$0x3] %vm531_vm3, %v3218_v17 }
 0xeb4   : > { %v5109_v18 = vpop.eup %5108 }
 0xeb9   : > { %v3422_v61 = vld [vmem:[#allocation3] sm:$0x3] }
 0xebc   : > { %v5111_v19 = vpop.eup %5110 }
 0xebd   : > { %v3220_v20 = vmul.f32 %v5111_v19, %v5109_v18  ;;  %v4120_v19 = vld [vmem:[%s3823_s21 + $0x7e] sm:$0x3] }
 0xebf   : > { %4101 = vst.msk [vmem:[%s3811_s16 + $0x1a] sm:$0x3] %vm531_vm3, %v3220_v20  ;;  %3222 = vst.msk [vmem:[#allocation2] sm:$0x3] %vm531_vm3, %v3220_v20 }
 0xec6   : > { %v3234_v21 = vld [vmem:[#allocation2] sm:$0x3] }
 0xec7   : > { %v3235_v22 = vpack.c.bf16 %v3234_v21, %v3234_v21 }
 0xec9   : > { %4778 = vmatmul.mubr.msk.bf16.vlgmr.msra.gmra.mrb[112].mxu0 %vm302_vm2, %v3235_v22  ;;  %4786 = vmatmul.mubr.msk.bf16.vlgmr.msra.gmra.mrb[112].mxu1 %vm302_vm2, %v3235_v22 }
 0xeca   : > { %4790 = vmatpush3.bf16.msra.mxu0 %v5796_v32  ;;  %4798 = vmatpush3.bf16.msra.mxu1 %v5800_v33 }
 0xecb   : > { %4791 = vmatprep.subr.bf16.mxu0 %v5201_v2  ;;  %4799 = vmatprep.subr.bf16.mxu1 %v5201_v2 }
 0xecc   : > { %4793 = vmatprep.mubr.msk.bf16.mxu0 %vm5202_vm1, %v5201_v2  ;;  %4801 = vmatprep.mubr.msk.bf16.mxu1 %vm5202_vm1, %v5201_v2 }
 0xece   : > { %4792 = vmatpush3.bf16.msra.mxu0 %v5810_v34  ;;  %4800 = vmatpush3.bf16.msra.mxu1 %v5861_v4 }
 0xecf   : > { %4805 = vmatprep.subr.bf16.mxu0 %v5201_v2  ;;  %4813 = vmatprep.subr.bf16.mxu1 %v5201_v2 }
 0xed1   : > { %4794 = vmatmul.mubr.msk.bf16.vlgmr.msra.gmra.mrb[116].mxu0 %vm302_vm2, %v3235_v22  ;;  %4802 = vmatmul.mubr.msk.bf16.vlgmr.msra.gmra.mrb[116].mxu1 %vm302_vm2, %v3235_v22 }
 0xed2   : > { %4806 = vmatpush3.bf16.msra.mxu0 %v5819_v35  ;;  %4814 = vmatpush3.bf16.msra.mxu1 %v5823_v36 }
 0xed3   : > { %4807 = vmatprep.subr.bf16.mxu0 %v5201_v2  ;;  %4815 = vmatprep.subr.bf16.mxu1 %v5201_v2 }
 0xed4   : > { %4809 = vmatprep.mubr.msk.bf16.mxu0 %vm5202_vm1, %v5201_v2  ;;  %4817 = vmatprep.mubr.msk.bf16.mxu1 %vm5202_vm1, %v5201_v2 }
 0xed6   : > { %4808 = vmatpush3.bf16.msra.mxu0 %v5833_v44  ;;  %4816 = vmatpush3.bf16.msra.mxu1 %v5837_v37 }
 0xed7   : > { %4821 = vmatprep.subr.bf16.mxu0 %v5201_v2  ;;  %4829 = vmatprep.subr.bf16.mxu1 %v5201_v2 }
 0xf9c   : > { %v3273_v24 = vpop.f32.mrb[112].mxu0  ;;  %v3320_v25 = vpop.f32.mrb[112].mxu1 }
 0xf9d   : > { %v3279_v26 = vadd.f32 %v4103_v23, %v3273_v24  ;;  %v3326_v27 = vadd.f32 %v4104_v5, %v3320_v25  ;;  %v4779_v28 = vpop.f32.mrb[113].mxu0  ;;  %v4787_v29 = vpop.f32.mrb[113].mxu1  ;;  %v4119_v5 = vld [vmem:[%s3823_s21 + $0x7c] sm:$0x3] }
 0xf9e   : > { %v3276_v30 = vpop.f32.mrb[114].mxu0  ;;  %v3323_v31 = vpop.f32.mrb[114].mxu1 }
 0xf9f   : > { %v4108_v35 = vmul.f32 -1.442695, %v3279_v26  ;;  %v4110_v36 = vmul.f32 -1.442695, %v3326_v27  ;;  %v4780_v44 = vpop.f32.mrb[115].mxu0  ;;  %v4788_v37 = vpop.f32.mrb[115].mxu1 }
 0xfa1   : > { %5112 = vpow2.f32 %v4108_v35 }
 0xfa2   : > { %5114 = vpow2.f32 %v4110_v36 }
 0xfa4   : > { %v3367_v39 = vpop.f32.mrb[116].mxu0  ;;  %v3409_v40 = vpop.f32.mrb[116].mxu1 }
 0xfa5   : > { %v3415_v41 = vadd.f32 %v4106_v38, %v3409_v40  ;;  %v4795_v42 = vpop.f32.mrb[117].mxu0  ;;  %v4803_v43 = vpop.f32.mrb[117].mxu1  ;;  %v3373_v56 = vadd.f32 %v4105_v45, %v3367_v39 }
 0xfa6   : > { %v3370_v46 = vpop.f32.mrb[118].mxu0  ;;  %v3412_v47 = vpop.f32.mrb[118].mxu1 }
 0xfa7   : > { %v4796_v48 = vpop.f32.mrb[119].mxu0  ;;  %v4804_v49 = vpop.f32.mrb[119].mxu1  ;;  %v4113_v55 = vmul.f32 -1.442695, %v3415_v41 }
 0xfa9   : > { %5116 = vpow2.f32 %v4113_v55 }
 0xfaa   : > { %5118 = vtanh.f32 %v3373_v56 }
 0xfab   : > { %v5113_v57 = vpop.eup %5112 }
 0xfac   : > { %v5115_v58 = vpop.eup %5114  ;;  %v3283_v59 = vadd.f32 1.0, %v5113_v57 }
 0xfad   : > { %v3330_v50 = vadd.f32 1.0, %v5115_v58 }
 0xfae   : > { %5120 = vrcp.f32 %v3283_v59 }
 0xfaf   : > { %5122 = vrcp.f32 %v3330_v50 }
 0xfb3   : > { %v5117_v51 = vpop.eup %5116 }
 0xfb4   : > { %v5119_v52 = vpop.eup %5118  ;;  %v3419_v62 = vadd.f32 1.0, %v5117_v51 }
 0xfb6   : > { %5124 = vrcp.f32 %v3419_v62 }
 0xfb8   : > { %v5121_v53 = vpop.eup %5120 }
 0xfb9   : > { %v5123_v54 = vpop.eup %5122  ;;  %v3424_v11 = vmul.f32 %v5121_v53, %v5119_v52 }
 0xfba   : > { %v3423_v60 = vmul.f32 %v5123_v54, %v3422_v61 }
 0xfbc   : > { %v3425_v63 = vadd.f32 %v3424_v11, %v3423_v60 }
 0xfbe   : > { %5126 = vtanh.f32 %v3425_v63  ;;  %3428 = vst.msk [vmem:[#allocation3] sm:$0x3] %vm531_vm3, %v3425_v63 }
 0xfc0   : > { %v5125_v0 = vpop.eup %5124 }
 0xfc5   : > { %v3629_v40 = vld [vmem:[#allocation3] sm:$0x3] }
 0xfc8   : > { %v5127_v6 = vpop.eup %5126 }
 0xfc9   : > { %v3427_v7 = vmul.f32 %v5127_v6, %v5125_v0 }
 0xfcb   : > { %4115 = vst.msk [vmem:[%s3819_s19 + $0x1c] sm:$0x3] %vm531_vm3, %v3427_v7  ;;  %3429 = vst.msk [vmem:[#allocation2] sm:$0x3] %vm531_vm3, %v3427_v7 }
 0xfd2   : > { %v3441_v12 = vld [vmem:[#allocation2] sm:$0x3] }
 0xfd3   : > { %v3442_v13 = vpack.c.bf16 %v3441_v12, %v3441_v12 }
 0xfd5   : > { %4810 = vmatmul.mubr.msk.bf16.vlgmr.msra.gmra.mrb[120].mxu0 %vm302_vm2, %v3442_v13  ;;  %4818 = vmatmul.mubr.msk.bf16.vlgmr.msra.gmra.mrb[120].mxu1 %vm302_vm2, %v3442_v13 }
 0xfd6   : > { %4822 = vmatpush3.bf16.msra.mxu0 %v5796_v32  ;;  %4830 = vmatpush3.bf16.msra.mxu1 %v5800_v33  ;;  %v4117_v32 = vld [vmem:[%s3823_s21 + $0x78] sm:$0x3]  ;;  %v4118_v33 = vld [vmem:[%s3823_s21 + $0x7a] sm:$0x3] }
 0xfd7   : > { %4823 = vmatprep.subr.bf16.mxu0 %v5201_v2  ;;  %4831 = vmatprep.subr.bf16.mxu1 %v5201_v2 }
 0xfd8   : > { %4825 = vmatprep.mubr.msk.bf16.mxu0 %vm5202_vm1, %v5201_v2  ;;  %4833 = vmatprep.mubr.msk.bf16.mxu1 %vm5202_vm1, %v5201_v2 }
 0xfda   : > { %4824 = vmatpush3.bf16.msra.mxu0 %v5810_v34  ;;  %4832 = vmatpush3.bf16.msra.mxu1 %v5861_v4 }
 0xfdd   : > { %4826 = vmatmul.mubr.msk.bf16.vlgmr.msra.gmra.mrb[124].mxu0 %vm302_vm2, %v3442_v13  ;;  %4834 = vmatmul.mubr.msk.bf16.vlgmr.msra.gmra.mrb[124].mxu1 %vm302_vm2, %v3442_v13 }
0x10a8   : > { %v3480_v14 = vpop.f32.mrb[120].mxu0  ;;  %v3527_v15 = vpop.f32.mrb[120].mxu1 }
0x10a9   : > { %v3486_v16 = vadd.f32 %v4117_v32, %v3480_v14  ;;  %v3533_v1 = vadd.f32 %v4118_v33, %v3527_v15  ;;  %v4811_v3 = vpop.f32.mrb[121].mxu0  ;;  %v4819_v8 = vpop.f32.mrb[121].mxu1 }
0x10aa   : > { %v3483_v9 = vpop.f32.mrb[122].mxu0  ;;  %v3530_v2 = vpop.f32.mrb[122].mxu1 }
0x10ab   : > { %v4122_v10 = vmul.f32 -1.442695, %v3486_v16  ;;  %v4124_v34 = vmul.f32 -1.442695, %v3533_v1  ;;  %v4812_v17 = vpop.f32.mrb[123].mxu0  ;;  %v4820_v18 = vpop.f32.mrb[123].mxu1 }
0x10ad   : > { %5128 = vpow2.f32 %v4122_v10 }
0x10ae   : > { %5130 = vpow2.f32 %v4124_v34 }
0x10b0   : > { %v3574_v20 = vpop.f32.mrb[124].mxu0  ;;  %v3616_v21 = vpop.f32.mrb[124].mxu1 }
0x10b1   : > { %v3622_v22 = vadd.f32 %v4120_v19, %v3616_v21  ;;  %v4827_v4 = vpop.f32.mrb[125].mxu0  ;;  %v4835_v23 = vpop.f32.mrb[125].mxu1  ;;  %v3580_v29 = vadd.f32 %v4119_v5, %v3574_v20 }
0x10b2   : > { %v3577_v24 = vpop.f32.mrb[126].mxu0  ;;  %v3619_v25 = vpop.f32.mrb[126].mxu1 }
0x10b3   : > { %v4828_v26 = vpop.f32.mrb[127].mxu0  ;;  %v4836_v27 = vpop.f32.mrb[127].mxu1  ;;  %v4127_v28 = vmul.f32 -1.442695, %v3622_v22 }
0x10b5   : > { %5132 = vpow2.f32 %v4127_v28 }
0x10b6   : > { %5134 = vtanh.f32 %v3580_v29 }
0x10b7   : > { %v5129_v30 = vpop.eup %5128 }
0x10b8   : > { %v5131_v31 = vpop.eup %5130  ;;  %v3490_v35 = vadd.f32 1.0, %v5129_v30 }
0x10b9   : > { %v3537_v36 = vadd.f32 1.0, %v5131_v31 }
0x10ba   : > { %5136 = vrcp.f32 %v3490_v35 }
0x10bb   : > { %5138 = vrcp.f32 %v3537_v36 }
0x10bf   : > { %v5133_v44 = vpop.eup %5132 }
0x10c0   : > { %v5135_v37 = vpop.eup %5134  ;;  %v3626_v42 = vadd.f32 1.0, %v5133_v44 }
0x10c2   : > { %5140 = vrcp.f32 %v3626_v42 }
0x10c4   : > { %v5137_v38 = vpop.eup %5136 }
0x10c5   : > { %v5139_v39 = vpop.eup %5138  ;;  %v3631_v41 = vmul.f32 %v5137_v38, %v5135_v37 }
0x10c6   : > { %v3630_v43 = vmul.f32 %v5139_v39, %v3629_v40 }
0x10c8   : > { %v3632_v45 = vadd.f32 %v3631_v41, %v3630_v43 }
0x10ca   : > { %5142 = vtanh.f32 %v3632_v45  ;;  %3635 = vst.msk [vmem:[#allocation3] sm:$0x3] %vm531_vm3, %v3632_v45 }
0x10cc   : > { %v5141_v46 = vpop.eup %5140 }
0x10d4   : > { %v5143_v47 = vpop.eup %5142 }
0x10d5   : > { %v3634_v48 = vmul.f32 %v5143_v47, %v5141_v46 }
0x10d7   : > { %3636 = vst.msk [vmem:[#allocation2] sm:$0x3] %vm531_vm3, %v3634_v48  ;;  %4129 = vst.msk [vmem:[%s3827_s22 + $0x1e] sm:$0x3] %vm531_vm3, %v3634_v48 }
0x10d8 PF: > { %s12_s13 = sadd.s32 1, %s5198_s13   ;;  %s5926_s9 = smov %s5190_s11 }
0x10d9   : > { %p9_p8 = scmp.ge.s32.totalorder %s12_s13, 6   ;;  %s5927_s10 = smov %s5194_s12 }
0x10da   : > { %s5928_s11 = smov %s5931_s14  ;;  %s5929_s12 = smov %s5935_s15 }
0x10db   :  { %11 = sbr.rel (!%p9_p8) target bundleno = 3 (0x3), region = 100 }

</bundles_post_ra>
